<compile_context>
chip_gen: v7x
topology: tpu7x:2x2x1
jax: 0.10.0
libtpu: 0.0.40
codegen_flags: <defaults>
</compile_context>

<pallas_src>
import functools

import jax
import jax.numpy as jnp
from jax.experimental import pallas as pl
from jax.experimental.pallas import tpu as pltpu


def _round_up(v, m):
    return ((v + m - 1) // m) * m


def _dense_layer_kernel(x_ref, s1_ref, b1_ref, w1_ref, s2_ref, b2_ref, w2_ref,
                        ml_ref, mr_ref, o_ref, pad_ref, *, H, W, S_INT, PAD_ROWS):
    """One batch element: BN1+ReLU -> 1x1 conv -> BN2+ReLU -> 3x3 conv (pad=1).

    pad_ref is a flattened, row-padded staging buffer of shape (PAD_ROWS, Cm_p):
      rows [S_INT, S_INT + H*W)      : the post-BN2 activation, row-major (y, x)
      rows [0, S_INT) and the tail   : zeros (provide the top/bottom conv padding)
    Tap (dy, dx) of the 3x3 conv is then the contiguous slab starting at
    S_INT + (dy-1)*W + (dx-1); the wrap-around at the left/right image edge is
    killed by the {0,1} column masks ml/mr.
    """
    HW = H * W
    Cm_p = pad_ref.shape[1]

    # ---- BN1 (folded affine) + ReLU, f32 ---------------------------------
    x = x_ref[0]                                           # (HW, Ci_p) f32
    a1 = jnp.maximum(x * s1_ref[...] + b1_ref[...], 0.0)

    # ---- conv1: 1x1 conv == channel matmul on the MXU (bf16 operands) ----
    h = jnp.dot(a1.astype(jnp.bfloat16), w1_ref[...],
                preferred_element_type=jnp.float32)        # (HW, Cm_p) f32

    # ---- BN2 (folded affine) + ReLU ---------------------------------------
    a2 = jnp.maximum(h * s2_ref[...] + b2_ref[...], 0.0)

    # ---- stage into the row-padded scratch (bf16) --------------------------
    # Zero only the border rows (a few image rows worth), every step; cheap and
    # safe under megacore sharding of the batch grid axis.
    pad_ref[0:S_INT, :] = jnp.zeros((S_INT, Cm_p), jnp.bfloat16)
    pad_ref[S_INT + HW:PAD_ROWS, :] = jnp.zeros((PAD_ROWS - S_INT - HW, Cm_p),
                                                jnp.bfloat16)
    pad_ref[S_INT:S_INT + HW, :] = a2.astype(jnp.bfloat16)

    # ---- conv2: 3x3, stride 1, padding 1, no bias --------------------------
    # 9 full-lane slab matmuls accumulated directly into the resident f32
    # output block (lane-dense since C_out is padded to 128).
    first = True
    for dy in range(3):
        base = S_INT + (dy - 1) * W - 1
        for dx in range(3):
            win = pad_ref[base + dx:base + dx + HW, :]     # (HW, Cm_p) bf16
            if dx == 0:
                win = win * ml_ref[...]                    # zero column x == 0
            elif dx == 2:
                win = win * mr_ref[...]                    # zero column x == W-1
            contrib = jnp.dot(win, w2_ref[dy * 3 + dx],
                              preferred_element_type=jnp.float32)
            if first:
                o_ref[0] = contrib
                first = False
            else:
                o_ref[0] += contrib


def dense_layer_forward(inputs_nchw, params, *, eps=1e-5):
    """Pallas implementation of _DenseLayer.forward.

    inputs_nchw: list of arrays, each (N, C_i, H, W) — concatenated on channels.
    params: dict with BN params, conv1 weight (C_mid, C_in, 1, 1) and
            conv2 weight (C_out, C_mid, 3, 3) in PyTorch layout.
    Returns (N, C_out, H, W) float32.
    """
    x = jnp.concatenate(list(inputs_nchw), axis=1)              # torch.cat(inputs, 1)
    x = jnp.transpose(x, (0, 2, 3, 1)).astype(jnp.float32)      # NCHW -> NHWC
    N, H, W, C_in = x.shape
    C_mid = params["w1"].shape[0]
    C_out = params["w2"].shape[0]
    HW = H * W

    LANES = 128
    Ci_p = _round_up(C_in, LANES)
    Cm_p = _round_up(C_mid, LANES)
    Co_p = _round_up(C_out, LANES)

    # Zero-pad channels to full 128-lane multiples (exact: padded channels get
    # zero scale/bias/weights so they contribute nothing), flatten spatial dims.
    x = jnp.pad(x, ((0, 0), (0, 0), (0, 0), (0, Ci_p - C_in)))
    x = x.reshape(N, HW, Ci_p)

    # Fold BN1 / BN2 into scale & bias (inference form).
    s1 = (params["gamma1"] / jnp.sqrt(params["var1"] + eps)).astype(jnp.float32)
    b1 = (params["beta1"] - params["mean1"] * s1).astype(jnp.float32)
    s2 = (params["gamma2"] / jnp.sqrt(params["var2"] + eps)).astype(jnp.float32)
    b2 = (params["beta2"] - params["mean2"] * s2).astype(jnp.float32)
    s1 = jnp.pad(s1, (0, Ci_p - C_in)).reshape(1, Ci_p)
    b1 = jnp.pad(b1, (0, Ci_p - C_in)).reshape(1, Ci_p)
    s2 = jnp.pad(s2, (0, Cm_p - C_mid)).reshape(1, Cm_p)
    b2 = jnp.pad(b2, (0, Cm_p - C_mid)).reshape(1, Cm_p)

    # conv1 weight (C_mid, C_in, 1, 1) -> (Ci_p, Cm_p), bf16 MXU operand.
    w1 = jnp.transpose(params["w1"][:, :, 0, 0], (1, 0))
    w1 = jnp.pad(w1, ((0, Ci_p - C_in), (0, Cm_p - C_mid))).astype(jnp.bfloat16)

    # conv2 weight (C_out, C_mid, 3, 3) -> (9, Cm_p, Co_p), bf16.
    w2 = jnp.transpose(params["w2"], (2, 3, 1, 0)).reshape(9, C_mid, C_out)
    w2 = jnp.pad(w2, ((0, 0), (0, Cm_p - C_mid), (0, Co_p - C_out)))
    w2 = w2.astype(jnp.bfloat16)

    # Column-edge masks for the dx = -1 / +1 taps ({0,1} bf16, broadcast over lanes).
    xcol = jnp.arange(HW, dtype=jnp.int32) % W
    mask_l = (xcol != 0).astype(jnp.bfloat16).reshape(HW, 1)
    mask_r = (xcol != (W - 1)).astype(jnp.bfloat16).reshape(HW, 1)

    # Flattened, row-padded staging-buffer geometry (16-row alignment so the
    # interior store stays aligned for packed bf16).
    S_INT = _round_up(W + 1, 16)
    PAD_ROWS = _round_up(S_INT + HW + W + 1, 16)

    kernel = functools.partial(_dense_layer_kernel,
                               H=H, W=W, S_INT=S_INT, PAD_ROWS=PAD_ROWS)

    # VMEM budget derived from actual block sizes (inputs/outputs are
    # double-buffered by the pipeline); clamp to a range that is safe on
    # v5e (16 MiB default scoped) through v7x (64 MiB physical).
    block_bytes = (HW * Ci_p * 4 +            # x block (f32)
                   HW * Co_p * 4 +            # out block (f32)
                   2 * Ci_p * 4 + 2 * Cm_p * 4 +   # BN scale/bias
                   Ci_p * Cm_p * 2 +          # w1 (bf16)
                   9 * Cm_p * Co_p * 2 +      # w2 (bf16)
                   2 * HW * 2)                # edge masks (bf16)
    scratch_bytes = PAD_ROWS * Cm_p * 2
    vmem_limit = int(min(max(2 * block_bytes + scratch_bytes + (4 << 20),
                             16 << 20), 32 << 20))

    out = pl.pallas_call(
        kernel,
        out_shape=jax.ShapeDtypeStruct((N, HW, Co_p), jnp.float32),
        grid_spec=pltpu.PrefetchScalarGridSpec(
            num_scalar_prefetch=0,
            grid=(N,),
            in_specs=[
                pl.BlockSpec((1, HW, Ci_p), lambda n: (n, 0, 0)),    # x
                pl.BlockSpec((1, Ci_p), lambda n: (0, 0)),           # s1
                pl.BlockSpec((1, Ci_p), lambda n: (0, 0)),           # b1
                pl.BlockSpec((Ci_p, Cm_p), lambda n: (0, 0)),        # w1
                pl.BlockSpec((1, Cm_p), lambda n: (0, 0)),           # s2
                pl.BlockSpec((1, Cm_p), lambda n: (0, 0)),           # b2
                pl.BlockSpec((9, Cm_p, Co_p), lambda n: (0, 0, 0)),  # w2
                pl.BlockSpec((HW, 1), lambda n: (0, 0)),             # mask_l
                pl.BlockSpec((HW, 1), lambda n: (0, 0)),             # mask_r
            ],
            out_specs=pl.BlockSpec((1, HW, Co_p), lambda n: (n, 0, 0)),
            scratch_shapes=[pltpu.VMEM((PAD_ROWS, Cm_p), jnp.bfloat16)],
        ),
        compiler_params=pltpu.CompilerParams(
            dimension_semantics=("parallel",),
            vmem_limit_bytes=vmem_limit),
    )(x, s1, b1, w1, s2, b2, w2, mask_l, mask_r)

    # Strip C_out padding, restore NCHW.
    out = out[:, :, :C_out].reshape(N, H, W, C_out)
    return jnp.transpose(out, (0, 3, 1, 2))


def _reference_forward(inputs_nchw, params, *, eps=1e-5):
    """Pure-JAX f32 reference of the PyTorch module (folded inference BN)."""
    x = jnp.concatenate(list(inputs_nchw), axis=1).astype(jnp.float32)
    s1 = params["gamma1"] / jnp.sqrt(params["var1"] + eps)
    b1 = params["beta1"] - params["mean1"] * s1
    t = jax.nn.relu(x * s1[None, :, None, None] + b1[None, :, None, None])
    t = jax.lax.conv_general_dilated(
        t, params["w1"].astype(jnp.float32), (1, 1), "VALID",
        dimension_numbers=("NCHW", "OIHW", "NCHW"),
        precision=jax.lax.Precision.HIGHEST)
    s2 = params["gamma2"] / jnp.sqrt(params["var2"] + eps)
    b2 = params["beta2"] - params["mean2"] * s2
    t = jax.nn.relu(t * s2[None, :, None, None] + b2[None, :, None, None])
    t = jax.lax.conv_general_dilated(
        t, params["w2"].astype(jnp.float32), (1, 1), ((1, 1), (1, 1)),
        dimension_numbers=("NCHW", "OIHW", "NCHW"),
        precision=jax.lax.Precision.HIGHEST)
    return t


def _init_params(key, num_input_features, growth_rate, bn_size):
    """Deterministic synthetic parameters matching _DenseLayer.__init__ shapes."""
    C_in = num_input_features
    C_mid = bn_size * growth_rate
    C_out = growth_rate
    ks = jax.random.split(key, 10)
    return {
        "gamma1": 1.0 + 0.05 * jax.random.normal(ks[0], (C_in,), jnp.float32),
        "beta1": 0.05 * jax.random.normal(ks[1], (C_in,), jnp.float32),
        "mean1": 0.1 * jax.random.normal(ks[2], (C_in,), jnp.float32),
        "var1": jnp.abs(1.0 + 0.1 * jax.random.normal(ks[3], (C_in,), jnp.float32)),
        "w1": 0.1 * jax.random.normal(ks[4], (C_mid, C_in, 1, 1), jnp.float32),
        "gamma2": 1.0 + 0.05 * jax.random.normal(ks[5], (C_mid,), jnp.float32),
        "beta2": 0.05 * jax.random.normal(ks[6], (C_mid,), jnp.float32),
        "mean2": 0.1 * jax.random.normal(ks[7], (C_mid,), jnp.float32),
        "var2": jnp.abs(1.0 + 0.1 * jax.random.normal(ks[8], (C_mid,), jnp.float32)),
        "w2": 0.1 * jax.random.normal(ks[9], (C_out, C_mid, 3, 3), jnp.float32),
    }


if __name__ == "__main__":
    # Small shapes consistent with the module: two feature maps of 4 channels
    # each (DenseNet "inputs" list), so num_input_features = 8.
    N, H, W = 2, 16, 16
    growth_rate, bn_size = 8, 4
    num_input_features = 8

    key = jax.random.PRNGKey(0)
    k_x1, k_x2, k_p = jax.random.split(key, 3)
    x1 = jax.random.normal(k_x1, (N, 4, H, W), jnp.float32)
    x2 = jax.random.normal(k_x2, (N, 4, H, W), jnp.float32)

    params = _init_params(k_p, num_input_features, growth_rate, bn_size)

    out = dense_layer_forward([x1, x2], params)
    out = jax.block_until_ready(out)
    assert out.shape == (N, growth_rate, H, W), out.shape

    ref = _reference_forward([x1, x2], params)
    max_err = float(jnp.max(jnp.abs(out - ref)))
    assert max_err < 5e-2, f"max abs error vs reference: {max_err}"

    print("KERNEL_OK")
</pallas_src>

<mosaic_0001>
module attributes {stable_mosaic.version = 11 : i64} {
  func.func @_dense_layer_kernel(%arg0: i32, %arg1: memref<1x256x128xf32, #tpu.memory_space<vmem>>, %arg2: memref<1x128xf32, #tpu.memory_space<vmem>>, %arg3: memref<1x128xf32, #tpu.memory_space<vmem>>, %arg4: memref<128x128xbf16, #tpu.memory_space<vmem>>, %arg5: memref<1x128xf32, #tpu.memory_space<vmem>>, %arg6: memref<1x128xf32, #tpu.memory_space<vmem>>, %arg7: memref<9x128x128xbf16, #tpu.memory_space<vmem>>, %arg8: memref<256x1xbf16, #tpu.memory_space<vmem>>, %arg9: memref<256x1xbf16, #tpu.memory_space<vmem>>, %arg10: memref<1x256x128xf32, #tpu.memory_space<vmem>>, %arg11: memref<320x128xbf16, #tpu.memory_space<vmem>>) attributes {dimension_semantics = [#tpu.dimension_semantics<parallel>], iteration_bounds = array<i64: 2>, scalar_prefetch = 0 : i64, scratch_operands = 1 : i64, tpu.core_type = #tpu.core_type<tc>, window_params = [{transform_indices = @transform_0, window_bounds = array<i64: 1, 256, 128>}, {pipeline_mode = #tpu.pipeline_mode<synchronous>, transform_indices = @transform_1, window_bounds = array<i64: 1, 128>}, {pipeline_mode = #tpu.pipeline_mode<synchronous>, transform_indices = @transform_2, window_bounds = array<i64: 1, 128>}, {pipeline_mode = #tpu.pipeline_mode<synchronous>, transform_indices = @transform_3, window_bounds = array<i64: 128, 128>}, {pipeline_mode = #tpu.pipeline_mode<synchronous>, transform_indices = @transform_4, window_bounds = array<i64: 1, 128>}, {pipeline_mode = #tpu.pipeline_mode<synchronous>, transform_indices = @transform_5, window_bounds = array<i64: 1, 128>}, {pipeline_mode = #tpu.pipeline_mode<synchronous>, transform_indices = @transform_6, window_bounds = array<i64: 9, 128, 128>}, {pipeline_mode = #tpu.pipeline_mode<synchronous>, transform_indices = @transform_7, window_bounds = array<i64: 256, 1>}, {pipeline_mode = #tpu.pipeline_mode<synchronous>, transform_indices = @transform_8, window_bounds = array<i64: 256, 1>}, {transform_indices = @transform_9, window_bounds = array<i64: 1, 256, 128>}]} {
    %c0 = arith.constant 0 : index
    %c0_0 = arith.constant 0 : index
    %c0_1 = arith.constant 0 : index
    %0 = vector.load %arg1[%c0, %c0_0, %c0_1] : memref<1x256x128xf32, #tpu.memory_space<vmem>>, vector<1x256x128xf32>
    %1 = vector.shape_cast %0 : vector<1x256x128xf32> to vector<256x128xf32>
    %c0_2 = arith.constant 0 : index
    %c0_3 = arith.constant 0 : index
    %2 = vector.load %arg2[%c0_2, %c0_3] : memref<1x128xf32, #tpu.memory_space<vmem>>, vector<1x128xf32>
    %3 = vector.broadcast %2 : vector<1x128xf32> to vector<256x128xf32>
    %4 = arith.mulf %1, %3 : vector<256x128xf32>
    %c0_4 = arith.constant 0 : index
    %c0_5 = arith.constant 0 : index
    %5 = vector.load %arg3[%c0_4, %c0_5] : memref<1x128xf32, #tpu.memory_space<vmem>>, vector<1x128xf32>
    %6 = vector.broadcast %5 : vector<1x128xf32> to vector<256x128xf32>
    %7 = arith.addf %4, %6 : vector<256x128xf32>
    %cst = arith.constant 0.000000e+00 : f32
    %8 = vector.broadcast %cst : f32 to vector<256x128xf32>
    %9 = arith.maximumf %7, %8 : vector<256x128xf32>
    %10 = arith.truncf %9 : vector<256x128xf32> to vector<256x128xbf16>
    %c0_6 = arith.constant 0 : index
    %c0_7 = arith.constant 0 : index
    %11 = vector.load %arg4[%c0_6, %c0_7] : memref<128x128xbf16, #tpu.memory_space<vmem>>, vector<128x128xbf16>
    %cst_8 = arith.constant dense<0.000000e+00> : vector<256x128xf32>
    %12 = tpu.matmul %10, %11, %cst_8 {dimension_numbers = #tpu.dot_dimension_numbers<[1], [0], [0], [1], [0, 0, 1, 1], [], []>} : vector<256x128xbf16>, vector<128x128xbf16>, vector<256x128xf32> -> vector<256x128xf32>
    %c0_9 = arith.constant 0 : index
    %c0_10 = arith.constant 0 : index
    %13 = vector.load %arg5[%c0_9, %c0_10] : memref<1x128xf32, #tpu.memory_space<vmem>>, vector<1x128xf32>
    %14 = vector.broadcast %13 : vector<1x128xf32> to vector<256x128xf32>
    %15 = arith.mulf %12, %14 : vector<256x128xf32>
    %c0_11 = arith.constant 0 : index
    %c0_12 = arith.constant 0 : index
    %16 = vector.load %arg6[%c0_11, %c0_12] : memref<1x128xf32, #tpu.memory_space<vmem>>, vector<1x128xf32>
    %17 = vector.broadcast %16 : vector<1x128xf32> to vector<256x128xf32>
    %18 = arith.addf %15, %17 : vector<256x128xf32>
    %cst_13 = arith.constant 0.000000e+00 : f32
    %19 = vector.broadcast %cst_13 : f32 to vector<256x128xf32>
    %20 = arith.maximumf %18, %19 : vector<256x128xf32>
    %cst_14 = arith.constant 0.000000e+00 : bf16
    %21 = vector.broadcast %cst_14 : bf16 to vector<32x128xbf16>
    %c0_15 = arith.constant 0 : index
    %c0_16 = arith.constant 0 : index
    %22 = vector.load %arg11[%c0_15, %c0_16] : memref<320x128xbf16, #tpu.memory_space<vmem>>, vector<32x128xbf16>
    tpu.vector_store %arg11[%c0_15, %c0_16], %21 {strides = array<i32>} : memref<320x128xbf16, #tpu.memory_space<vmem>>, vector<32x128xbf16>,
    %cst_17 = arith.constant 0.000000e+00 : bf16
    %23 = vector.broadcast %cst_17 : bf16 to vector<32x128xbf16>
    %c288 = arith.constant 288 : index
    %c0_18 = arith.constant 0 : index
    %24 = vector.load %arg11[%c288, %c0_18] : memref<320x128xbf16, #tpu.memory_space<vmem>>, vector<32x128xbf16>
    tpu.vector_store %arg11[%c288, %c0_18], %23 {strides = array<i32>} : memref<320x128xbf16, #tpu.memory_space<vmem>>, vector<32x128xbf16>,
    %25 = arith.truncf %20 : vector<256x128xf32> to vector<256x128xbf16>
    %c32 = arith.constant 32 : index
    %c0_19 = arith.constant 0 : index
    %26 = vector.load %arg11[%c32, %c0_19] : memref<320x128xbf16, #tpu.memory_space<vmem>>, vector<256x128xbf16>
    tpu.vector_store %arg11[%c32, %c0_19], %25 {strides = array<i32>} : memref<320x128xbf16, #tpu.memory_space<vmem>>, vector<256x128xbf16>,
    %c15 = arith.constant 15 : index
    %c0_20 = arith.constant 0 : index
    %27 = vector.load %arg11[%c15, %c0_20] : memref<320x128xbf16, #tpu.memory_space<vmem>>, vector<256x128xbf16>
    %c0_21 = arith.constant 0 : index
    %c0_22 = arith.constant 0 : index
    %28 = vector.load %arg8[%c0_21, %c0_22] : memref<256x1xbf16, #tpu.memory_space<vmem>>, vector<256x1xbf16>
    %29 = vector.broadcast %28 : vector<256x1xbf16> to vector<256x128xbf16>
    %30 = arith.mulf %27, %29 : vector<256x128xbf16>
    %c0_23 = arith.constant 0 : index
    %c0_24 = arith.constant 0 : index
    %c0_25 = arith.constant 0 : index
    %31 = vector.load %arg7[%c0_23, %c0_24, %c0_25] : memref<9x128x128xbf16, #tpu.memory_space<vmem>>, vector<1x128x128xbf16>
    %32 = vector.shape_cast %31 : vector<1x128x128xbf16> to vector<128x128xbf16>
    %cst_26 = arith.constant dense<0.000000e+00> : vector<256x128xf32>
    %33 = tpu.matmul %30, %32, %cst_26 {dimension_numbers = #tpu.dot_dimension_numbers<[1], [0], [0], [1], [0, 0, 1, 1], [], []>} : vector<256x128xbf16>, vector<128x128xbf16>, vector<256x128xf32> -> vector<256x128xf32>
    %c0_27 = arith.constant 0 : index
    %c0_28 = arith.constant 0 : index
    %c0_29 = arith.constant 0 : index
    %34 = vector.load %arg10[%c0_27, %c0_28, %c0_29] : memref<1x256x128xf32, #tpu.memory_space<vmem>>, vector<1x256x128xf32>
    %35 = vector.shape_cast %34 : vector<1x256x128xf32> to vector<256x128xf32>
    %36 = vector.shape_cast %33 : vector<256x128xf32> to vector<1x256x128xf32>
    tpu.vector_store %arg10[%c0_27, %c0_28, %c0_29], %36 {strides = array<i32>} : memref<1x256x128xf32, #tpu.memory_space<vmem>>, vector<1x256x128xf32>,
    %c16 = arith.constant 16 : index
    %c0_30 = arith.constant 0 : index
    %37 = vector.load %arg11[%c16, %c0_30] : memref<320x128xbf16, #tpu.memory_space<vmem>>, vector<256x128xbf16>
    %c1 = arith.constant 1 : index
    %c0_31 = arith.constant 0 : index
    %c0_32 = arith.constant 0 : index
    %38 = vector.load %arg7[%c1, %c0_31, %c0_32] : memref<9x128x128xbf16, #tpu.memory_space<vmem>>, vector<1x128x128xbf16>
    %39 = vector.shape_cast %38 : vector<1x128x128xbf16> to vector<128x128xbf16>
    %cst_33 = arith.constant dense<0.000000e+00> : vector<256x128xf32>
    %40 = tpu.matmul %37, %39, %cst_33 {dimension_numbers = #tpu.dot_dimension_numbers<[1], [0], [0], [1], [0, 0, 1, 1], [], []>} : vector<256x128xbf16>, vector<128x128xbf16>, vector<256x128xf32> -> vector<256x128xf32>
    %c0_34 = arith.constant 0 : index
    %c0_35 = arith.constant 0 : index
    %c0_36 = arith.constant 0 : index
    %41 = vector.load %arg10[%c0_34, %c0_35, %c0_36] : memref<1x256x128xf32, #tpu.memory_space<vmem>>, vector<1x256x128xf32>
    %42 = vector.shape_cast %41 : vector<1x256x128xf32> to vector<256x128xf32>
    %43 = arith.addf %42, %40 : vector<256x128xf32>
    %c0_37 = arith.constant 0 : index
    %c0_38 = arith.constant 0 : index
    %c0_39 = arith.constant 0 : index
    %44 = vector.load %arg10[%c0_37, %c0_38, %c0_39] : memref<1x256x128xf32, #tpu.memory_space<vmem>>, vector<1x256x128xf32>
    %45 = vector.shape_cast %44 : vector<1x256x128xf32> to vector<256x128xf32>
    %46 = vector.shape_cast %43 : vector<256x128xf32> to vector<1x256x128xf32>
    tpu.vector_store %arg10[%c0_37, %c0_38, %c0_39], %46 {strides = array<i32>} : memref<1x256x128xf32, #tpu.memory_space<vmem>>, vector<1x256x128xf32>,
    %c17 = arith.constant 17 : index
    %c0_40 = arith.constant 0 : index
    %47 = vector.load %arg11[%c17, %c0_40] : memref<320x128xbf16, #tpu.memory_space<vmem>>, vector<256x128xbf16>
    %c0_41 = arith.constant 0 : index
    %c0_42 = arith.constant 0 : index
    %48 = vector.load %arg9[%c0_41, %c0_42] : memref<256x1xbf16, #tpu.memory_space<vmem>>, vector<256x1xbf16>
    %49 = vector.broadcast %48 : vector<256x1xbf16> to vector<256x128xbf16>
    %50 = arith.mulf %47, %49 : vector<256x128xbf16>
    %c2 = arith.constant 2 : index
    %c0_43 = arith.constant 0 : index
    %c0_44 = arith.constant 0 : index
    %51 = vector.load %arg7[%c2, %c0_43, %c0_44] : memref<9x128x128xbf16, #tpu.memory_space<vmem>>, vector<1x128x128xbf16>
    %52 = vector.shape_cast %51 : vector<1x128x128xbf16> to vector<128x128xbf16>
    %cst_45 = arith.constant dense<0.000000e+00> : vector<256x128xf32>
    %53 = tpu.matmul %50, %52, %cst_45 {dimension_numbers = #tpu.dot_dimension_numbers<[1], [0], [0], [1], [0, 0, 1, 1], [], []>} : vector<256x128xbf16>, vector<128x128xbf16>, vector<256x128xf32> -> vector<256x128xf32>
    %c0_46 = arith.constant 0 : index
    %c0_47 = arith.constant 0 : index
    %c0_48 = arith.constant 0 : index
    %54 = vector.load %arg10[%c0_46, %c0_47, %c0_48] : memref<1x256x128xf32, #tpu.memory_space<vmem>>, vector<1x256x128xf32>
    %55 = vector.shape_cast %54 : vector<1x256x128xf32> to vector<256x128xf32>
    %56 = arith.addf %55, %53 : vector<256x128xf32>
    %c0_49 = arith.constant 0 : index
    %c0_50 = arith.constant 0 : index
    %c0_51 = arith.constant 0 : index
    %57 = vector.load %arg10[%c0_49, %c0_50, %c0_51] : memref<1x256x128xf32, #tpu.memory_space<vmem>>, vector<1x256x128xf32>
    %58 = vector.shape_cast %57 : vector<1x256x128xf32> to vector<256x128xf32>
    %59 = vector.shape_cast %56 : vector<256x128xf32> to vector<1x256x128xf32>
    tpu.vector_store %arg10[%c0_49, %c0_50, %c0_51], %59 {strides = array<i32>} : memref<1x256x128xf32, #tpu.memory_space<vmem>>, vector<1x256x128xf32>,
    %c31 = arith.constant 31 : index
    %c0_52 = arith.constant 0 : index
    %60 = vector.load %arg11[%c31, %c0_52] : memref<320x128xbf16, #tpu.memory_space<vmem>>, vector<256x128xbf16>
    %c0_53 = arith.constant 0 : index
    %c0_54 = arith.constant 0 : index
    %61 = vector.load %arg8[%c0_53, %c0_54] : memref<256x1xbf16, #tpu.memory_space<vmem>>, vector<256x1xbf16>
    %62 = vector.broadcast %61 : vector<256x1xbf16> to vector<256x128xbf16>
    %63 = arith.mulf %60, %62 : vector<256x128xbf16>
    %c3 = arith.constant 3 : index
    %c0_55 = arith.constant 0 : index
    %c0_56 = arith.constant 0 : index
    %64 = vector.load %arg7[%c3, %c0_55, %c0_56] : memref<9x128x128xbf16, #tpu.memory_space<vmem>>, vector<1x128x128xbf16>
    %65 = vector.shape_cast %64 : vector<1x128x128xbf16> to vector<128x128xbf16>
    %cst_57 = arith.constant dense<0.000000e+00> : vector<256x128xf32>
    %66 = tpu.matmul %63, %65, %cst_57 {dimension_numbers = #tpu.dot_dimension_numbers<[1], [0], [0], [1], [0, 0, 1, 1], [], []>} : vector<256x128xbf16>, vector<128x128xbf16>, vector<256x128xf32> -> vector<256x128xf32>
    %c0_58 = arith.constant 0 : index
    %c0_59 = arith.constant 0 : index
    %c0_60 = arith.constant 0 : index
    %67 = vector.load %arg10[%c0_58, %c0_59, %c0_60] : memref<1x256x128xf32, #tpu.memory_space<vmem>>, vector<1x256x128xf32>
    %68 = vector.shape_cast %67 : vector<1x256x128xf32> to vector<256x128xf32>
    %69 = arith.addf %68, %66 : vector<256x128xf32>
    %c0_61 = arith.constant 0 : index
    %c0_62 = arith.constant 0 : index
    %c0_63 = arith.constant 0 : index
    %70 = vector.load %arg10[%c0_61, %c0_62, %c0_63] : memref<1x256x128xf32, #tpu.memory_space<vmem>>, vector<1x256x128xf32>
    %71 = vector.shape_cast %70 : vector<1x256x128xf32> to vector<256x128xf32>
    %72 = vector.shape_cast %69 : vector<256x128xf32> to vector<1x256x128xf32>
    tpu.vector_store %arg10[%c0_61, %c0_62, %c0_63], %72 {strides = array<i32>} : memref<1x256x128xf32, #tpu.memory_space<vmem>>, vector<1x256x128xf32>,
    %c32_64 = arith.constant 32 : index
    %c0_65 = arith.constant 0 : index
    %73 = vector.load %arg11[%c32_64, %c0_65] : memref<320x128xbf16, #tpu.memory_space<vmem>>, vector<256x128xbf16>
    %c4 = arith.constant 4 : index
    %c0_66 = arith.constant 0 : index
    %c0_67 = arith.constant 0 : index
    %74 = vector.load %arg7[%c4, %c0_66, %c0_67] : memref<9x128x128xbf16, #tpu.memory_space<vmem>>, vector<1x128x128xbf16>
    %75 = vector.shape_cast %74 : vector<1x128x128xbf16> to vector<128x128xbf16>
    %cst_68 = arith.constant dense<0.000000e+00> : vector<256x128xf32>
    %76 = tpu.matmul %73, %75, %cst_68 {dimension_numbers = #tpu.dot_dimension_numbers<[1], [0], [0], [1], [0, 0, 1, 1], [], []>} : vector<256x128xbf16>, vector<128x128xbf16>, vector<256x128xf32> -> vector<256x128xf32>
    %c0_69 = arith.constant 0 : index
    %c0_70 = arith.constant 0 : index
    %c0_71 = arith.constant 0 : index
    %77 = vector.load %arg10[%c0_69, %c0_70, %c0_71] : memref<1x256x128xf32, #tpu.memory_space<vmem>>, vector<1x256x128xf32>
    %78 = vector.shape_cast %77 : vector<1x256x128xf32> to vector<256x128xf32>
    %79 = arith.addf %78, %76 : vector<256x128xf32>
    %c0_72 = arith.constant 0 : index
    %c0_73 = arith.constant 0 : index
    %c0_74 = arith.constant 0 : index
    %80 = vector.load %arg10[%c0_72, %c0_73, %c0_74] : memref<1x256x128xf32, #tpu.memory_space<vmem>>, vector<1x256x128xf32>
    %81 = vector.shape_cast %80 : vector<1x256x128xf32> to vector<256x128xf32>
    %82 = vector.shape_cast %79 : vector<256x128xf32> to vector<1x256x128xf32>
    tpu.vector_store %arg10[%c0_72, %c0_73, %c0_74], %82 {strides = array<i32>} : memref<1x256x128xf32, #tpu.memory_space<vmem>>, vector<1x256x128xf32>,
    %c33 = arith.constant 33 : index
    %c0_75 = arith.constant 0 : index
    %83 = vector.load %arg11[%c33, %c0_75] : memref<320x128xbf16, #tpu.memory_space<vmem>>, vector<256x128xbf16>
    %c0_76 = arith.constant 0 : index
    %c0_77 = arith.constant 0 : index
    %84 = vector.load %arg9[%c0_76, %c0_77] : memref<256x1xbf16, #tpu.memory_space<vmem>>, vector<256x1xbf16>
    %85 = vector.broadcast %84 : vector<256x1xbf16> to vector<256x128xbf16>
    %86 = arith.mulf %83, %85 : vector<256x128xbf16>
    %c5 = arith.constant 5 : index
    %c0_78 = arith.constant 0 : index
    %c0_79 = arith.constant 0 : index
    %87 = vector.load %arg7[%c5, %c0_78, %c0_79] : memref<9x128x128xbf16, #tpu.memory_space<vmem>>, vector<1x128x128xbf16>
    %88 = vector.shape_cast %87 : vector<1x128x128xbf16> to vector<128x128xbf16>
    %cst_80 = arith.constant dense<0.000000e+00> : vector<256x128xf32>
    %89 = tpu.matmul %86, %88, %cst_80 {dimension_numbers = #tpu.dot_dimension_numbers<[1], [0], [0], [1], [0, 0, 1, 1], [], []>} : vector<256x128xbf16>, vector<128x128xbf16>, vector<256x128xf32> -> vector<256x128xf32>
    %c0_81 = arith.constant 0 : index
    %c0_82 = arith.constant 0 : index
    %c0_83 = arith.constant 0 : index
    %90 = vector.load %arg10[%c0_81, %c0_82, %c0_83] : memref<1x256x128xf32, #tpu.memory_space<vmem>>, vector<1x256x128xf32>
    %91 = vector.shape_cast %90 : vector<1x256x128xf32> to vector<256x128xf32>
    %92 = arith.addf %91, %89 : vector<256x128xf32>
    %c0_84 = arith.constant 0 : index
    %c0_85 = arith.constant 0 : index
    %c0_86 = arith.constant 0 : index
    %93 = vector.load %arg10[%c0_84, %c0_85, %c0_86] : memref<1x256x128xf32, #tpu.memory_space<vmem>>, vector<1x256x128xf32>
    %94 = vector.shape_cast %93 : vector<1x256x128xf32> to vector<256x128xf32>
    %95 = vector.shape_cast %92 : vector<256x128xf32> to vector<1x256x128xf32>
    tpu.vector_store %arg10[%c0_84, %c0_85, %c0_86], %95 {strides = array<i32>} : memref<1x256x128xf32, #tpu.memory_space<vmem>>, vector<1x256x128xf32>,
    %c47 = arith.constant 47 : index
    %c0_87 = arith.constant 0 : index
    %96 = vector.load %arg11[%c47, %c0_87] : memref<320x128xbf16, #tpu.memory_space<vmem>>, vector<256x128xbf16>
    %c0_88 = arith.constant 0 : index
    %c0_89 = arith.constant 0 : index
    %97 = vector.load %arg8[%c0_88, %c0_89] : memref<256x1xbf16, #tpu.memory_space<vmem>>, vector<256x1xbf16>
    %98 = vector.broadcast %97 : vector<256x1xbf16> to vector<256x128xbf16>
    %99 = arith.mulf %96, %98 : vector<256x128xbf16>
    %c6 = arith.constant 6 : index
    %c0_90 = arith.constant 0 : index
    %c0_91 = arith.constant 0 : index
    %100 = vector.load %arg7[%c6, %c0_90, %c0_91] : memref<9x128x128xbf16, #tpu.memory_space<vmem>>, vector<1x128x128xbf16>
    %101 = vector.shape_cast %100 : vector<1x128x128xbf16> to vector<128x128xbf16>
    %cst_92 = arith.constant dense<0.000000e+00> : vector<256x128xf32>
    %102 = tpu.matmul %99, %101, %cst_92 {dimension_numbers = #tpu.dot_dimension_numbers<[1], [0], [0], [1], [0, 0, 1, 1], [], []>} : vector<256x128xbf16>, vector<128x128xbf16>, vector<256x128xf32> -> vector<256x128xf32>
    %c0_93 = arith.constant 0 : index
    %c0_94 = arith.constant 0 : index
    %c0_95 = arith.constant 0 : index
    %103 = vector.load %arg10[%c0_93, %c0_94, %c0_95] : memref<1x256x128xf32, #tpu.memory_space<vmem>>, vector<1x256x128xf32>
    %104 = vector.shape_cast %103 : vector<1x256x128xf32> to vector<256x128xf32>
    %105 = arith.addf %104, %102 : vector<256x128xf32>
    %c0_96 = arith.constant 0 : index
    %c0_97 = arith.constant 0 : index
    %c0_98 = arith.constant 0 : index
    %106 = vector.load %arg10[%c0_96, %c0_97, %c0_98] : memref<1x256x128xf32, #tpu.memory_space<vmem>>, vector<1x256x128xf32>
    %107 = vector.shape_cast %106 : vector<1x256x128xf32> to vector<256x128xf32>
    %108 = vector.shape_cast %105 : vector<256x128xf32> to vector<1x256x128xf32>
    tpu.vector_store %arg10[%c0_96, %c0_97, %c0_98], %108 {strides = array<i32>} : memref<1x256x128xf32, #tpu.memory_space<vmem>>, vector<1x256x128xf32>,
    %c48 = arith.constant 48 : index
    %c0_99 = arith.constant 0 : index
    %109 = vector.load %arg11[%c48, %c0_99] : memref<320x128xbf16, #tpu.memory_space<vmem>>, vector<256x128xbf16>
    %c7 = arith.constant 7 : index
    %c0_100 = arith.constant 0 : index
    %c0_101 = arith.constant 0 : index
    %110 = vector.load %arg7[%c7, %c0_100, %c0_101] : memref<9x128x128xbf16, #tpu.memory_space<vmem>>, vector<1x128x128xbf16>
    %111 = vector.shape_cast %110 : vector<1x128x128xbf16> to vector<128x128xbf16>
    %cst_102 = arith.constant dense<0.000000e+00> : vector<256x128xf32>
    %112 = tpu.matmul %109, %111, %cst_102 {dimension_numbers = #tpu.dot_dimension_numbers<[1], [0], [0], [1], [0, 0, 1, 1], [], []>} : vector<256x128xbf16>, vector<128x128xbf16>, vector<256x128xf32> -> vector<256x128xf32>
    %c0_103 = arith.constant 0 : index
    %c0_104 = arith.constant 0 : index
    %c0_105 = arith.constant 0 : index
    %113 = vector.load %arg10[%c0_103, %c0_104, %c0_105] : memref<1x256x128xf32, #tpu.memory_space<vmem>>, vector<1x256x128xf32>
    %114 = vector.shape_cast %113 : vector<1x256x128xf32> to vector<256x128xf32>
    %115 = arith.addf %114, %112 : vector<256x128xf32>
    %c0_106 = arith.constant 0 : index
    %c0_107 = arith.constant 0 : index
    %c0_108 = arith.constant 0 : index
    %116 = vector.load %arg10[%c0_106, %c0_107, %c0_108] : memref<1x256x128xf32, #tpu.memory_space<vmem>>, vector<1x256x128xf32>
    %117 = vector.shape_cast %116 : vector<1x256x128xf32> to vector<256x128xf32>
    %118 = vector.shape_cast %115 : vector<256x128xf32> to vector<1x256x128xf32>
    tpu.vector_store %arg10[%c0_106, %c0_107, %c0_108], %118 {strides = array<i32>} : memref<1x256x128xf32, #tpu.memory_space<vmem>>, vector<1x256x128xf32>,
    %c49 = arith.constant 49 : index
    %c0_109 = arith.constant 0 : index
    %119 = vector.load %arg11[%c49, %c0_109] : memref<320x128xbf16, #tpu.memory_space<vmem>>, vector<256x128xbf16>
    %c0_110 = arith.constant 0 : index
    %c0_111 = arith.constant 0 : index
    %120 = vector.load %arg9[%c0_110, %c0_111] : memref<256x1xbf16, #tpu.memory_space<vmem>>, vector<256x1xbf16>
    %121 = vector.broadcast %120 : vector<256x1xbf16> to vector<256x128xbf16>
    %122 = arith.mulf %119, %121 : vector<256x128xbf16>
    %c8 = arith.constant 8 : index
    %c0_112 = arith.constant 0 : index
    %c0_113 = arith.constant 0 : index
    %123 = vector.load %arg7[%c8, %c0_112, %c0_113] : memref<9x128x128xbf16, #tpu.memory_space<vmem>>, vector<1x128x128xbf16>
    %124 = vector.shape_cast %123 : vector<1x128x128xbf16> to vector<128x128xbf16>
    %cst_114 = arith.constant dense<0.000000e+00> : vector<256x128xf32>
    %125 = tpu.matmul %122, %124, %cst_114 {dimension_numbers = #tpu.dot_dimension_numbers<[1], [0], [0], [1], [0, 0, 1, 1], [], []>} : vector<256x128xbf16>, vector<128x128xbf16>, vector<256x128xf32> -> vector<256x128xf32>
    %c0_115 = arith.constant 0 : index
    %c0_116 = arith.constant 0 : index
    %c0_117 = arith.constant 0 : index
    %126 = vector.load %arg10[%c0_115, %c0_116, %c0_117] : memref<1x256x128xf32, #tpu.memory_space<vmem>>, vector<1x256x128xf32>
    %127 = vector.shape_cast %126 : vector<1x256x128xf32> to vector<256x128xf32>
    %128 = arith.addf %127, %125 : vector<256x128xf32>
    %c0_118 = arith.constant 0 : index
    %c0_119 = arith.constant 0 : index
    %c0_120 = arith.constant 0 : index
    %129 = vector.load %arg10[%c0_118, %c0_119, %c0_120] : memref<1x256x128xf32, #tpu.memory_space<vmem>>, vector<1x256x128xf32>
    %130 = vector.shape_cast %129 : vector<1x256x128xf32> to vector<256x128xf32>
    %131 = vector.shape_cast %128 : vector<256x128xf32> to vector<1x256x128xf32>
    tpu.vector_store %arg10[%c0_118, %c0_119, %c0_120], %131 {strides = array<i32>} : memref<1x256x128xf32, #tpu.memory_space<vmem>>, vector<1x256x128xf32>,
    return
  }
  func.func @transform_0(%arg0: i32) -> (i32, i32, i32) {
    %c0_i32 = arith.constant 0 : i32
    %c0_i32_0 = arith.constant 0 : i32
    %c0_i32_1 = arith.constant 0 : i32
    return %arg0, %c0_i32, %c0_i32_0 : i32, i32, i32
  }
  func.func @transform_1(%arg0: i32) -> (i32, i32) {
    %c0_i32 = arith.constant 0 : i32
    %c0_i32_0 = arith.constant 0 : i32
    %c0_i32_1 = arith.constant 0 : i32
    return %c0_i32, %c0_i32_0 : i32, i32
  }
  func.func @transform_2(%arg0: i32) -> (i32, i32) {
    %c0_i32 = arith.constant 0 : i32
    %c0_i32_0 = arith.constant 0 : i32
    %c0_i32_1 = arith.constant 0 : i32
    return %c0_i32, %c0_i32_0 : i32, i32
  }
  func.func @transform_3(%arg0: i32) -> (i32, i32) {
    %c0_i32 = arith.constant 0 : i32
    %c0_i32_0 = arith.constant 0 : i32
    %c0_i32_1 = arith.constant 0 : i32
    return %c0_i32, %c0_i32_0 : i32, i32
  }
  func.func @transform_4(%arg0: i32) -> (i32, i32) {
    %c0_i32 = arith.constant 0 : i32
    %c0_i32_0 = arith.constant 0 : i32
    %c0_i32_1 = arith.constant 0 : i32
    return %c0_i32, %c0_i32_0 : i32, i32
  }
  func.func @transform_5(%arg0: i32) -> (i32, i32) {
    %c0_i32 = arith.constant 0 : i32
    %c0_i32_0 = arith.constant 0 : i32
    %c0_i32_1 = arith.constant 0 : i32
    return %c0_i32, %c0_i32_0 : i32, i32
  }
  func.func @transform_6(%arg0: i32) -> (i32, i32, i32) {
    %c0_i32 = arith.constant 0 : i32
    %c0_i32_0 = arith.constant 0 : i32
    %c0_i32_1 = arith.constant 0 : i32
    %c0_i32_2 = arith.constant 0 : i32
    return %c0_i32, %c0_i32_0, %c0_i32_1 : i32, i32, i32
  }
  func.func @transform_7(%arg0: i32) -> (i32, i32) {
    %c0_i32 = arith.constant 0 : i32
    %c0_i32_0 = arith.constant 0 : i32
    %c0_i32_1 = arith.constant 0 : i32
    return %c0_i32, %c0_i32_0 : i32, i32
  }
  func.func @transform_8(%arg0: i32) -> (i32, i32) {
    %c0_i32 = arith.constant 0 : i32
    %c0_i32_0 = arith.constant 0 : i32
    %c0_i32_1 = arith.constant 0 : i32
    return %c0_i32, %c0_i32_0 : i32, i32
  }
  func.func @transform_9(%arg0: i32) -> (i32, i32, i32) {
    %c0_i32 = arith.constant 0 : i32
    %c0_i32_0 = arith.constant 0 : i32
    %c0_i32_1 = arith.constant 0 : i32
    return %arg0, %c0_i32, %c0_i32_0 : i32, i32, i32
  }
}

</mosaic_0001>

<bundles_post_ra>
// kernel: tpu_custom_call.1
= control target key start
LH: loop header
LB: loop body
LE: loop exit
PB: predicated region body
PF: predicated region fallthrough
CT: control target
= control target key end

     0   :  { %14 = vsyncpa [#allocation4], 0  ;;  %s13535_s0 = inlined_call_operand.hbm [shape: f32[2,256,128], index: 0, kind: input, shape index: {}]   ;;  %s13536_s1 = inlined_call_operand.vmem [shape: f32[1,128], index: 1, kind: input, shape index: {}]   ;;  %s13537_s2 = inlined_call_operand.vmem [shape: f32[1,128], index: 2, kind: input, shape index: {}]   ;;  %s13538_s3 = inlined_call_operand.vmem [shape: bf16[128,128], index: 3, kind: input, shape index: {}]   ;;  %s13539_s4 = inlined_call_operand.vmem [shape: f32[1,128], index: 4, kind: input, shape index: {}]   ;;  %s13540_s5 = inlined_call_operand.vmem [shape: f32[1,128], index: 5, kind: input, shape index: {}]   ;;  %s13541_s6 = inlined_call_operand.hbm [shape: bf16[9,128,128], index: 6, kind: input, shape index: {}]   ;;  %s13542_s7 = inlined_call_operand.vmem [shape: bf16[256,1], index: 7, kind: input, shape index: {}]   ;;  %s13543_s8 = inlined_call_operand.vmem [shape: bf16[256,1], index: 8, kind: input, shape index: {}]   ;;  %s13544_s9 = inlined_call_operand.hbm [shape: f32[2,256,128], index: 9, kind: output, shape index: {}]  }
   0x1   :  { %16 = vsyncpa [#allocation4 + $0x1], 0 }
   0x2   :  { %17 = vsyncpa [#allocation7], 0 }
   0x3   :  { %18 = vsyncpa [#allocation5], 0 }
   0x4   :  { %20 = vsyncpa [#allocation5 + $0x1], 0  ;;  %s10389_s30 = smov 0   ;;  %s10391_s10 = smov 0  }
   0x5   :  { %s10393_s11 = smov 0   ;;  %s10395_s12 = smov 0  }
   0x6 LB: > { %s10410_s13 = sadd.s32 4294967295, %s10326_s12   ;;  %s8808_s14 = sadd.s32 4294967294, %s10326_s12   ;;  %s10326_s12 = sphi %s10395_s12, %s13726_s12   ;;  %s10322_s11 = sphi %s10393_s11, %s13729_s11   ;;  %s10318_s10 = sphi %s10391_s10, %s13728_s10   ;;  %s10314_s30 = sphi %s10389_s30, %s13727_s30  }
   0x7   : > { %p46_p0 = scmp.ne.s32.totalorder %s10318_s10, %s10314_s30  ;;  %p13545_p1 = scmp.eq.s32.totalorder %s10410_s13, 0 }
   0x8   : > { %p244_p3 = scmp.eq.s32.totalorder %s8808_s14, 1  ;;  %p8809_p5 = scmp.ge.s32.totalorder %s10326_s12, 1 }
   0x9   : > { %p10419_p4 = por %p13545_p1, %p46_p0  ;;  %p251_p7 = scmp.lt.s32.totalorder %s10326_s12, 3 }
   0xa   : > { %p10424_p6 = por %p244_p3, %p46_p0  ;;  %s10328_s18 = smov [#allocation6]  }
   0xb   : > { %s13586_s15 = scalar_select %p10419_p4, 1, 0 }
   0xc   : > { %s13587_s16 = scalar_select %p10424_p6, 1, 0 }
   0xd   : > { %p10429_p8 = pnand %p8809_p5, %p251_p7  ;;  %s278_s19 = sshll.u32 %s10328_s18, 4  ;;  %s10433_s19 = int_to_ptr.vmem [resolvable:$true] %s278_s19 }
   0xe   : > { %13588 = sst [smem:[#allocation12_spill]] %s13587_s16  ;;  %s10445_s21 = sadd.s32 1, %s10326_s12  }
   0xf   : > { %s13589_s17 = scalar_select %p10429_p8, 1, 0 }
  0x10   : > { %p10054_p9 = pneg %p10429_p8  ;;  %13591 = sst [smem:[#allocation13_spill]] %s10445_s21 }
  0x11   : > { %s33_s22 = sadd.s32 1, %s10322_s11  ;;  %s30_s23 = ssub.s32 %s10326_s12, %s10445_s21 }
  0x12   : > { %p10440_p11 = pnand %p10054_p9, %p13545_p1  ;;  %s10198_s26 = scalar_lea.hbm %s13541_s6, 9216 }
  0x13   : > { %p10199_p12 = scmp.ne.s32.totalorder %s13541_s6, %s10198_s26  ;;  %p10205_p5 = scmp.lt.u32.totalorder %s10198_s26, %s13541_s6 }
  0x14   : > { %p10200_p13 = pneg %p10440_p11 }
  0x16   : > { %p10201_p0 = pnand %p10200_p13, %p10199_p12 }
  0x18   : > { %p10202_p3 = pneg %p10201_p0 }
  0x1a   : > { %p10207_p7 = pnand %p10205_p5, %p10202_p3 }
  0x1c   : > { %10210 = shalt.err (!%p10207_p7)
}
  0x1d   : > { %s10211_s18 = scalar_lea.vmem %s10433_s19, 9216  ;;  %p10219_p2 = scmp.lt.s32.totalorder %s10433_s19, %s10433_s19 }
  0x1e   : > { %p10212_p9 = scmp.ne.s32.totalorder %s10433_s19, %s10211_s18  ;;  %p10220_p6 = scmp.lt.s32.totalorder %s10211_s18, %s10211_s18 }
  0x20   : > { %p10214_p10 = pnand %p10212_p9, %p10200_p13  ;;  %p10221_p4 = por %p10220_p6, %p10219_p2 }
  0x22   : > { %p10215_p1 = pneg %p10214_p10 }
  0x24   : > { %p10222_p8 = pnand %p10221_p4, %p10215_p1 }
  0x26   : > { %10225 = shalt.err (!%p10222_p8)
}
  0x27   : > { %s10329_s24 = smov 64   ;;  %s10330_s25 = smov 4  }
  0x28   : > { %10057 = dma.hbm_to_vmem [thread:$0]  (!%p10440_p11), %s13541_s6, 9216, %s10433_s19, [#allocation7], %s10329_s24, %s10329_s24, %s10330_s25  }
  0x29   : > { %p31_p2 = scmp.eq.s32.totalorder %s30_s23, 0  ;;  %p40_p1 = scmp.ne.s32.totalorder %s10322_s11, %s10318_s10 }
  0x2a   : > { %p41_p4 = scmp.eq.s32.totalorder %s10326_s12, 0  ;;  %p10067_p6 = scmp.lt.s32.totalorder %s10326_s12, 2 }
  0x2b   : > { %s10476_s28 = scalar_select %p31_p2, %s10322_s11, %s33_s22  }
  0x2c   : > { %p42_p8 = por %p41_p4, %p40_p1  ;;  %p13592_p10 = scmp.eq.s32.totalorder %s10410_s13, 1 }
  0x2d   : > { %s298_s14 = sand.u32 1, %s10322_s11   ;;  %s9004_s18 = sshll.u32 %s10326_s12, 12 }
  0x2e   : > { %p10480_p12 = por %p13592_p10, %p40_p1  ;;  %s8812_s21 = sshll.u32 %s298_s14, 8 }
  0x2f   : > { %s10489_s26 = scalar_lea.hbm %s13535_s0, %s9004_s18  ;;  %s302_s19 = scalar_lea.vmem [#allocation3], %s8812_s21 }
  0x30   : > { %s309_s22 = sshll.u32 %s302_s19, 4  ;;  %p10491_p11 = pnand %p10067_p6, %p42_p8  ;;  %s10495_s22 = int_to_ptr.vmem [resolvable:$true] %s309_s22 }
  0x31   : > { %s10497_s24 = scalar_lea.sflag [#allocation4], %s298_s14  ;;  %s10226_s25 = scalar_lea.hbm %s10489_s26, 4096 }
  0x32   : > { %p10227_p13 = scmp.ne.s32.totalorder %s10489_s26, %s10226_s25  ;;  %p10228_p0 = pneg %p10491_p11 }
  0x33   : > { %s10231_s27 = scalar_lea.hbm %s13535_s0, 8192  ;;  %p10232_p7 = scmp.lt.u32.totalorder %s10489_s26, %s13535_s0 }
  0x34   : > { %p10229_p3 = pnand %p10228_p0, %p10227_p13  ;;  %p10233_p9 = scmp.lt.u32.totalorder %s10231_s27, %s10226_s25 }
  0x35   : > { %p10235_p1 = scmp.lt.u32.totalorder %s10226_s25, %s10489_s26 }
  0x36   : > { %p10230_p5 = pneg %p10229_p3  ;;  %p10234_p2 = por %p10233_p9, %p10232_p7 }
  0x38   : > { %p10236_p4 = por %p10235_p1, %p10234_p2 }
  0x3a   : > { %p10237_p6 = pnand %p10236_p4, %p10230_p5 }
  0x3c   : > { %10240 = shalt.err (!%p10237_p6)
}
  0x3d   : > { %s10241_s14 = scalar_lea.vmem %s10495_s22, 4096  ;;  %s10331_s19 = smov [#allocation3]  }
  0x3e   : > { %p10242_p8 = scmp.ne.s32.totalorder %s10495_s22, %s10241_s14  ;;  %s10246_s16 = sshll.u32 %s10331_s19, 4  ;;  %s10247_s16 = int_to_ptr.vmem [resolvable:$false] %s10246_s16 }
  0x3f   : > { %s10248_s21 = scalar_lea.vmem %s10247_s16, 8192  ;;  %p10249_p3 = scmp.lt.s32.totalorder %s10495_s22, %s10247_s16 }
  0x40   : > { %p10244_p10 = pnand %p10242_p8, %p10228_p0  ;;  %p10250_p7 = scmp.lt.s32.totalorder %s10248_s21, %s10241_s14 }
  0x42   : > { %p10245_p13 = pneg %p10244_p10  ;;  %p10251_p9 = por %p10250_p7, %p10249_p3 }
  0x44   : > { %p10252_p2 = pnand %p10251_p9, %p10245_p13 }
  0x46   : > { %10255 = shalt.err (!%p10252_p2)
}
  0x47   : > { %s10332_s25 = smov 128   ;;  %s10333_s27 = smov 8  }
  0x48   : > { %10061 = dma.hbm_to_vmem [thread:$0]  (!%p10491_p11), %s10489_s26, 4096, %s10495_s22, %s10497_s24, %s10332_s25, %s10332_s25, %s10333_s27  }
  0x49   : > { %p13595_p0 = scmp.ne.s32.totalorder %s13589_s17, 0 }
  0x4b   : > { %321 = sbr.rel (%p13595_p0) target bundleno = 925 (0x39d), region = 56 }
  0x52   : > { %s10528_s18 = sand.u32 1, %s10318_s10   ;;  %p13596_p5 = scmp.ne.s32.totalorder %s13586_s15, 0 }
  0x53   : > { %s8816_s20 = sshll.u32 %s10528_s18, 8  ;;  %s324_s14 = scalar_lea.sflag [#allocation4], %s10528_s18 }
  0x54   : > { %s10534_s19 = scalar_lea.vmem [#allocation3], %s8816_s20 }
  0x55   : > { %10301 = dma.done.wait (%p13596_p5), %s324_s14, 4096  }
  0x56   : > { %10303 = vsyncadd (%p13596_p5), %s324_s14, 4294963200  ;;  %p13597_p11 = scmp.eq.s32.totalorder %s10410_s13, 0 }
  0x58   : > { %10305 = dma.done.wait (%p13597_p11), [#allocation7], 9216   ;;  %p13598_p1 = pmov %p13597_p11 }
  0x59   : > { %v10334_v0 = vmov 0   ;;  %v915_v1 = vld [vmem:[%s13542_s7 + $0x8] sm:$0xf]  ;;  %v913_v2 = vld [vmem:[%s13542_s7] sm:$0xf]  ;;  %v10115_v9 = vld [vmem:[%s13538_s3 + $0x10] sm:$0xff]  }
  0x5a   : > { %10307 = vsyncadd (%p13598_p1), [#allocation7], 4294958080  ;;  %10112 = vset.pattern.permute.xlu1 %v10334_v0  ;;  %860 = vst [vmem:[#allocation2] sm:$0xff] %v10334_v0  ;;  %10111 = vset.pattern.permute.xlu0 %v10334_v0  ;;  %v10113_v3 = vld [vmem:[%s13538_s3] sm:$0xff]   ;;  %v916_v4 = vld [vmem:[%s13542_s7 + $0xc] sm:$0xf] }
  0x5b   : > { %861 = vst [vmem:[#allocation2 + $0x8] sm:$0xff] %v10334_v0  ;;  %862 = vst [vmem:[#allocation2 + $0x90] sm:$0xff] %v10334_v0  ;;  %971 = vperm.xlu1 %10112, %v915_v1   ;;  %947 = vperm.xlu0 %10111, %v913_v2   ;;  %v914_v5 = vld [vmem:[%s13542_s7 + $0x4] sm:$0xf]  ;;  %v10114_v6 = vld [vmem:[%s13538_s3 + $0x8] sm:$0xff]   ;;  %s13431_s21 = scalar_lea.vmem [#allocation8], %s8816_s20 }
  0x5c   : > { %863 = vst [vmem:[#allocation2 + $0x98] sm:$0xff] %v10334_v0  ;;  %9246 = vmatprep.subr.bf16.mxu0 %v10113_v3  ;;  %v918_v7 = vld [vmem:[%s13542_s7 + $0x14] sm:$0xf]  ;;  %v917_v8 = vld [vmem:[%s13542_s7 + $0x10] sm:$0xf]  ;;  %v10116_v12 = vld [vmem:[%s13538_s3 + $0x18] sm:$0xff]  }
  0x5d   : > { %9247 = vmatpush3.bf16.msra.mxu0 %v10113_v3  ;;  %v920_v10 = vld [vmem:[%s13542_s7 + $0x1c] sm:$0xf]  ;;  %v919_v11 = vld [vmem:[%s13542_s7 + $0x18] sm:$0xf]  ;;  %v922_v13 = vld [vmem:[%s13542_s7 + $0x24] sm:$0xf] }
  0x5e   : > { %9248 = vmatprep.subr.bf16.mxu0 %v10114_v6  ;;  %v921_v14 = vld [vmem:[%s13542_s7 + $0x20] sm:$0xf]  ;;  %v368_v17 = vld [vmem:[%s10534_s19 + $0x8] sm:$0xff]  ;;  %v369_v22 = vld [vmem:[%s10534_s19 + $0x10] sm:$0xff]  ;;  %vm1409_vm0 = vsmask.f32 7424 }
  0x5f   : > { %983 = vperm.xlu1 %10112, %v916_v4   ;;  %959 = vperm.xlu0 %10111, %v914_v5   ;;  %v10117_v15 = vld [vmem:[%s13538_s3 + $0x20] sm:$0xff]   ;;  %v370_v23 = vld [vmem:[%s10534_s19 + $0x18] sm:$0xff]  ;;  %v372_v27 = vld [vmem:[%s10534_s19 + $0x28] sm:$0xff]  ;;  %vm1587_vm1 = vsmask.f32 256  ;;  %s9005_s20 = sshll.u32 %s10410_s13, 12 }
  0x60   : > { %v367_v16 = vld [vmem:[%s10534_s19] sm:$0xff]  ;;  %v924_v28 = vld [vmem:[%s13542_s7 + $0x2c] sm:$0xf]  ;;  %v923_v29 = vld [vmem:[%s13542_s7 + $0x28] sm:$0xf]  ;;  %s8725_s25 = sshll.u32 %s13431_s21, 4  ;;  %s13485_s17 = scalar_lea.hbm %s13544_s9, %s9005_s20  ;;  %s13487_s25 = int_to_ptr.vmem [resolvable:$true] %s8725_s25 }
  0x61   : > { %9249 = vmatpush3.bf16.msra.mxu0 %v10114_v6  ;;  %v10594_v18 = vld [vmem:[%s13536_s1] ss:$0 sm:$0xff]  ;;  %v10118_v30 = vld [vmem:[%s13538_s3 + $0x28] sm:$0xff]   ;;  %v926_v38 = vld [vmem:[%s13542_s7 + $0x34] sm:$0xf]  ;;  %s8712_s13 = scalar_lea.sflag [#allocation5], %s10528_s18 }
  0x62   : > { %9250 = vmatprep.subr.bf16.mxu0 %v10115_v9  ;;  %v406_v19 = vmul.f32 %v10594_v18, %v367_v16  ;;  %v407_v20 = vmul.f32 %v10594_v18, %v368_v17  ;;  %v10601_v21 = vld [vmem:[%s13537_s2] ss:$0 sm:$0xff]  ;;  %v408_v33 = vmul.f32 %v10594_v18, %v369_v22  ;;  %v409_v34 = vmul.f32 %v10594_v18, %v370_v23  ;;  %v925_v39 = vld [vmem:[%s13542_s7 + $0x30] sm:$0xf]  ;;  %v374_v46 = vld [vmem:[%s10534_s19 + $0x38] sm:$0xff]  ;;  %s10256_s26 = scalar_lea.vmem %s13487_s25, 4096 }
  0x63   : > { %1007 = vperm.xlu1 %10112, %v918_v7   ;;  %995 = vperm.xlu0 %10111, %v917_v8   ;;  %v371_v26 = vld [vmem:[%s10534_s19 + $0x20] sm:$0xff]  ;;  %v411_v36 = vmul.f32 %v10594_v18, %v372_v27  ;;  %v10119_v40 = vld [vmem:[%s13538_s3 + $0x30] sm:$0xff]   ;;  %v376_v48 = vld [vmem:[%s10534_s19 + $0x48] sm:$0xff]  ;;  %v413_v55 = vmul.f32 %v10594_v18, %v374_v46  ;;  %p10257_p4 = scmp.ne.s32.totalorder %s13487_s25, %s10256_s26  ;;  %s10336_s22 = smov [#allocation8]  }
  0x64   : > { %v445_v24 = vadd.f32 %v10601_v21, %v406_v19  ;;  %v446_v25 = vadd.f32 %v10601_v21, %v407_v20  ;;  %v410_v35 = vmul.f32 %v10594_v18, %v371_v26  ;;  %v447_v41 = vadd.f32 %v10601_v21, %v408_v33  ;;  %v373_v45 = vld [vmem:[%s10534_s19 + $0x30] sm:$0xff]  ;;  %v375_v47 = vld [vmem:[%s10534_s19 + $0x40] sm:$0xff]  ;;  %v928_v49 = vld [vmem:[%s13542_s7 + $0x3c] sm:$0xf]  ;;  %s10260_s15 = sshll.u32 %s10336_s22, 4  ;;  %s10261_s15 = int_to_ptr.vmem [resolvable:$false] %s10260_s15 }
  0x65   : > { %9251 = vmatpush3.bf16.msra.mxu0 %v10115_v9  ;;  %v448_v42 = vadd.f32 %v10601_v21, %v409_v34  ;;  %v450_v44 = vadd.f32 %v10601_v21, %v411_v36  ;;  %v927_v50 = vld [vmem:[%s13542_s7 + $0x38] sm:$0xf]  ;;  %v412_v54 = vmul.f32 %v10594_v18, %v373_v45  ;;  %v414_v58 = vmul.f32 %v10594_v18, %v375_v47  ;;  %v930_v60 = vld [vmem:[%s13542_s7 + $0x44] sm:$0xf]  ;;  %v929_v61 = vld [vmem:[%s13542_s7 + $0x40] sm:$0xf]  ;;  %p10258_p6 = pnand %p10257_p4, %p10480_p12  ;;  %p10263_p10 = scmp.lt.s32.totalorder %s13487_s25, %s10261_s15 }
  0x66   : > { %9252 = vmatprep.subr.bf16.mxu0 %v10116_v12  ;;  %v477_v31 = vmax.f32 %v445_v24, 0.0  ;;  %v478_v32 = vmax.f32 %v446_v25, 0.0  ;;  %v449_v43 = vadd.f32 %v10601_v21, %v410_v35  ;;  %v10120_v51 = vld [vmem:[%s13538_s3 + $0x38] sm:$0xff]   ;;  %v479_v52 = vmax.f32 %v447_v41, 0.0  ;;  %v377_v1 = vld [vmem:[%s10534_s19 + $0x50] sm:$0xff]  ;;  %v379_v6 = vld [vmem:[%s10534_s19 + $0x60] sm:$0xff] }
  0x67   : > { %1031 = vperm.xlu1 %10112, %v920_v10   ;;  %1019 = vperm.xlu0 %10111, %v919_v11   ;;  %v480_v53 = vmax.f32 %v448_v42, 0.0  ;;  %v482_v57 = vmax.f32 %v450_v44, 0.0  ;;  %v415_v59 = vmul.f32 %v10594_v18, %v376_v48  ;;  %v451_v63 = vadd.f32 %v10601_v21, %v412_v54  ;;  %v378_v5 = vld [vmem:[%s10534_s19 + $0x58] sm:$0xff]  ;;  %v380_v7 = vld [vmem:[%s10534_s19 + $0x68] sm:$0xff]  ;;  %v934_v19 = vld [vmem:[%s13542_s7 + $0x54] sm:$0xf]  ;;  %p10259_p8 = pneg %p10258_p6 }
  0x68   : > { %v509_v37 = vpack.c.bf16 %v478_v32, %v477_v31  ;;  %v481_v56 = vmax.f32 %v449_v43, 0.0  ;;  %v452_v0 = vadd.f32 %v10601_v21, %v413_v55  ;;  %v453_v3 = vadd.f32 %v10601_v21, %v414_v58  ;;  %v932_v8 = vld [vmem:[%s13542_s7 + $0x4c] sm:$0xf]  ;;  %v931_v9 = vld [vmem:[%s13542_s7 + $0x48] sm:$0xf]  ;;  %v381_v26 = vld [vmem:[%s10534_s19 + $0x70] sm:$0xff] }
  0x69   : > { %9253 = vmatpush3.bf16.msra.mxu0 %v10116_v12  ;;  %v510_v62 = vpack.c.bf16 %v480_v53, %v479_v52  ;;  %v454_v4 = vadd.f32 %v10601_v21, %v415_v59  ;;  %v416_v10 = vmul.f32 %v10594_v18, %v377_v1  ;;  %v483_v11 = vmax.f32 %v451_v63, 0.0  ;;  %v933_v20 = vld [vmem:[%s13542_s7 + $0x50] sm:$0xf]  ;;  %v382_v31 = vld [vmem:[%s10534_s19 + $0x78] sm:$0xff]  ;;  %v383_v32 = vld [vmem:[%s10534_s19 + $0x80] sm:$0xff] }
  0x6a   : > { %9254 = vmatprep.subr.bf16.mxu0 %v10117_v15  ;;  %9262 = vmatprep.mubr.bf16.mxu0 %v509_v37  ;;  %v511_v2 = vpack.c.bf16 %v482_v57, %v481_v56  ;;  %v484_v12 = vmax.f32 %v452_v0, 0.0  ;;  %v419_v17 = vmul.f32 %v10594_v18, %v380_v7  ;;  %v397_v27 = vld [vmem:[%s10534_s19 + $0xf0] sm:$0xff]  ;;  %v384_v33 = vld [vmem:[%s10534_s19 + $0x88] sm:$0xff]  ;;  %v936_v34 = vld [vmem:[%s13542_s7 + $0x5c] sm:$0xf]  ;;  %v420_v37 = vmul.f32 %v10594_v18, %v381_v26 }
  0x6b   : > { %1055 = vperm.xlu1 %10112, %v922_v13   ;;  %1043 = vperm.xlu0 %10111, %v921_v14   ;;  %v417_v13 = vmul.f32 %v10594_v18, %v378_v5  ;;  %v418_v14 = vmul.f32 %v10594_v18, %v379_v6  ;;  %v486_v16 = vmax.f32 %v454_v4, 0.0  ;;  %v455_v22 = vadd.f32 %v10601_v21, %v416_v10  ;;  %v935_v35 = vld [vmem:[%s13542_s7 + $0x58] sm:$0xf]  ;;  %v387_v46 = vld [vmem:[%s10534_s19 + $0xa0] sm:$0xff]  ;;  %v388_v55 = vld [vmem:[%s10534_s19 + $0xa8] sm:$0xff] }
  0x6c   : > { %v512_v23 = vpack.c.bf16 %v484_v12, %v483_v11  ;;  %v421_v43 = vmul.f32 %v10594_v18, %v382_v31  ;;  %v422_v44 = vmul.f32 %v10594_v18, %v383_v32  ;;  %v386_v45 = vld [vmem:[%s10534_s19 + $0x98] sm:$0xff]  ;;  %v423_v48 = vmul.f32 %v10594_v18, %v384_v33  ;;  %v937_v53 = vld [vmem:[%s13542_s7 + $0x60] sm:$0xf]  ;;  %v939_v4 = vld [vmem:[%s13542_s7 + $0x68] sm:$0xf] }
  0x6d   : > { %9255 = vmatpush3.bf16.msra.mxu0 %v10117_v15  ;;  %v485_v15 = vmax.f32 %v453_v3, 0.0  ;;  %v456_v24 = vadd.f32 %v10601_v21, %v417_v13  ;;  %v457_v25 = vadd.f32 %v10601_v21, %v418_v14  ;;  %v487_v36 = vmax.f32 %v455_v22, 0.0  ;;  %v942_v14 = vld [vmem:[%s13542_s7 + $0x74] sm:$0xf] }
  0x6e   : > { %9256 = vmatprep.subr.bf16.mxu0 %v10118_v30  ;;  %v425_v54 = vmul.f32 %v10594_v18, %v386_v45  ;;  %v426_v56 = vmul.f32 %v10594_v18, %v387_v46  ;;  %v461_v63 = vadd.f32 %v10601_v21, %v422_v44  ;;  %v462_v0 = vadd.f32 %v10601_v21, %v423_v48  ;;  %v396_v44 = vld [vmem:[%s10534_s19 + $0xe8] sm:$0xff] }
  0x6f   : > { %1079 = vperm.xlu1 %10112, %v924_v28   ;;  %1067 = vperm.xlu0 %10111, %v923_v29   ;;  %v398_v28 = vld [vmem:[%s10534_s19 + $0xf8] sm:$0xff]  ;;  %v513_v29 = vpack.c.bf16 %v486_v16, %v485_v15  ;;  %v488_v41 = vmax.f32 %v456_v24, 0.0  ;;  %v489_v42 = vmax.f32 %v457_v25, 0.0  ;;  %v427_v3 = vmul.f32 %v10594_v18, %v388_v55  ;;  %v392_v25 = vld [vmem:[%s10534_s19 + $0xc8] sm:$0xff] }
  0x70   : > { %v464_v6 = vadd.f32 %v10601_v21, %v425_v54  ;;  %v465_v7 = vadd.f32 %v10601_v21, %v426_v56  ;;  %v493_v12 = vmax.f32 %v461_v63, 0.0  ;;  %v494_v13 = vmax.f32 %v462_v0, 0.0  ;;  %v2335_v46 = vld [vmem:[%s13543_s8 + $0xc] sm:$0xf]  ;;  %v2337_v56 = vld [vmem:[%s13543_s8 + $0x14] sm:$0xf] }
  0x71   : > { %9257 = vmatpush3.bf16.msra.mxu0 %v10118_v30  ;;  %v458_v30 = vadd.f32 %v10601_v21, %v419_v17  ;;  %v514_v59 = vpack.c.bf16 %v488_v41, %v487_v36  ;;  %v466_v15 = vadd.f32 %v10601_v21, %v427_v3  ;;  %v394_v36 = vld [vmem:[%s10534_s19 + $0xd8] sm:$0xff]  ;;  %v435_v54 = vmul.f32 %v10594_v18, %v396_v44 }
  0x72   : > { %9258 = vmatprep.subr.bf16.mxu0 %v10119_v40  ;;  %v497_v24 = vmax.f32 %v465_v7, 0.0 }
  0x73   : > { %1103 = vperm.xlu1 %10112, %v926_v38   ;;  %1091 = vperm.xlu0 %10111, %v925_v39   ;;  %v385_v38 = vld [vmem:[%s10534_s19 + $0x90] sm:$0xff]  ;;  %v436_v39 = vmul.f32 %v10594_v18, %v397_v27  ;;  %v490_v47 = vmax.f32 %v458_v30, 0.0  ;;  %v944_v27 = vld [vmem:[%s13542_s7 + $0x7c] sm:$0xf]  ;;  %v943_v30 = vld [vmem:[%s13542_s7 + $0x78] sm:$0xf] }
  0x74   : > { %v424_v52 = vmul.f32 %v10594_v18, %v385_v38  ;;  %v498_v31 = vmax.f32 %v466_v15, 0.0  ;;  %v2332_v38 = vld [vmem:[%s13543_s8] sm:$0xf] }
  0x75   : > { %9259 = vmatpush3.bf16.msra.mxu0 %v10119_v40  ;;  %v437_v40 = vmul.f32 %v10594_v18, %v398_v28  ;;  %v517_v28 = vpack.c.bf16 %v494_v13, %v493_v12  ;;  %v2347_v12 = vld [vmem:[%s13543_s8 + $0x3c] sm:$0xf]  ;;  %v2346_v13 = vld [vmem:[%s13543_s8 + $0x38] sm:$0xf]  ;;  %v2348_v15 = vld [vmem:[%s13543_s8 + $0x40] sm:$0xf] }
  0x76   : > { %9260 = vmatprep.subr.bf16.mxu0 %v10120_v51  ;;  %v463_v5 = vadd.f32 %v10601_v21, %v424_v52 }
  0x77   : > { %1127 = vperm.xlu1 %10112, %v928_v49   ;;  %1115 = vperm.xlu0 %10111, %v927_v50   ;;  %v475_v49 = vadd.f32 %v10601_v21, %v436_v39  ;;  %v476_v50 = vadd.f32 %v10601_v21, %v437_v40 }
  0x78   : > { %v495_v22 = vmax.f32 %v463_v5, 0.0  ;;  %v2340_v5 = vld [vmem:[%s13543_s8 + $0x20] sm:$0xf] }
  0x79   : > { %9261 = vmatpush3.bf16.msra.mxu0 %v10120_v51  ;;  %v938_v51 = vld [vmem:[%s13542_s7 + $0x64] sm:$0xf]  ;;  %v507_v57 = vmax.f32 %v475_v49, 0.0  ;;  %v508_v58 = vmax.f32 %v476_v50, 0.0  ;;  %v433_v49 = vmul.f32 %v10594_v18, %v394_v36  ;;  %v2334_v50 = vld [vmem:[%s13543_s8 + $0x8] sm:$0xf] }
  0x7a   : > { %v4963_v36 = vld [vmem:[%s13543_s8 + $0x14] sm:$0xf] }
  0x7b   : > { %1151 = vperm.xlu1 %10112, %v930_v60   ;;  %1139 = vperm.xlu0 %10111, %v929_v61   ;;  %v459_v60 = vadd.f32 %v10601_v21, %v420_v37  ;;  %v460_v61 = vadd.f32 %v10601_v21, %v421_v43  ;;  %v10723_v1 = vpack.c.bf16 %v508_v58, %v507_v57  ;;  %v2333_v37 = vld [vmem:[%s13543_s8 + $0x4] sm:$0xf]  ;;  %v2336_v57 = vld [vmem:[%s13543_s8 + $0x10] sm:$0xf] }
  0x7c   : > { %9263 = vmatmul.mubr.bf16.vlgmr.msra.gmra.mrb[0].mxu0 %v510_v62  ;;  %v515_v62 = vpack.c.bf16 %v490_v47, %v489_v42  ;;  %v395_v43 = vld [vmem:[%s10534_s19 + $0xe0] sm:$0xff]  ;;  %v519_v47 = vpack.c.bf16 %v498_v31, %v497_v24  ;;  %v472_v58 = vadd.f32 %v10601_v21, %v433_v49  ;;  %v2354_v24 = vld [vmem:[%s13543_s8 + $0x58] sm:$0xf]  ;;  %v4962_v31 = vld [vmem:[%s13543_s8 + $0x10] sm:$0xf] }
  0x7d   : > { %9266 = vmatprep.mubr.bf16.mxu0 %v511_v2  ;;  %v940_v2 = vld [vmem:[%s13542_s7 + $0x6c] sm:$0xf]  ;;  %v491_v10 = vmax.f32 %v459_v60, 0.0  ;;  %v492_v11 = vmax.f32 %v460_v61, 0.0  ;;  %v2339_v61 = vld [vmem:[%s13543_s8 + $0x1c] sm:$0xf] }
  0x7e   : > { %v4967_v49 = vld [vmem:[%s13543_s8 + $0x24] sm:$0xf] }
  0x7f   : > { %1175 = vperm.xlu1 %10112, %v932_v8   ;;  %1163 = vperm.xlu0 %10111, %v931_v9   ;;  %v389_v8 = vld [vmem:[%s10534_s19 + $0xb0] sm:$0xff]  ;;  %v390_v9 = vld [vmem:[%s10534_s19 + $0xb8] sm:$0xff]  ;;  %v516_v26 = vpack.c.bf16 %v492_v11, %v491_v10 }
  0x80   : > { %v428_v16 = vmul.f32 %v10594_v18, %v389_v8  ;;  %v429_v17 = vmul.f32 %v10594_v18, %v390_v9  ;;  %v2343_v8 = vld [vmem:[%s13543_s8 + $0x2c] sm:$0xf]  ;;  %v2342_v9 = vld [vmem:[%s13543_s8 + $0x28] sm:$0xf]  ;;  %v2345_v10 = vld [vmem:[%s13543_s8 + $0x34] sm:$0xf] }
  0x81   : > { %v2344_v11 = vld [vmem:[%s13543_s8 + $0x30] sm:$0xf] }
  0x82   : > { %v467_v32 = vadd.f32 %v10601_v21, %v428_v16  ;;  %v468_v33 = vadd.f32 %v10601_v21, %v429_v17  ;;  %v2351_v16 = vld [vmem:[%s13543_s8 + $0x4c] sm:$0xf]  ;;  %v10121_v17 = vld [vmem:[#allocation6 + $0x100] sm:$0xff]  }
  0x83   : > { %1199 = vperm.xlu1 %10112, %v934_v19   ;;  %1187 = vperm.xlu0 %10111, %v933_v20   ;;  %v391_v19 = vld [vmem:[%s10534_s19 + $0xc0] sm:$0xff]  ;;  %v941_v20 = vld [vmem:[%s13542_s7 + $0x70] sm:$0xf] }
  0x84   : > { %9267 = vmatmul.mubr.bf16.gmra.mrb[4].mxu0 %v512_v23  ;;  %v496_v23 = vmax.f32 %v464_v6, 0.0  ;;  %v499_v39 = vmax.f32 %v467_v32, 0.0  ;;  %v500_v40 = vmax.f32 %v468_v33, 0.0  ;;  %9486 = vmatprep.subr.bf16.mxu1 %v10121_v17  ;;  %v4961_v32 = vld [vmem:[%s13543_s8 + $0xc] sm:$0xf]  ;;  %v10127_v33 = vld [vmem:[#allocation6 + $0x120] sm:$0xff]  }
  0x85   : > { %9270 = vmatprep.mubr.bf16.mxu0 %v513_v29  ;;  %v430_v29 = vmul.f32 %v10594_v18, %v391_v19  ;;  %9487 = vmatpush3.bf16.msra.mxu1 %v10121_v17  ;;  %v2353_v19 = vld [vmem:[%s13543_s8 + $0x54] sm:$0xf] }
  0x86   : > { %v518_v45 = vpack.c.bf16 %v496_v23, %v495_v22  ;;  %v520_v60 = vpack.c.bf16 %v500_v40, %v499_v39  ;;  %v10122_v22 = vld [vmem:[#allocation6 + $0x108] sm:$0xff]   ;;  %v4958_v23 = vld [vmem:[%s13543_s8] sm:$0xf]  ;;  %v10335_v39 = vmov 839922192  }
  0x87   : > { %1223 = vperm.xlu1 %10112, %v936_v34   ;;  %1211 = vperm.xlu0 %10111, %v935_v35   ;;  %v431_v34 = vmul.f32 %v10594_v18, %v392_v25  ;;  %v393_v35 = vld [vmem:[%s10534_s19 + $0xd0] sm:$0xff]  ;;  %v469_v41 = vadd.f32 %v10601_v21, %v430_v29  ;;  %v10125_v29 = vld [vmem:[#allocation6 + $0x118] sm:$0xff]   ;;  %v951_v40 = vunpack.c.l.s4 %v10335_v39  ;;  %s10262_s19 = scalar_lea.vmem %s10261_s15, 8192 }
  0x88   : > { %v432_v48 = vmul.f32 %v10594_v18, %v393_v35  ;;  %9488 = vmatprep.subr.bf16.mxu1 %v10122_v22  ;;  %v10123_v25 = vld [vmem:[#allocation6 + $0x110] sm:$0xff]   ;;  %v4964_v35 = vld [vmem:[%s13543_s8 + $0x18] sm:$0xf]  ;;  %p10264_p13 = scmp.lt.s32.totalorder %s10262_s19, %s10256_s26 }
  0x89   : > { %v470_v42 = vadd.f32 %v10601_v21, %v431_v34  ;;  %9489 = vmatpush3.bf16.msra.mxu1 %v10122_v22  ;;  %v10128_v34 = vld [vmem:[#allocation6 + $0x10] sm:$0xff]   ;;  %v952_v44 = vunpack.c.0.s8 %v951_v40  ;;  %v4975_v22 = vld [vmem:[%s13543_s8 + $0x44] sm:$0xf] }
  0x8a   : > { %v471_v55 = vadd.f32 %v10601_v21, %v432_v48  ;;  %9490 = vmatprep.subr.bf16.mxu1 %v10123_v25  ;;  %v4968_v48 = vld [vmem:[%s13543_s8 + $0x28] sm:$0xf]  ;;  %v4979_v40 = vld [vmem:[%s13543_s8 + $0x54] sm:$0xf]  ;;  %p10265_p3 = por %p10264_p13, %p10263_p10 }
  0x8b   : > { %1247 = vperm.xlu1 %10112, %v938_v51   ;;  %1235 = vperm.xlu0 %10111, %v937_v53   ;;  %v501_v51 = vmax.f32 %v469_v41, 0.0  ;;  %v502_v52 = vmax.f32 %v470_v42, 0.0  ;;  %v434_v53 = vmul.f32 %v10594_v18, %v395_v43  ;;  %v474_v18 = vadd.f32 %v10601_v21, %v435_v54  ;;  %v4966_v42 = vld [vmem:[%s13543_s8 + $0x20] sm:$0xf]  ;;  %v4965_v43 = vld [vmem:[%s13543_s8 + $0x1c] sm:$0xf] }
  0x8c   : > { %9271 = vmatmul.mubr.bf16.gmra.mrb[8].mxu0 %v514_v59  ;;  %v503_v0 = vmax.f32 %v471_v55, 0.0  ;;  %v953_v41 = vlaneseq  ;;  %v4970_v55 = vld [vmem:[%s13543_s8 + $0x30] sm:$0xf]  ;;  %p10266_p7 = pnand %p10265_p3, %p10259_p8 }
  0x8d   : > { %9274 = vmatprep.mubr.bf16.mxu0 %v515_v62  ;;  %v473_v59 = vadd.f32 %v10601_v21, %v434_v53  ;;  %v2338_v62 = vld [vmem:[%s13543_s8 + $0x18] sm:$0xf]  ;;  %v521_v63 = vpack.c.bf16 %v502_v52, %v501_v51  ;;  %v2341_v21 = vld [vmem:[%s13543_s8 + $0x24] sm:$0xf]  ;;  %9491 = vmatpush3.bf16.msra.mxu1 %v10123_v25  ;;  %v10134_v52 = vld [vmem:[#allocation6 + $0x28] sm:$0xff]  }
  0x8e   : > { %9492 = vmatprep.subr.bf16.mxu1 %v10125_v29  ;;  %v10133_v51 = vld [vmem:[#allocation6 + $0x138] sm:$0xff]  }
  0x8f   : > { %1271 = vperm.xlu1 %10112, %v940_v2   ;;  %1259 = vperm.xlu0 %10111, %v939_v4   ;;  %v504_v2 = vmax.f32 %v472_v58, 0.0  ;;  %v505_v3 = vmax.f32 %v473_v59, 0.0  ;;  %v506_v4 = vmax.f32 %v474_v18, 0.0  ;;  %v10136_v59 = vld [vmem:[#allocation6 + $0x30] sm:$0xff]  }
  0x91   : > { %v522_v6 = vpack.c.bf16 %v504_v2, %v503_v0  ;;  %v523_v7 = vpack.c.bf16 %v506_v4, %v505_v3  ;;  %9493 = vmatpush3.bf16.msra.mxu1 %v10125_v29  ;;  %v4971_v0 = vld [vmem:[%s13543_s8 + $0x34] sm:$0xf]  ;;  %v10137_v4 = vld [vmem:[#allocation6 + $0x38] sm:$0xff]   ;;  %v4978_v29 = vld [vmem:[%s13543_s8 + $0x50] sm:$0xf] }
  0x92   : > { %9494 = vmatprep.subr.bf16.mxu1 %v10127_v33 }
  0x93   : > { %1295 = vperm.xlu1 %10112, %v942_v14   ;;  %1283 = vperm.xlu0 %10111, %v941_v20   ;;  %v2349_v14 = vld [vmem:[%s13543_s8 + $0x44] sm:$0xf]  ;;  %v2352_v20 = vld [vmem:[%s13543_s8 + $0x50] sm:$0xf] }
  0x94   : > { %9275 = vmatmul.mubr.bf16.gmra.mrb[12].mxu0 %v516_v26  ;;  %v10124_v26 = vld [vmem:[#allocation6] sm:$0xff]  }
  0x95   : > { %9278 = vmatprep.mubr.bf16.mxu0 %v517_v28  ;;  %9294 = vmatprep.subr.bf16.mxu0 %v10124_v26  ;;  %v4959_v28 = vld [vmem:[%s13543_s8 + $0x4] sm:$0xf] }
  0x96   : > { %9295 = vmatpush3.bf16.msra.mxu0 %v10124_v26  ;;  %9495 = vmatpush3.bf16.msra.mxu1 %v10127_v33  ;;  %v10920_v26 = vld [vmem:[#allocation2] sm:$0xff] }
  0x97   : > { %1319 = vperm.xlu1 %10112, %v944_v27   ;;  %1307 = vperm.xlu0 %10111, %v943_v30   ;;  %v4960_v27 = vld [vmem:[%s13543_s8 + $0x8] sm:$0xf]  ;;  %v10929_v33 = vld [vmem:[#allocation6 + $0x140] sm:$0xff]  }
  0x98   : > { %v10126_v30 = vld [vmem:[#allocation6 + $0x8] sm:$0xff]  }
  0x99   : > { %9296 = vmatprep.subr.bf16.mxu0 %v10126_v30 }
  0x9a   : > { %9297 = vmatpush3.bf16.msra.mxu0 %v10126_v30 }
  0x9b   : > { %2378 = vperm.xlu1 %10112, %v2333_v37   ;;  %2366 = vperm.xlu0 %10111, %v2332_v38   ;;  %v10129_v37 = vld [vmem:[#allocation6 + $0x128] sm:$0xff]   ;;  %v10130_v38 = vld [vmem:[#allocation6 + $0x18] sm:$0xff]  }
  0x9c   : > { %9279 = vmatmul.mubr.bf16.gmra.mrb[16].mxu0 %v518_v45  ;;  %9298 = vmatprep.subr.bf16.mxu0 %v10128_v34  ;;  %v954_v45 = vshrl.u32 %v953_v41, 7 }
  0x9d   : > { %9282 = vmatprep.mubr.bf16.mxu0 %v519_v47  ;;  %9496 = vmatprep.subr.bf16.mxu1 %v10129_v37  ;;  %v10132_v47 = vld [vmem:[#allocation6 + $0x20] sm:$0xff]  }
  0x9e   : > { %9299 = vmatpush3.bf16.msra.mxu0 %v10128_v34  ;;  %9497 = vmatpush3.bf16.msra.mxu1 %v10129_v37 }
  0x9f   : > { %2402 = vperm.xlu1 %10112, %v2335_v46   ;;  %2390 = vperm.xlu0 %10111, %v2334_v50   ;;  %v10131_v46 = vld [vmem:[#allocation6 + $0x130] sm:$0xff]   ;;  %v10875_v50 = vsub.s32 %v952_v44, %v954_v45  ;;  %v4982_v44 = vld [vmem:[%s13543_s8 + $0x60] sm:$0xf]  ;;  %v4981_v45 = vld [vmem:[%s13543_s8 + $0x5c] sm:$0xf] }
  0xa0   : > { %9300 = vmatprep.subr.bf16.mxu0 %v10130_v38  ;;  %9498 = vmatprep.subr.bf16.mxu1 %v10131_v46 }
  0xa2   : > { %9301 = vmatpush3.bf16.msra.mxu0 %v10130_v38  ;;  %9499 = vmatpush3.bf16.msra.mxu1 %v10131_v46  ;;  %v4980_v38 = vld [vmem:[%s13543_s8 + $0x58] sm:$0xf] }
  0xa3   : > { %2426 = vperm.xlu1 %10112, %v2337_v56   ;;  %2414 = vperm.xlu0 %10111, %v2336_v57   ;;  %v4969_v56 = vld [vmem:[%s13543_s8 + $0x2c] sm:$0xf] }
  0xa4   : > { %9283 = vmatmul.mubr.bf16.gmra.mrb[20].mxu0 %v520_v60  ;;  %9302 = vmatprep.subr.bf16.mxu0 %v10132_v47 }
  0xa5   : > { %9286 = vmatprep.mubr.bf16.mxu0 %v521_v63  ;;  %9500 = vmatprep.subr.bf16.mxu1 %v10133_v51  ;;  %v4972_v63 = vld [vmem:[%s13543_s8 + $0x38] sm:$0xf] }
  0xa6   : > { %9303 = vmatpush3.bf16.msra.mxu0 %v10132_v47  ;;  %9501 = vmatpush3.bf16.msra.mxu1 %v10133_v51 }
  0xa7   : > { %2450 = vperm.xlu1 %10112, %v2339_v61   ;;  %2438 = vperm.xlu0 %10111, %v2338_v62  }
  0xa8   : > { %9304 = vmatprep.subr.bf16.mxu0 %v10134_v52  ;;  %9534 = vmatprep.subr.bf16.mxu1 %v10929_v33 }
  0xaa   : > { %9305 = vmatpush3.bf16.msra.mxu0 %v10134_v52 }
  0xab   : > { %2474 = vperm.xlu1 %10112, %v2341_v21   ;;  %2462 = vperm.xlu0 %10111, %v2340_v5  }
  0xac   : > { %9287 = vmatmul.mubr.bf16.gmra.mrb[24].mxu0 %v522_v6  ;;  %9306 = vmatprep.subr.bf16.mxu0 %v10136_v59 }
  0xad   : > { %9290 = vmatprep.mubr.bf16.mxu0 %v523_v7 }
  0xae   : > { %9307 = vmatpush3.bf16.msra.mxu0 %v10136_v59 }
  0xaf   : > { %2498 = vperm.xlu1 %10112, %v2343_v8   ;;  %2486 = vperm.xlu0 %10111, %v2342_v9  }
  0xb0   : > { %9308 = vmatprep.subr.bf16.mxu0 %v10137_v4 }
  0xb2   : > { %9309 = vmatpush3.bf16.msra.mxu0 %v10137_v4 }
  0xb3   : > { %2522 = vperm.xlu1 %10112, %v2345_v10   ;;  %2510 = vperm.xlu0 %10111, %v2344_v11   ;;  %v4974_v10 = vld [vmem:[%s13543_s8 + $0x40] sm:$0xf] }
  0xb4   : > { %9291 = vmatmul.mubr.bf16.gmra.mrb[28].mxu0 %v10723_v1  ;;  %v2350_v1 = vld [vmem:[%s13543_s8 + $0x48] sm:$0xf] }
  0xb7   : > { %2546 = vperm.xlu1 %10112, %v2347_v12   ;;  %2534 = vperm.xlu0 %10111, %v2346_v13   ;;  %v4973_v13 = vld [vmem:[%s13543_s8 + $0x3c] sm:$0xf] }
  0xbb   : > { %2570 = vperm.xlu1 %10112, %v2349_v14   ;;  %2558 = vperm.xlu0 %10111, %v2348_v15   ;;  %v896_v14 = vld [vmem:[#allocation2] sm:$0x80] }
  0xbf   : > { %2594 = vperm.xlu1 %10112, %v2351_v16   ;;  %2582 = vperm.xlu0 %10111, %v2350_v1  }
  0xc3   : > { %2618 = vperm.xlu1 %10112, %v2353_v19   ;;  %2606 = vperm.xlu0 %10111, %v2352_v20   ;;  %v4976_v19 = vld [vmem:[%s13543_s8 + $0x48] sm:$0xf] }
  0xc7   : > { %4992 = vperm.xlu1 %10112, %v4958_v23   ;;  %2630 = vperm.xlu0 %10111, %v2354_v24  }
  0xcb   : > { %5016 = vperm.xlu1 %10112, %v4960_v27   ;;  %5004 = vperm.xlu0 %10111, %v4959_v28  }
  0xcf   : > { %5040 = vperm.xlu1 %10112, %v4962_v31   ;;  %5028 = vperm.xlu0 %10111, %v4961_v32   ;;  %v4977_v31 = vld [vmem:[%s13543_s8 + $0x4c] sm:$0xf] }
  0xd3   : > { %5064 = vperm.xlu1 %10112, %v4964_v35   ;;  %5052 = vperm.xlu0 %10111, %v4963_v36  }
  0xd7   : > { %5088 = vperm.xlu1 %10112, %v4966_v42   ;;  %5076 = vperm.xlu0 %10111, %v4965_v43  }
  0xda   : > { %v972_v53 = vpop.permute.xlu1 %971  ;;  %v948_v54 = vpop.permute.xlu0 %947 }
  0xdb   : > { %5112 = vperm.xlu1 %10112, %v4968_v48   ;;  %5100 = vperm.xlu0 %10111, %v4967_v49   ;;  %v980_v57 = vrot.slane %v972_v53, %v10875_v50  ;;  %v956_v58 = vrot.slane %v948_v54, %v10875_v50  ;;  %v4984_v48 = vld [vmem:[%s13543_s8 + $0x68] sm:$0xf]  ;;  %v4983_v49 = vld [vmem:[%s13543_s8 + $0x64] sm:$0xf]  ;;  %v4986_v53 = vld [vmem:[%s13543_s8 + $0x70] sm:$0xf] }
  0xdc   : > { %v4985_v54 = vld [vmem:[%s13543_s8 + $0x6c] sm:$0xf] }
  0xde   : > { %v984_v18 = vpop.permute.xlu1 %983  ;;  %v960_v60 = vpop.permute.xlu0 %959 }
  0xdf   : > { %v992_v61 = vrot.slane %v984_v18, %v10875_v50  ;;  %v968_v62 = vrot.slane %v960_v60, %v10875_v50  ;;  %5136 = vperm.xlu1 %10112, %v4970_v55   ;;  %5124 = vperm.xlu0 %10111, %v4969_v56   ;;  %v6102_v60 = vld [vmem:[%s13542_s7] sm:$0xf] }
  0xe1   : > { %v8832_v2 = vcombine.low %v980_v57, %v992_v61  ;;  %v8831_v3 = vcombine.low %v956_v58, %v968_v62  ;;  %v4988_v57 = vld [vmem:[%s13543_s8 + $0x78] sm:$0xf]  ;;  %v4987_v58 = vld [vmem:[%s13543_s8 + $0x74] sm:$0xf]  ;;  %v4989_v61 = vld [vmem:[%s13543_s8 + $0x7c] sm:$0xf] }
  0xe2   : > { %v10893_v21 = vpop.permute.xlu1 %1007  ;;  %v10895_v5 = vpop.permute.xlu0 %995 }
  0xe3   : > { %v1418_v6 = vshll.u32 %v8832_v2, 16  ;;  %v1422_v7 = vshrl.u32 %v8832_v2, 16  ;;  %v1411_v8 = vshll.u32 %v8831_v3, 16  ;;  %v1414_v9 = vshrl.u32 %v8831_v3, 16  ;;  %5160 = vperm.xlu1 %10112, %v4972_v63   ;;  %5148 = vperm.xlu0 %10111, %v4971_v0   ;;  %v6104_v0 = vld [vmem:[%s13542_s7 + $0x8] sm:$0xf] }
  0xe4   : > { %v6103_v2 = vld [vmem:[%s13542_s7 + $0x4] sm:$0xf] }
  0xe5   : > { %v1420_v11 = vrot.slane %v1418_v6, 1  ;;  %v1413_v12 = vrot.slane %v1411_v8, 1  ;;  %v6106_v6 = vld [vmem:[%s13542_s7 + $0x10] sm:$0xf] }
  0xe6   : > { %v10903_v15 = vpop.permute.xlu1 %1031  ;;  %v10905_v16 = vpop.permute.xlu0 %1019 }
  0xe7   : > { %v10907_v1 = vor.u32 %v1422_v7, %v1420_v11  ;;  %v1416_v17 = vor.u32 %v1414_v9, %v1413_v12  ;;  %5184 = vperm.xlu1 %10112, %v4974_v10   ;;  %5172 = vperm.xlu0 %10111, %v4973_v13   ;;  %v1554_v20 = vmul.bf16 %v1413_v12, %v896_v14  ;;  %v6105_v7 = vld [vmem:[%s13542_s7 + $0xc] sm:$0xf]  ;;  %v6108_v10 = vld [vmem:[%s13542_s7 + $0x18] sm:$0xf]  ;;  %v6110_v14 = vld [vmem:[%s13542_s7 + $0x20] sm:$0xf] }
  0xe9   : > { %v1421_v23 = vsel %vm1409_vm0, %v1416_v17, %v1420_v11  ;;  %v1589_v28 = vshrl.u32 %v1554_v20, 16  ;;  %v6107_v11 = vld [vmem:[%s13542_s7 + $0x14] sm:$0xf]  ;;  %v6109_v17 = vld [vmem:[%s13542_s7 + $0x1c] sm:$0xf] }
  0xea   : > { %v10916_v24 = vpop.permute.xlu1 %1055  ;;  %v10918_v25 = vpop.permute.xlu0 %1043  ;;  %v1555_v27 = vmul.bf16 %v10920_v26, %v1421_v23  ;;  %v6111_v23 = vld [vmem:[%s13542_s7 + $0x24] sm:$0xf] }
  0xeb   : > { %5208 = vperm.xlu1 %10112, %v4976_v19   ;;  %5196 = vperm.xlu0 %10111, %v4975_v22   ;;  %v1591_v36 = vrot.slane %v1589_v28, 7  ;;  %v6112_v22 = vld [vmem:[%s13542_s7 + $0x28] sm:$0xf] }
  0xec   : > { %v1593_v30 = vshrl.u32 %v1555_v27, 16  ;;  %v1596_v32 = vshll.u32 %v1555_v27, 16 }
  0xee   : > { %v10931_v34 = vpop.permute.xlu1 %1079  ;;  %v10933_v35 = vpop.permute.xlu0 %1067  ;;  %v10935_v37 = vrot.slane %v1593_v30, 7  ;;  %v6113_v30 = vld [vmem:[%s13542_s7 + $0x2c] sm:$0xf] }
  0xef   : > { %5232 = vperm.xlu1 %10112, %v4978_v29   ;;  %5220 = vperm.xlu0 %10111, %v4977_v31   ;;  %v6114_v29 = vld [vmem:[%s13542_s7 + $0x30] sm:$0xf] }
  0xf0   : > { %v1598_v39 = vor.u32 %v1596_v32, %v10935_v37 }
  0xf2   : > { %v10945_v41 = vpop.permute.xlu1 %1103  ;;  %v10947_v42 = vpop.permute.xlu0 %1091  ;;  %v1599_v43 = vsel %vm1587_vm1, %v1591_v36, %v1598_v39  ;;  %v11060_v36 = vld [vmem:[#allocation6 + $0x40] sm:$0xff]   ;;  %v1004_v39 = vrot.slane %v10895_v5, %v10875_v50  ;;  %v1064_v5 = vrot.slane %v10916_v24, %v10875_v50 }
  0xf3   : > { %5256 = vperm.xlu1 %10112, %v4980_v38   ;;  %5244 = vperm.xlu0 %10111, %v4979_v40   ;;  %v1016_v38 = vrot.slane %v10893_v21, %v10875_v50  ;;  %v1040_v40 = vrot.slane %v10903_v15, %v10875_v50  ;;  %v6115_v21 = vld [vmem:[%s13542_s7 + $0x34] sm:$0xf]  ;;  %v1052_v15 = vrot.slane %v10918_v25, %v10875_v50  ;;  %v6118_v24 = vld [vmem:[%s13542_s7 + $0x40] sm:$0xf]  ;;  %v6117_v25 = vld [vmem:[%s13542_s7 + $0x3c] sm:$0xf] }
  0xf4   : > { %9310 = vmatprep.mubr.bf16.mxu0 %v1599_v43  ;;  %v1028_v43 = vrot.slane %v10905_v16, %v10875_v50  ;;  %9342 = vmatprep.subr.bf16.mxu0 %v11060_v36 }
  0xf6   : > { %v10956_v46 = vpop.permute.xlu1 %1127  ;;  %v10958_v47 = vpop.permute.xlu0 %1115 }
  0xf7   : > { %5280 = vperm.xlu1 %10112, %v4982_v44   ;;  %5268 = vperm.xlu0 %10111, %v4981_v45   ;;  %v6116_v44 = vld [vmem:[%s13542_s7 + $0x38] sm:$0xf] }
  0xfa   : > { %v10966_v51 = vpop.permute.xlu1 %1151  ;;  %v10968_v52 = vpop.permute.xlu0 %1139 }
  0xfb   : > { %5304 = vperm.xlu1 %10112, %v4984_v48   ;;  %5292 = vperm.xlu0 %10111, %v4983_v49   ;;  %v8833_v48 = vcombine.low %v1004_v39, %v1016_v38  ;;  %v8834_v49 = vcombine.low %v1028_v43, %v1040_v40  ;;  %v6121_v43 = vld [vmem:[%s13542_s7 + $0x4c] sm:$0xf] }
  0xfe   : > { %v10976_v55 = vpop.permute.xlu1 %1175  ;;  %v10978_v56 = vpop.permute.xlu0 %1163 }
  0xff   : > { %5328 = vperm.xlu1 %10112, %v4986_v53   ;;  %5316 = vperm.xlu0 %10111, %v4985_v54   ;;  %v1088_v53 = vrot.slane %v10931_v34, %v10875_v50  ;;  %v1076_v54 = vrot.slane %v10933_v35, %v10875_v50  ;;  %v1100_v34 = vrot.slane %v10947_v42, %v10875_v50  ;;  %v1430_v42 = vshrl.u32 %v8833_v48, 16 }
 0x100   : > { %v1184_v40 = vrot.slane %v10976_v55, %v10875_v50 }
 0x102   : > { %v10986_v59 = vpop.permute.xlu1 %1199  ;;  %v10988_v18 = vpop.permute.xlu0 %1187 }
 0x103   : > { %5352 = vperm.xlu1 %10112, %v4988_v57   ;;  %5340 = vperm.xlu0 %10111, %v4987_v58   ;;  %v8835_v57 = vcombine.low %v1052_v15, %v1064_v5  ;;  %v1112_v58 = vrot.slane %v10945_v41, %v10875_v50  ;;  %v6120_v41 = vld [vmem:[%s13542_s7 + $0x48] sm:$0xf] }
 0x106   : > { %v10996_v62 = vpop.permute.xlu1 %1223  ;;  %v10998_v63 = vpop.permute.xlu0 %1211 }
 0x107   : > { %6136 = vperm.xlu1 %10112, %v6102_v60   ;;  %5364 = vperm.xlu0 %10111, %v4989_v61   ;;  %v1426_v61 = vshll.u32 %v8833_v48, 16 }
 0x10a   : > { %v11006_v3 = vpop.permute.xlu1 %1247  ;;  %v11008_v4 = vpop.permute.xlu0 %1235 }
 0x10b   : > { %6160 = vperm.xlu1 %10112, %v6104_v0   ;;  %6148 = vperm.xlu0 %10111, %v6103_v2   ;;  %v1434_v0 = vshll.u32 %v8834_v49, 16  ;;  %v8836_v2 = vcombine.low %v1076_v54, %v1088_v53 }
 0x10d   : > { %v1450_v38 = vshll.u32 %v8836_v2, 16  ;;  %v1454_v54 = vshrl.u32 %v8836_v2, 16  ;;  %v1256_v2 = vrot.slane %v11006_v3, %v10875_v50 }
 0x10e   : > { %v11016_v8 = vpop.permute.xlu1 %1271  ;;  %v11018_v9 = vpop.permute.xlu0 %1259 }
 0x10f   : > { %6184 = vperm.xlu1 %10112, %v6106_v6   ;;  %6172 = vperm.xlu0 %10111, %v6105_v7   ;;  %v1136_v6 = vrot.slane %v10956_v46, %v10875_v50  ;;  %v1124_v7 = vrot.slane %v10958_v47, %v10875_v50  ;;  %v1148_v46 = vrot.slane %v10968_v52, %v10875_v50  ;;  %v6122_v52 = vld [vmem:[%s13542_s7 + $0x50] sm:$0xf]  ;;  %v1452_v53 = vrot.slane %v1450_v38, 1 }
 0x111   : > { %v11121_v39 = vcombine.low %v1124_v7, %v1136_v6 }
 0x112   : > { %v11026_v12 = vpop.permute.xlu1 %1295  ;;  %v11028_v13 = vpop.permute.xlu0 %1283 }
 0x113   : > { %6208 = vperm.xlu1 %10112, %v6108_v10   ;;  %6196 = vperm.xlu0 %10111, %v6107_v11   ;;  %v6119_v10 = vld [vmem:[%s13542_s7 + $0x44] sm:$0xf]  ;;  %v1442_v11 = vshll.u32 %v8835_v57, 16 }
 0x116   : > { %v11036_v19 = vpop.permute.xlu1 %1319  ;;  %v11038_v20 = vpop.permute.xlu0 %1307 }
 0x117   : > { %6232 = vperm.xlu1 %10112, %v6110_v14   ;;  %6220 = vperm.xlu0 %10111, %v6109_v17   ;;  %v8837_v14 = vcombine.low %v1100_v34, %v1112_v58  ;;  %v1160_v17 = vrot.slane %v10966_v51, %v10875_v50  ;;  %v1172_v51 = vrot.slane %v10978_v56, %v10875_v50  ;;  %v6124_v34 = vld [vmem:[%s13542_s7 + $0x58] sm:$0xf] }
 0x118   : > { %v1208_v58 = vrot.slane %v10986_v59, %v10875_v50  ;;  %v1244_v59 = vrot.slane %v11008_v4, %v10875_v50 }
 0x119   : > { %v1458_v5 = vshll.u32 %v8837_v14, 16  ;;  %v11133_v15 = vcombine.low %v1148_v46, %v1160_v17 }
 0x11a   : > { %v11046_v27 = vpop.permute.xlu1 %2378  ;;  %v11048_v28 = vpop.permute.xlu0 %2366 }
 0x11b   : > { %6256 = vperm.xlu1 %10112, %v6112_v22   ;;  %6244 = vperm.xlu0 %10111, %v6111_v23   ;;  %v1428_v23 = vrot.slane %v1426_v61, 1  ;;  %v1232_v61 = vrot.slane %v10996_v62, %v10875_v50  ;;  %v1460_v7 = vrot.slane %v1458_v5, 1  ;;  %v2387_v46 = vrot.slane %v11046_v27, %v10875_v50  ;;  %v6125_v27 = vld [vmem:[%s13542_s7 + $0x5c] sm:$0xf] }
 0x11c   : > { %v1268_v5 = vrot.slane %v11018_v9, %v10875_v50 }
 0x11e   : > { %v11056_v31 = vpop.permute.xlu1 %2402  ;;  %v11058_v32 = vpop.permute.xlu0 %2390 }
 0x11f   : > { %6280 = vperm.xlu1 %10112, %v6114_v29   ;;  %6268 = vperm.xlu0 %10111, %v6113_v30   ;;  %v1436_v29 = vrot.slane %v1434_v0, 1  ;;  %v1438_v30 = vshrl.u32 %v8834_v49, 16  ;;  %v1432_v49 = vor.u32 %v1430_v42, %v1428_v23  ;;  %v1220_v0 = vrot.slane %v10998_v63, %v10875_v50 }
 0x120   : > { %v1474_v42 = vshll.u32 %v11133_v15, 16  ;;  %v11167_v63 = vsel %vm1409_vm0, %v10907_v1, %v1428_v23  ;;  %v6126_v1 = vld [vmem:[%s13542_s7 + $0x60] sm:$0xf] }
 0x121   : > { %v1440_v56 = vor.u32 %v1438_v30, %v1436_v29  ;;  %v11170_v3 = vsel %vm1409_vm0, %v1432_v49, %v1436_v29  ;;  %v2375_v30 = vrot.slane %v11048_v28, %v10875_v50  ;;  %v11186_v38 = vcombine.low %v1220_v0, %v1232_v61 }
 0x122   : > { %v11081_v45 = vpop.permute.xlu1 %2426  ;;  %v11083_v16 = vpop.permute.xlu0 %2414  ;;  %v1304_v49 = vrot.slane %v11026_v12, %v10875_v50  ;;  %v2411_v61 = vrot.slane %v11056_v31, %v10875_v50  ;;  %v2399_v0 = vrot.slane %v11058_v32, %v10875_v50 }
 0x123   : > { %6304 = vperm.xlu1 %10112, %v6116_v44   ;;  %6292 = vperm.xlu0 %10111, %v6115_v21   ;;  %v1444_v44 = vrot.slane %v1442_v11, 1  ;;  %v1446_v21 = vshrl.u32 %v8835_v57, 16  ;;  %v1196_v57 = vrot.slane %v10988_v18, %v10875_v50  ;;  %v6123_v18 = vld [vmem:[%s13542_s7 + $0x54] sm:$0xf]  ;;  %v1456_v11 = vor.u32 %v1454_v54, %v1452_v53 }
 0x125   : > { %v1448_v6 = vor.u32 %v1446_v21, %v1444_v44  ;;  %v11173_v4 = vsel %vm1409_vm0, %v1440_v56, %v1444_v44  ;;  %v11184_v29 = vcombine.low %v1196_v57, %v1208_v58  ;;  %v1280_v21 = vrot.slane %v11016_v8, %v10875_v50  ;;  %v6128_v8 = vld [vmem:[%s13542_s7 + $0x68] sm:$0xf]  ;;  %v6127_v57 = vld [vmem:[%s13542_s7 + $0x64] sm:$0xf] }
 0x126   : > { %v11099_v60 = vpop.permute.xlu1 %2450  ;;  %v11101_v35 = vpop.permute.xlu0 %2438  ;;  %v1292_v56 = vrot.slane %v11028_v13, %v10875_v50  ;;  %v1498_v58 = vshll.u32 %v11186_v38, 16 }
 0x127   : > { %6328 = vperm.xlu1 %10112, %v6118_v24   ;;  %6316 = vperm.xlu0 %10111, %v6117_v25   ;;  %v1466_v24 = vshll.u32 %v11121_v39, 16  ;;  %v11140_v25 = vcombine.low %v1172_v51, %v1184_v40  ;;  %v11188_v40 = vcombine.low %v1244_v59, %v1256_v2  ;;  %v1476_v51 = vrot.slane %v1474_v42, 1 }
 0x128   : > { %v1490_v12 = vshll.u32 %v11184_v29, 16  ;;  %v2435_v42 = vrot.slane %v11081_v45, %v10875_v50  ;;  %v1494_v45 = vshrl.u32 %v11184_v29, 16 }
 0x129   : > { %v1468_v17 = vrot.slane %v1466_v24, 1  ;;  %v1482_v23 = vshll.u32 %v11140_v25, 16  ;;  %v1486_v54 = vshrl.u32 %v11140_v25, 16  ;;  %v11213_v24 = vcombine.low %v2375_v30, %v2387_v46  ;;  %v6129_v30 = vld [vmem:[%s13542_s7 + $0x6c] sm:$0xf] }
 0x12a   : > { %v11117_v22 = vpop.permute.xlu1 %2474  ;;  %v11119_v47 = vpop.permute.xlu0 %2462  ;;  %v1506_v13 = vshll.u32 %v11188_v40, 16 }
 0x12b   : > { %6352 = vperm.xlu1 %10112, %v6120_v41   ;;  %6340 = vperm.xlu0 %10111, %v6119_v10   ;;  %v1462_v41 = vshrl.u32 %v8837_v14, 16  ;;  %v1470_v14 = vshrl.u32 %v11121_v39, 16  ;;  %v11194_v39 = vsel %vm1409_vm0, %v1448_v6, %v1452_v53  ;;  %v11210_v53 = vsel %vm1409_vm0, %v1456_v11, %v1460_v7 }
 0x12c   : > { %v1484_v9 = vrot.slane %v1482_v23, 1  ;;  %v11237_v6 = vcombine.low %v1292_v56, %v1304_v49  ;;  %v2829_v32 = vshrl.u32 %v11213_v24, 16  ;;  %v2423_v11 = vrot.slane %v11083_v16, %v10875_v50 }
 0x12d   : > { %v1464_v28 = vor.u32 %v1462_v41, %v1460_v7  ;;  %v1328_v7 = vrot.slane %v11036_v19, %v10875_v50  ;;  %v1316_v41 = vrot.slane %v11038_v20, %v10875_v50  ;;  %v6130_v19 = vld [vmem:[%s13542_s7 + $0x70] sm:$0xf]  ;;  %v1500_v20 = vrot.slane %v1498_v58, 1 }
 0x12e   : > { %v11135_v48 = vpop.permute.xlu1 %2498  ;;  %v11137_v55 = vpop.permute.xlu0 %2486  ;;  %v1508_v46 = vrot.slane %v1506_v13, 1  ;;  %v1502_v16 = vshrl.u32 %v11186_v38, 16  ;;  %v11262_v23 = vcombine.low %v2399_v0, %v2411_v61  ;;  %v11273_v49 = vrot.slane %v2829_v32, 7 }
 0x12f   : > { %6376 = vperm.xlu1 %10112, %v6122_v52   ;;  %6364 = vperm.xlu0 %10111, %v6121_v43   ;;  %v1478_v52 = vshrl.u32 %v11133_v15, 16  ;;  %v1472_v15 = vor.u32 %v1470_v14, %v1468_v17  ;;  %v11225_v25 = vsel %vm1409_vm0, %v1464_v28, %v1468_v17  ;;  %v1488_v17 = vor.u32 %v1486_v54, %v1484_v9 }
 0x130   : > { %v1492_v14 = vrot.slane %v1490_v12, 1  ;;  %v11275_v29 = vcombine.low %v2423_v11, %v2435_v42  ;;  %v2459_v38 = vrot.slane %v11099_v60, %v10875_v50  ;;  %v2447_v56 = vrot.slane %v11101_v35, %v10875_v50  ;;  %v6131_v12 = vld [vmem:[%s13542_s7 + $0x74] sm:$0xf] }
 0x131   : > { %v11244_v31 = vsel %vm1409_vm0, %v1472_v15, %v1476_v51  ;;  %v2832_v60 = vshll.u32 %v11213_v24, 16  ;;  %v2836_v58 = vshrl.u32 %v11262_v23, 16  ;;  %v2483_v35 = vrot.slane %v11117_v22, %v10875_v50 }
 0x132   : > { %v11161_v10 = vpop.permute.xlu1 %2522  ;;  %v11163_v62 = vpop.permute.xlu0 %2510  ;;  %v11285_v15 = vsel %vm1409_vm0, %v1488_v17, %v1492_v14  ;;  %v1496_v54 = vor.u32 %v1494_v45, %v1492_v14  ;;  %v2471_v13 = vrot.slane %v11119_v47, %v10875_v50  ;;  %v2844_v22 = vshrl.u32 %v11275_v29, 16  ;;  %v2355_v47 = vld [vmem:[%s13543_s8 + $0x5c] sm:$0xf] }
 0x133   : > { %6400 = vperm.xlu1 %10112, %v6124_v34   ;;  %6388 = vperm.xlu0 %10111, %v6123_v18   ;;  %v1480_v34 = vor.u32 %v1478_v52, %v1476_v51  ;;  %v11235_v18 = vcombine.low %v1268_v5, %v1280_v21  ;;  %v1510_v51 = vshrl.u32 %v11188_v40, 16  ;;  %v1522_v21 = vshll.u32 %v11237_v6, 16  ;;  %v6132_v40 = vld [vmem:[%s13542_s7 + $0x78] sm:$0xf]  ;;  %v6133_v17 = vld [vmem:[%s13542_s7 + $0x7c] sm:$0xf] }
 0x134   : > { %v11271_v5 = vcombine.low %v1316_v41, %v1328_v7  ;;  %v1526_v41 = vshrl.u32 %v11237_v6, 16  ;;  %v2834_v32 = vor.u32 %v2832_v60, %v11273_v49  ;;  %v11305_v42 = vcombine.low %v2447_v56, %v2459_v38  ;;  %v2357_v56 = vld [vmem:[%s13543_s8 + $0x64] sm:$0xf] }
 0x135   : > { %v1514_v52 = vshll.u32 %v11235_v18, 16  ;;  %v1518_v0 = vshrl.u32 %v11235_v18, 16  ;;  %v1524_v7 = vrot.slane %v1522_v21, 1  ;;  %v2507_v18 = vrot.slane %v11135_v48, %v10875_v50 }
 0x136   : > { %v11197_v43 = vpop.permute.xlu1 %2546  ;;  %v11199_v44 = vpop.permute.xlu0 %2534  ;;  %v1530_v24 = vshll.u32 %v11271_v5, 16  ;;  %v2495_v6 = vrot.slane %v11137_v55, %v10875_v50  ;;  %v2531_v11 = vrot.slane %v11161_v10, %v10875_v50  ;;  %v11322_v14 = vsel %vm1409_vm0, %v1496_v54, %v1500_v20 }
 0x137   : > { %6424 = vperm.xlu1 %10112, %v6126_v1   ;;  %6412 = vperm.xlu0 %10111, %v6125_v27   ;;  %v11258_v1 = vsel %vm1409_vm0, %v1480_v34, %v1484_v9  ;;  %v1512_v9 = vor.u32 %v1510_v51, %v1508_v46  ;;  %v1516_v61 = vrot.slane %v1514_v52, 1  ;;  %v2838_v48 = vrot.slane %v2836_v58, 7 }
 0x138   : > { %v11327_v45 = vcombine.low %v2471_v13, %v2483_v35  ;;  %v1528_v51 = vor.u32 %v1526_v41, %v1524_v7  ;;  %v1534_v52 = vshrl.u32 %v11271_v5, 16  ;;  %v11341_v21 = vrot.slane %v2844_v22, 7 }
 0x139   : > { %v11334_v10 = vsel %vm1409_vm0, %v1512_v9, %v1516_v61  ;;  %v2852_v38 = vshrl.u32 %v11305_v42, 16  ;;  %v2847_v54 = vshll.u32 %v11275_v29, 16  ;;  %v2543_v60 = vrot.slane %v11199_v44, %v10875_v50 }
 0x13a   : > { %v11231_v2 = vpop.permute.xlu1 %2570  ;;  %v11233_v59 = vpop.permute.xlu0 %2558  ;;  %v2860_v9 = vshrl.u32 %v11327_v45, 16  ;;  %v2855_v22 = vshll.u32 %v11305_v42, 16 }
 0x13b   : > { %6448 = vperm.xlu1 %10112, %v6128_v8   ;;  %6436 = vperm.xlu0 %10111, %v6127_v57   ;;  %v1504_v8 = vor.u32 %v1502_v16, %v1500_v20  ;;  %v11338_v20 = vmul.bf16 %v10920_v26, %v2834_v32  ;;  %v2356_v26 = vld [vmem:[%s13543_s8 + $0x60] sm:$0xf]  ;;  %v2579_v35 = vrot.slane %v11231_v2, %v10875_v50  ;;  %v11376_v41 = vrot.slane %v2852_v38, 7  ;;  %v2359_v2 = vld [vmem:[%s13543_s8 + $0x6c] sm:$0xf] }
 0x13c   : > { %v2567_v13 = vrot.slane %v11233_v59, %v10875_v50  ;;  %v2849_v44 = vor.u32 %v2847_v54, %v11341_v21  ;;  %v2358_v32 = vld [vmem:[%s13543_s8 + $0x68] sm:$0xf]  ;;  %v2863_v38 = vshll.u32 %v11327_v45, 16 }
 0x13d   : > { %v3009_v59 = vshll.u32 %v11338_v20, 16  ;;  %v3007_v45 = vshrl.u32 %v11338_v20, 16 }
 0x13e   : > { %v11264_v27 = vpop.permute.xlu1 %2594  ;;  %v11266_v28 = vpop.permute.xlu0 %2582  ;;  %v11410_v42 = vcombine.low %v2567_v13, %v2579_v35 }
 0x13f   : > { %6472 = vperm.xlu1 %10112, %v6130_v19   ;;  %6460 = vperm.xlu0 %10111, %v6129_v30   ;;  %v2519_v19 = vrot.slane %v11163_v62, %v10875_v50  ;;  %v11325_v30 = vsel %vm1409_vm0, %v1504_v8, %v1508_v46  ;;  %v1520_v62 = vor.u32 %v1518_v0, %v1516_v61  ;;  %v2839_v46 = vshll.u32 %v11262_v23, 16 }
 0x140   : > { %v11348_v8 = vcombine.low %v2495_v6, %v2507_v18  ;;  %v2603_v61 = vrot.slane %v11264_v27, %v10875_v50  ;;  %v2591_v0 = vrot.slane %v11266_v28, %v10875_v50  ;;  %v3011_v54 = vrot.slane %v3009_v59, 1 }
 0x141   : > { %v11350_v5 = vcombine.low %v2519_v19, %v2531_v11  ;;  %v2841_v23 = vor.u32 %v2839_v46, %v2838_v48  ;;  %v11427_v46 = vor.u32 %v2855_v22, %v11376_v41  ;;  %v2892_v59 = vshrl.u32 %v11410_v42, 16 }
 0x142   : > { %v11296_v57 = vpop.permute.xlu1 %2618  ;;  %v11298_v34 = vpop.permute.xlu0 %2606  ;;  %v2868_v28 = vshrl.u32 %v11348_v8, 16 }
 0x143   : > { %6496 = vperm.xlu1 %10112, %v6132_v40   ;;  %6484 = vperm.xlu0 %10111, %v6131_v12   ;;  %v1532_v40 = vrot.slane %v1530_v24, 1  ;;  %v2555_v12 = vrot.slane %v11197_v43, %v10875_v50  ;;  %v11373_v43 = vsel %vm1409_vm0, %v1520_v62, %v1524_v7  ;;  %v2876_v7 = vshrl.u32 %v11350_v5, 16 }
 0x144   : > { %v2627_v18 = vrot.slane %v11296_v57, %v10875_v50  ;;  %v2615_v6 = vrot.slane %v11298_v34, %v10875_v50  ;;  %v11408_v62 = vrot.slane %v2860_v9, 7  ;;  %v11417_v57 = vld [vmem:[%s13540_s5] ss:$0 sm:$0xff]  ;;  %v11421_v34 = vsel %vm1587_vm1, %v11273_v49, %v2841_v23  ;;  %v2360_v23 = vld [vmem:[%s13543_s8 + $0x70] sm:$0xf] }
 0x145   : > { %v11383_v27 = vsel %vm1409_vm0, %v1528_v51, %v1532_v40  ;;  %v11385_v24 = vor.u32 %v1534_v52, %v1532_v40  ;;  %v11412_v51 = vcombine.low %v2591_v0, %v2603_v61  ;;  %13601 = vst [vmem:[#allocation16_spill] sm:$0xff] %v11421_v34  ;;  %v11424_v52 = vsel %vm1587_vm1, %v2838_v48, %v2849_v44  ;;  %v2361_v40 = vld [vmem:[%s13543_s8 + $0x74] sm:$0xf]  ;;  %v3477_v34 = vld [vmem:[%s13542_s7 + $0x4] sm:$0xf] }
 0x146   : > { %v11329_v55 = vpop.permute.xlu1 %4992  ;;  %v11331_v16 = vpop.permute.xlu0 %2630  ;;  %13602 = vst [vmem:[#allocation17_spill] sm:$0xff] %v11424_v52  ;;  %v11435_v9 = vrot.slane %v2876_v7, 7  ;;  %v11444_v35 = vcombine.low %v2615_v6, %v2627_v18  ;;  %v11452_v44 = vor.u32 %v2863_v38, %v11408_v62  ;;  %v2363_v18 = vld [vmem:[%s13543_s8 + $0x7c] sm:$0xf] }
 0x147   : > { %13599 = vst [vmem:[#allocation14_spill] sm:$0xff] %v11331_v16  ;;  %2642 = vperm.xlu1 %10112, %v2355_v47   ;;  %6508 = vperm.xlu0 %10111, %v6133_v17   ;;  %13600 = vst [vmem:[#allocation15_spill] sm:$0xff] %v11385_v24  ;;  %v11393_v47 = vcombine.low %v2543_v60, %v2555_v12  ;;  %v11406_v17 = vld [vmem:[%s13539_s4] ss:$0 sm:$0xff]  ;;  %v2871_v12 = vshll.u32 %v11348_v8, 16  ;;  %v2900_v20 = vshrl.u32 %v11412_v51, 16 }
 0x149   : > { %v2884_v60 = vshrl.u32 %v11393_v47, 16 }
 0x14a   : > { %v11360_v58 = vpop.permute.xlu1 %5016  ;;  %v11362_v29 = vpop.permute.xlu0 %5004 }
 0x14b   : > { %2666 = vperm.xlu1 %10112, %v2357_v56   ;;  %2654 = vperm.xlu0 %10111, %v2356_v26   ;;  %v11433_v26 = vrot.slane %v2868_v28, 7  ;;  %v5013_v28 = vrot.slane %v11362_v29, %v10875_v50 }
 0x14d   : > { %v11467_v6 = vor.u32 %v2871_v12, %v11433_v26 }
 0x14e   : > { %v11399_v11 = vpop.permute.xlu1 %5040  ;;  %v11401_v19 = vpop.permute.xlu0 %5028 }
 0x14f   : > { %2690 = vperm.xlu1 %10112, %v2359_v2   ;;  %2678 = vperm.xlu0 %10111, %v2358_v32   ;;  %v9264_v56 = vpop.f32.mrb[0].mxu0  ;;  %v2879_v2 = vshll.u32 %v11350_v5, 16  ;;  %v11464_v5 = vor.u32 %v3011_v54, %v3007_v45  ;;  %v5001_v54 = vrot.slane %v11329_v55, %v10875_v50 }
 0x150   : > { %v759_v49 = vmul.f32 %v9264_v56, %v11406_v17  ;;  %v623_v48 = vpop.f32.mrb[1].mxu0 }
 0x151   : > { %v757_v13 = vmul.f32 %v11406_v17, %v623_v48  ;;  %v9265_v8 = vpop.f32.mrb[2].mxu0  ;;  %13603 = vst [vmem:[#allocation18_spill] sm:$0xff] %v11464_v5  ;;  %v11470_v38 = vor.u32 %v2879_v2, %v11435_v9  ;;  %v2908_v48 = vshrl.u32 %v11444_v35, 16  ;;  %v11488_v2 = vrot.slane %v2892_v59, 7 }
 0x152   : > { %v11447_v61 = vpop.permute.xlu1 %5064  ;;  %v11449_v0 = vpop.permute.xlu0 %5052  ;;  %v798_v7 = vadd.f32 %v11417_v57, %v759_v49  ;;  %v760_v32 = vmul.f32 %v9265_v8, %v11406_v17  ;;  %v11477_v49 = vrot.slane %v2884_v60, 7  ;;  %v11490_v8 = vrot.slane %v2900_v20, 7 }
 0x153   : > { %2714 = vperm.xlu1 %10112, %v2361_v40   ;;  %2702 = vperm.xlu0 %10111, %v2360_v23   ;;  %v626_v22 = vpop.f32.mrb[3].mxu0  ;;  %v796_v29 = vadd.f32 %v11417_v57, %v757_v13  ;;  %v2362_v40 = vld [vmem:[%s13543_s8 + $0x78] sm:$0xf]  ;;  %v2887_v13 = vshll.u32 %v11393_v47, 16  ;;  %13605 = vst [vmem:[#allocation20_spill] sm:$0xff] %v11488_v2  ;;  %v11494_v5 = vcombine.low %v5001_v54, %v5013_v28  ;;  %v2903_v47 = vshll.u32 %v11412_v51, 16 }
 0x154   : > { %v758_v56 = vmul.f32 %v11406_v17, %v626_v22  ;;  %13604 = vst [vmem:[#allocation19_spill] sm:$0xff] %v11477_v49  ;;  %v799_v23 = vadd.f32 %v11417_v57, %v760_v32  ;;  %13606 = vst [vmem:[#allocation21_spill] sm:$0xff] %v11490_v8  ;;  %v2895_v22 = vshll.u32 %v11410_v42, 16  ;;  %v830_v55 = vmax.f32 %v798_v7, 0.0  ;;  %v3476_v42 = vld [vmem:[%s13542_s7] sm:$0xf] }
 0x155   : > { %v828_v59 = vmax.f32 %v796_v29, 0.0  ;;  %v11505_v28 = vor.u32 %v2887_v13, %v11477_v49  ;;  %v11507_v7 = vrot.slane %v2908_v48, 7  ;;  %v2911_v48 = vshll.u32 %v11444_v35, 16 }
 0x156   : > { %v11483_v45 = vpop.permute.xlu1 %5088  ;;  %v11485_v12 = vpop.permute.xlu0 %5076  ;;  %v797_v60 = vadd.f32 %v11417_v57, %v758_v56  ;;  %v831_v52 = vmax.f32 %v799_v23, 0.0  ;;  %v11517_v29 = vor.u32 %v2895_v22, %v11488_v2  ;;  %v11520_v23 = vor.u32 %v2903_v47, %v11490_v8 }
 0x157   : > { %2738 = vperm.xlu1 %10112, %v2363_v18   ;;  %2726 = vperm.xlu0 %10111, %v2362_v40   ;;  %v9268_v32 = vpop.f32.mrb[4].mxu0  ;;  %13607 = vst [vmem:[#allocation22_spill] sm:$0xff] %v11507_v7 }
 0x158   : > { %v829_v20 = vmax.f32 %v797_v60, 0.0  ;;  %v763_v24 = vmul.f32 %v9268_v32, %v11406_v17  ;;  %v639_v56 = vpop.f32.mrb[5].mxu0  ;;  %v11509_v18 = vpack.c.bf16 %v831_v52, %v830_v55  ;;  %13608 = vst [vmem:[#allocation23_spill] sm:$0xff] %v11517_v29  ;;  %13609 = vst [vmem:[#allocation24_spill] sm:$0xff] %v11520_v23  ;;  %v11525_v52 = vsel %vm1587_vm1, %v11341_v21, %v11427_v46 }
 0x159   : > { %v761_v40 = vmul.f32 %v11406_v17, %v639_v56  ;;  %v9269_v32 = vpop.f32.mrb[6].mxu0  ;;  %13610 = vst [vmem:[#allocation25_spill] sm:$0xff] %v11525_v52  ;;  %v5455_v55 = vshrl.u32 %v11494_v5, 16  ;;  %v11548_v56 = vor.u32 %v2911_v48, %v11507_v7  ;;  %v5097_v29 = vrot.slane %v11483_v45, %v10875_v50 }
 0x15a   : > { %v11512_v54 = vpop.permute.xlu1 %5112  ;;  %v11514_v51 = vpop.permute.xlu0 %5100  ;;  %v864_v60 = vpack.c.bf16 %v829_v20, %v828_v59  ;;  %881 = vst [vmem:[#allocation2 + $0x18] sm:$0xff] %v11509_v18  ;;  %v802_v22 = vadd.f32 %v11417_v57, %v763_v24  ;;  %v764_v46 = vmul.f32 %v9269_v32, %v11406_v17  ;;  %v3478_v59 = vld [vmem:[%s13542_s7 + $0x8] sm:$0xf]  ;;  %v11545_v24 = vsel %vm1587_vm1, %v11376_v41, %v11452_v44 }
 0x15b   : > { %3522 = vperm.xlu1 %10112, %v3477_v34   ;;  %3510 = vperm.xlu0 %10111, %v3476_v42   ;;  %v642_v47 = vpop.f32.mrb[7].mxu0  ;;  %v3479_v34 = vld [vmem:[%s13542_s7 + $0xc] sm:$0xf]  ;;  %v800_v21 = vadd.f32 %v11417_v57, %v761_v40  ;;  %13611 = vst [vmem:[#allocation26_spill] sm:$0xff] %v11545_v24  ;;  %13612 = vst [vmem:[#allocation27_spill] sm:$0xff] %v11548_v56  ;;  %v5025_v42 = vrot.slane %v11360_v58, %v10875_v50  ;;  %v11572_v7 = vrot.slane %v5455_v55, 7 }
 0x15c   : > { %880 = vst [vmem:[#allocation2 + $0x10] sm:$0xff] %v864_v60  ;;  %v762_v35 = vmul.f32 %v11406_v17, %v642_v47  ;;  %9502 = vmatprep.mubr.bf16.mxu1 %v864_v60  ;;  %v10138_v20 = vld [vmem:[#allocation6 + $0x148] sm:$0xff]   ;;  %v5037_v40 = vrot.slane %v11401_v19, %v10875_v50  ;;  %v1556_v13 = vmul.bf16 %v11167_v63, %v864_v60  ;;  %v3481_v58 = vld [vmem:[%s13542_s7 + $0x14] sm:$0xf] }
 0x15d   : > { %9503 = vmatmul.mubr.bf16.vlgmr.msra.gmra.mrb[0].mxu1 %v11509_v18  ;;  %v5061_v41 = vrot.slane %v11449_v0, %v10875_v50  ;;  %v803_v44 = vadd.f32 %v11417_v57, %v764_v46  ;;  %v11570_v19 = vsel %vm1587_vm1, %v11408_v62, %v11467_v6  ;;  %v5049_v63 = vrot.slane %v11399_v11, %v10875_v50  ;;  %v10139_v55 = vld [vmem:[#allocation6 + $0x150] sm:$0xff]  }
 0x15e   : > { %v11554_v32 = vpop.permute.xlu1 %5136  ;;  %v11556_v47 = vpop.permute.xlu0 %5124  ;;  %v801_v48 = vadd.f32 %v11417_v57, %v762_v35  ;;  %13613 = vst [vmem:[#allocation28_spill] sm:$0xff] %v11570_v19  ;;  %v834_v0 = vmax.f32 %v802_v22, 0.0  ;;  %9535 = vmatpush3.bf16.msra.mxu1 %v10929_v33  ;;  %v1601_v46 = vshrl.u32 %v1556_v13, 16  ;;  %v832_v35 = vmax.f32 %v800_v21, 0.0 }
 0x15f   : > { %3546 = vperm.xlu1 %10112, %v3479_v34   ;;  %3534 = vperm.xlu0 %10111, %v3478_v59   ;;  %v9272_v60 = vpop.f32.mrb[8].mxu0  ;;  %v3480_v34 = vld [vmem:[%s13542_s7 + $0x10] sm:$0xf]  ;;  %v835_v8 = vmax.f32 %v803_v44, 0.0  ;;  %v5458_v11 = vshll.u32 %v11494_v5, 16  ;;  %v11582_v22 = vcombine.low %v5025_v42, %v5037_v40  ;;  %v11591_v21 = vcombine.low %v5049_v63, %v5061_v41 }
 0x160   : > { %v833_v56 = vmax.f32 %v801_v48, 0.0  ;;  %v767_v62 = vmul.f32 %v9272_v60, %v11406_v17  ;;  %v655_v6 = vpop.f32.mrb[9].mxu0  ;;  %9536 = vmatprep.subr.bf16.mxu1 %v10138_v20  ;;  %v11589_v33 = vrot.slane %v1601_v46, 7  ;;  %v11600_v5 = vsel %vm1587_vm1, %v11433_v26, %v11470_v38  ;;  %v3482_v63 = vld [vmem:[%s13542_s7 + $0x18] sm:$0xf] }
 0x161   : > { %v765_v59 = vmul.f32 %v11406_v17, %v655_v6  ;;  %v11593_v44 = vpack.c.bf16 %v835_v8, %v834_v0  ;;  %v9273_v60 = vpop.f32.mrb[10].mxu0  ;;  %13614 = vst [vmem:[#allocation29_spill] sm:$0xff] %v11600_v5  ;;  %v11603_v42 = vor.u32 %v5458_v11, %v11572_v7  ;;  %v5085_v40 = vrot.slane %v11485_v12, %v10875_v50  ;;  %v10140_v0 = vld [vmem:[#allocation6 + $0x158] sm:$0xff]  }
 0x162   : > { %v11585_v2 = vpop.permute.xlu1 %5160  ;;  %v11587_v23 = vpop.permute.xlu0 %5148  ;;  %v11595_v48 = vpack.c.bf16 %v833_v56, %v832_v35  ;;  %v806_v41 = vadd.f32 %v11417_v57, %v767_v62  ;;  %v3483_v56 = vld [vmem:[%s13542_s7 + $0x1c] sm:$0xf]  ;;  %9537 = vmatpush3.bf16.msra.mxu1 %v10138_v20  ;;  %v768_v38 = vmul.f32 %v9273_v60, %v11406_v17  ;;  %v5073_v20 = vrot.slane %v11447_v61, %v10875_v50  ;;  %v11637_v61 = vld [vmem:[#allocation6 + $0x48] sm:$0xff]  }
 0x163   : > { %3570 = vperm.xlu1 %10112, %v3481_v58   ;;  %3558 = vperm.xlu0 %10111, %v3480_v34   ;;  %v658_v8 = vpop.f32.mrb[11].mxu0  ;;  %v1604_v58 = vshll.u32 %v1556_v13, 16  ;;  %883 = vst [vmem:[#allocation2 + $0x28] sm:$0xff] %v11593_v44  ;;  %v804_v26 = vadd.f32 %v11417_v57, %v765_v59  ;;  %v5462_v13 = vshrl.u32 %v11582_v22, 16  ;;  %v11629_v35 = vmul.bf16 %v11170_v3, %v11509_v18  ;;  %v7585_v18 = vld [vmem:[%s13543_s8 + $0x4] sm:$0xf] }
 0x164   : > { %882 = vst [vmem:[#allocation2 + $0x20] sm:$0xff] %v11595_v48  ;;  %v766_v12 = vmul.f32 %v11406_v17, %v658_v8  ;;  %9506 = vmatprep.mubr.bf16.mxu1 %v11595_v48  ;;  %9538 = vmatprep.subr.bf16.mxu1 %v10139_v55  ;;  %v5465_v62 = vshll.u32 %v11582_v22, 16  ;;  %v5470_v6 = vshrl.u32 %v11591_v21, 16  ;;  %v807_v11 = vadd.f32 %v11417_v57, %v768_v38  ;;  %v7584_v22 = vld [vmem:[%s13543_s8] sm:$0xf] }
 0x165   : > { %v1606_v46 = vor.u32 %v1604_v58, %v11589_v33  ;;  %9507 = vmatmul.mubr.bf16.gmra.mrb[4].mxu1 %v11593_v44  ;;  %v11639_v8 = vcombine.low %v5073_v20, %v5085_v40  ;;  %v5109_v58 = vrot.slane %v11514_v51, %v10875_v50  ;;  %v1609_v38 = vshrl.u32 %v11629_v35, 16 }
 0x166   : > { %v11623_v34 = vpop.permute.xlu1 %5184  ;;  %v805_v59 = vadd.f32 %v11417_v57, %v766_v12  ;;  %v11635_v60 = vpop.permute.xlu0 %5172  ;;  %9539 = vmatpush3.bf16.msra.mxu1 %v10139_v55  ;;  %v838_v40 = vmax.f32 %v806_v41, 0.0  ;;  %v836_v12 = vmax.f32 %v804_v26, 0.0  ;;  %v839_v20 = vmax.f32 %v807_v11, 0.0  ;;  %v10141_v55 = vld [vmem:[#allocation6 + $0x160] sm:$0xff]  }
 0x167   : > { %3594 = vperm.xlu1 %10112, %v3483_v56   ;;  %3582 = vperm.xlu0 %10111, %v3482_v63   ;;  %v9276_v3 = vpop.f32.mrb[12].mxu0  ;;  %v1607_v56 = vsel %vm1587_vm1, %v10935_v37, %v1606_v46  ;;  %v11652_v49 = vrot.slane %v5462_v13, 7  ;;  %v11661_v41 = vrot.slane %v5470_v6, 7  ;;  %v5133_v26 = vrot.slane %v11556_v47, %v10875_v50  ;;  %v7587_v47 = vld [vmem:[%s13543_s8 + $0xc] sm:$0xf] }
 0x168   : > { %v837_v51 = vmax.f32 %v805_v59, 0.0  ;;  %v671_v63 = vpop.f32.mrb[13].mxu0  ;;  %9311 = vmatmul.mubr.bf16.vlgmr.msra.gmra.mrb[32].mxu0 %v1607_v56  ;;  %9540 = vmatprep.subr.bf16.mxu1 %v10140_v0  ;;  %v771_v5 = vmul.f32 %v9276_v3, %v11406_v17  ;;  %v11665_v13 = vpack.c.bf16 %v839_v20, %v838_v40  ;;  %v5478_v3 = vshrl.u32 %v11639_v8, 16 }
 0x169   : > { %v769_v19 = vmul.f32 %v11406_v17, %v671_v63  ;;  %v9277_v46 = vpop.f32.mrb[14].mxu0  ;;  %9343 = vmatpush3.bf16.msra.mxu0 %v11060_v36  ;;  %13615 = vst [vmem:[#allocation30_spill] sm:$0xff] %v11661_v41  ;;  %v5121_v36 = vrot.slane %v11512_v54, %v10875_v50  ;;  %v11675_v6 = vcombine.low %v5097_v29, %v5109_v58  ;;  %v11677_v56 = vrot.slane %v1609_v38, 7  ;;  %v7586_v58 = vld [vmem:[%s13543_s8 + $0x8] sm:$0xf] }
 0x16a   : > { %v11658_v37 = vpop.permute.xlu1 %5208  ;;  %v11667_v11 = vpack.c.bf16 %v837_v51, %v836_v12  ;;  %v11669_v45 = vpop.permute.xlu0 %5196  ;;  %9344 = vmatprep.subr.bf16.mxu0 %v11637_v61  ;;  %9541 = vmatpush3.bf16.msra.mxu1 %v10140_v0  ;;  %885 = vst [vmem:[#allocation2 + $0x38] sm:$0xff] %v11665_v13  ;;  %v772_v54 = vmul.f32 %v9277_v46, %v11406_v17  ;;  %v5481_v20 = vshll.u32 %v11639_v8, 16 }
 0x16b   : > { %7630 = vperm.xlu1 %10112, %v7585_v18   ;;  %v674_v59 = vpop.f32.mrb[15].mxu0  ;;  %7618 = vperm.xlu0 %10111, %v7584_v22   ;;  %v810_v18 = vadd.f32 %v11417_v57, %v771_v5  ;;  %v808_v40 = vadd.f32 %v11417_v57, %v769_v19  ;;  %v5467_v0 = vor.u32 %v5465_v62, %v11652_v49  ;;  %v5473_v22 = vshll.u32 %v11591_v21, 16  ;;  %v11698_v19 = vld [vmem:[#allocation6 + $0x168] sm:$0xff]  }
 0x16c   : > { %884 = vst [vmem:[#allocation2 + $0x30] sm:$0xff] %v11667_v11  ;;  %v770_v29 = vmul.f32 %v11406_v17, %v674_v59  ;;  %9510 = vmatprep.mubr.bf16.mxu1 %v11667_v11  ;;  %v1612_v5 = vshll.u32 %v11629_v35, 16  ;;  %9542 = vmatprep.subr.bf16.mxu1 %v10141_v55  ;;  %v11703_v12 = vsel %vm1587_vm1, %v11435_v9, %v11505_v28  ;;  %v3485_v35 = vld [vmem:[%s13542_s7 + $0x24] sm:$0xf]  ;;  %v11716_v59 = vrot.slane %v5478_v3, 7 }
 0x16d   : > { %9511 = vmatmul.mubr.bf16.gmra.mrb[8].mxu1 %v11665_v13  ;;  %13616 = vst [vmem:[#allocation31_spill] sm:$0xff] %v11703_v12  ;;  %v11706_v51 = vcombine.low %v5121_v36, %v5133_v26  ;;  %v811_v21 = vadd.f32 %v11417_v57, %v772_v54  ;;  %v5475_v46 = vor.u32 %v5473_v22, %v11661_v41  ;;  %v5486_v9 = vshrl.u32 %v11675_v6, 16  ;;  %v3484_v26 = vld [vmem:[%s13542_s7 + $0x20] sm:$0xf]  ;;  %v10146_v36 = vld [vmem:[#allocation6 + $0x50] sm:$0xff]  }
 0x16e   : > { %v11694_v38 = vpop.permute.xlu1 %5232  ;;  %v809_v62 = vadd.f32 %v11417_v57, %v770_v29  ;;  %v11710_v63 = vpop.permute.xlu0 %5220  ;;  %13617 = vst [vmem:[#allocation32_spill] sm:$0xff] %v11716_v59  ;;  %v1614_v28 = vor.u32 %v1612_v5, %v11677_v56  ;;  %v840_v54 = vmax.f32 %v808_v40, 0.0  ;;  %9543 = vmatpush3.bf16.msra.mxu1 %v10141_v55  ;;  %9345 = vmatpush3.bf16.msra.mxu0 %v11637_v61  ;;  %v7594_v41 = vld [vmem:[%s13543_s8 + $0x28] sm:$0xf] }
 0x16f   : > { %7654 = vperm.xlu1 %10112, %v7587_v47   ;;  %7642 = vperm.xlu0 %10111, %v7586_v58   ;;  %v9280_v8 = vpop.f32.mrb[16].mxu0  ;;  %v842_v47 = vmax.f32 %v810_v18, 0.0  ;;  %v843_v29 = vmax.f32 %v811_v21, 0.0  ;;  %v1558_v18 = vmul.bf16 %v11173_v4, %v11595_v48  ;;  %v5494_v40 = vshrl.u32 %v11706_v51, 16 }
 0x170   : > { %v841_v12 = vmax.f32 %v809_v62, 0.0  ;;  %v687_v24 = vpop.f32.mrb[17].mxu0  ;;  %v1615_v3 = vsel %vm1587_vm1, %v11589_v33, %v1614_v28  ;;  %v775_v22 = vmul.f32 %v9280_v8, %v11406_v17  ;;  %9544 = vmatprep.subr.bf16.mxu1 %v11698_v19  ;;  %v11746_v4 = vsel %vm1587_vm1, %v11652_v49, %v5475_v46  ;;  %v7589_v62 = vld [vmem:[%s13543_s8 + $0x14] sm:$0xf]  ;;  %9346 = vmatprep.subr.bf16.mxu0 %v10146_v36  ;;  %v10147_v46 = vld [vmem:[#allocation6 + $0x58] sm:$0xff]  }
 0x171   : > { %v773_v58 = vmul.f32 %v11406_v17, %v687_v24  ;;  %v9281_v52 = vpop.f32.mrb[18].mxu0  ;;  %v11734_v55 = vpack.c.bf16 %v843_v29, %v842_v47  ;;  %9314 = vmatprep.mubr.bf16.mxu0 %v1615_v3  ;;  %v11742_v24 = vsel %vm1587_vm1, %v11572_v7, %v5467_v0  ;;  %v11749_v48 = vor.u32 %v5481_v20, %v11716_v59 }
 0x172   : > { %v11728_v5 = vpop.permute.xlu1 %5256  ;;  %v11736_v61 = vpack.c.bf16 %v841_v12, %v840_v54  ;;  %v11738_v33 = vpop.permute.xlu0 %5244  ;;  %v5157_v12 = vrot.slane %v11587_v23, %v10875_v50  ;;  %v814_v49 = vadd.f32 %v11417_v57, %v775_v22  ;;  %v776_v0 = vmul.f32 %v9281_v52, %v11406_v17  ;;  %v7588_v23 = vld [vmem:[%s13543_s8 + $0x10] sm:$0xf]  ;;  %9347 = vmatpush3.bf16.msra.mxu0 %v10146_v36 }
 0x173   : > { %3618 = vperm.xlu1 %10112, %v3485_v35   ;;  %v690_v21 = vpop.f32.mrb[19].mxu0  ;;  %13618 = vst [vmem:[#allocation33_spill] sm:$0xff] %v11749_v48  ;;  %3606 = vperm.xlu0 %10111, %v3484_v26   ;;  %v10145_v35 = vld [vmem:[#allocation6 + $0x170] sm:$0xff]   ;;  %887 = vst [vmem:[#allocation2 + $0x48] sm:$0xff] %v11734_v55  ;;  %v812_v7 = vadd.f32 %v11417_v57, %v773_v58  ;;  %v11766_v28 = vrot.slane %v5486_v9, 7  ;;  %v5489_v8 = vshll.u32 %v11675_v6, 16 }
 0x174   : > { %886 = vst [vmem:[#allocation2 + $0x40] sm:$0xff] %v11736_v61  ;;  %v774_v20 = vmul.f32 %v11406_v17, %v690_v21  ;;  %9514 = vmatprep.mubr.bf16.mxu1 %v11736_v61  ;;  %v5145_v26 = vrot.slane %v11554_v32, %v10875_v50  ;;  %v1617_v47 = vshrl.u32 %v1558_v18, 16  ;;  %v11774_v52 = vrot.slane %v5494_v40, 7  ;;  %v3487_v32 = vld [vmem:[%s13542_s7 + $0x2c] sm:$0xf]  ;;  %9545 = vmatpush3.bf16.msra.mxu1 %v11698_v19 }
 0x175   : > { %13619 = vst [vmem:[#allocation34_spill] sm:$0xff] %v11766_v28  ;;  %9515 = vmatmul.mubr.bf16.gmra.mrb[12].mxu1 %v11734_v55  ;;  %v5169_v29 = vrot.slane %v11585_v2, %v10875_v50  ;;  %v815_v3 = vadd.f32 %v11417_v57, %v776_v0  ;;  %v5181_v36 = vrot.slane %v11635_v60, %v10875_v50  ;;  %v1620_v2 = vshll.u32 %v1558_v18, 16  ;;  %v3486_v21 = vld [vmem:[%s13542_s7 + $0x28] sm:$0xf] }
 0x176   : > { %v11771_v54 = vpop.permute.xlu1 %5280  ;;  %13620 = vst [vmem:[#allocation35_spill] sm:$0xff] %v11774_v52  ;;  %v813_v9 = vadd.f32 %v11417_v57, %v774_v20  ;;  %v11780_v22 = vpop.permute.xlu0 %5268  ;;  %v11786_v6 = vcombine.low %v5145_v26, %v5157_v12  ;;  %v11790_v58 = vrot.slane %v1617_v47, 7  ;;  %9546 = vmatprep.subr.bf16.mxu1 %v10145_v35  ;;  %v846_v0 = vmax.f32 %v814_v49, 0.0  ;;  %9348 = vmatprep.subr.bf16.mxu0 %v10147_v46  ;;  %v10149_v49 = vld [vmem:[#allocation6 + $0x60] sm:$0xff]  }
 0x177   : > { %7678 = vperm.xlu1 %10112, %v7589_v62   ;;  %7666 = vperm.xlu0 %10111, %v7588_v23   ;;  %v9284_v40 = vpop.f32.mrb[20].mxu0  ;;  %v10148_v62 = vld [vmem:[#allocation6 + $0x178] sm:$0xff]   ;;  %v844_v20 = vmax.f32 %v812_v7, 0.0  ;;  %v847_v16 = vmax.f32 %v815_v3, 0.0  ;;  %v11796_v26 = vor.u32 %v5489_v8, %v11766_v28  ;;  %v1559_v18 = vmul.bf16 %v11194_v39, %v11593_v44 }
 0x178   : > { %v845_v19 = vmax.f32 %v813_v9, 0.0  ;;  %v703_v12 = vpop.f32.mrb[21].mxu0  ;;  %v1622_v60 = vor.u32 %v1620_v2, %v11790_v58  ;;  %v779_v23 = vmul.f32 %v9284_v40, %v11406_v17  ;;  %9349 = vmatpush3.bf16.msra.mxu0 %v10147_v46  ;;  %v5497_v7 = vshll.u32 %v11706_v51, 16  ;;  %9547 = vmatpush3.bf16.msra.mxu1 %v10145_v35 }
 0x179   : > { %13621 = vst [vmem:[#allocation36_spill] sm:$0xff] %v11796_v26  ;;  %v9285_v59 = vpop.f32.mrb[22].mxu0  ;;  %v11805_v3 = vpack.c.bf16 %v847_v16, %v846_v0  ;;  %v777_v8 = vmul.f32 %v11406_v17, %v703_v12  ;;  %v5502_v39 = vshrl.u32 %v11786_v6, 16  ;;  %v5193_v44 = vrot.slane %v11623_v34, %v10875_v50  ;;  %v7591_v16 = vld [vmem:[%s13543_s8 + $0x1c] sm:$0xf]  ;;  %9548 = vmatprep.subr.bf16.mxu1 %v10148_v62  ;;  %v10150_v0 = vld [vmem:[#allocation6 + $0x68] sm:$0xff]  }
 0x17a   : > { %v11802_v47 = vpop.permute.xlu1 %5304  ;;  %v11807_v9 = vpack.c.bf16 %v845_v19, %v844_v20  ;;  %v11810_v28 = vpop.permute.xlu0 %5292  ;;  %v1623_v46 = vsel %vm1587_vm1, %v11677_v56, %v1622_v60  ;;  %v1625_v51 = vshrl.u32 %v1559_v18, 16  ;;  %v11821_v40 = vor.u32 %v5497_v7, %v11774_v52  ;;  %v7590_v34 = vld [vmem:[%s13543_s8 + $0x18] sm:$0xf]  ;;  %9350 = vmatprep.subr.bf16.mxu0 %v10149_v49  ;;  %v11841_v20 = vld [vmem:[#allocation6 + $0x180] sm:$0xff]  }
 0x17b   : > { %3642 = vperm.xlu1 %10112, %v3487_v32   ;;  %v706_v2 = vpop.f32.mrb[23].mxu0  ;;  %3630 = vperm.xlu0 %10111, %v3486_v21   ;;  %v11823_v32 = vcombine.low %v5169_v29, %v5181_v36  ;;  %v5205_v35 = vrot.slane %v11669_v45, %v10875_v50  ;;  %889 = vst [vmem:[#allocation2 + $0x58] sm:$0xff] %v11805_v3  ;;  %v1628_v29 = vshll.u32 %v1559_v18, 16  ;;  %13623 = vst [vmem:[#allocation38_spill] sm:$0xff] %v11841_v20 }
 0x17c   : > { %13622 = vst [vmem:[#allocation37_spill] sm:$0xff] %v11821_v40  ;;  %888 = vst [vmem:[#allocation2 + $0x50] sm:$0xff] %v11807_v9  ;;  %9315 = vmatmul.mubr.bf16.gmra.mrb[36].mxu0 %v1623_v46  ;;  %9518 = vmatprep.mubr.bf16.mxu1 %v11807_v9  ;;  %v5229_v56 = vrot.slane %v11710_v63, %v10875_v50  ;;  %v11835_v21 = vrot.slane %v1625_v51, 7  ;;  %v818_v36 = vadd.f32 %v11417_v57, %v779_v23 }
 0x17d   : > { %9519 = vmatmul.mubr.bf16.gmra.mrb[16].mxu1 %v11805_v3  ;;  %v5505_v19 = vshll.u32 %v11786_v6, 16  ;;  %v816_v12 = vadd.f32 %v11417_v57, %v777_v8  ;;  %v780_v60 = vmul.f32 %v9285_v59, %v11406_v17  ;;  %v778_v63 = vmul.f32 %v11406_v17, %v706_v2  ;;  %v3489_v59 = vld [vmem:[%s13542_s7 + $0x34] sm:$0xf]  ;;  %9351 = vmatpush3.bf16.msra.mxu0 %v10149_v49 }
 0x17e   : > { %v11838_v45 = vpop.permute.xlu1 %5328  ;;  %v11847_v7 = vpop.permute.xlu0 %5316  ;;  %9549 = vmatpush3.bf16.msra.mxu1 %v10148_v62  ;;  %v11849_v18 = vrot.slane %v5502_v39, 7  ;;  %v5217_v23 = vrot.slane %v11658_v37, %v10875_v50  ;;  %v1630_v46 = vor.u32 %v1628_v29, %v11835_v21  ;;  %v1560_v6 = vmul.bf16 %v11210_v53, %v11667_v11  ;;  %9352 = vmatprep.subr.bf16.mxu0 %v10150_v0 }
 0x17f   : > { %7702 = vperm.xlu1 %10112, %v7591_v16   ;;  %7690 = vperm.xlu0 %10111, %v7590_v34   ;;  %v9288_v8 = vpop.f32.mrb[24].mxu0  ;;  %v5510_v2 = vshrl.u32 %v11823_v32, 16  ;;  %v11860_v51 = vcombine.low %v5193_v44, %v5205_v35  ;;  %v819_v62 = vadd.f32 %v11417_v57, %v780_v60  ;;  %v817_v39 = vadd.f32 %v11417_v57, %v778_v63  ;;  %v3488_v16 = vld [vmem:[%s13542_s7 + $0x30] sm:$0xf] }
 0x180   : > { %13624 = vst [vmem:[#allocation39_spill] sm:$0xff] %v11849_v18  ;;  %v719_v37 = vpop.f32.mrb[25].mxu0  ;;  %v11867_v53 = vcombine.low %v5217_v23, %v5229_v56  ;;  %v5253_v11 = vrot.slane %v11738_v33, %v10875_v50  ;;  %v1631_v34 = vsel %vm1587_vm1, %v11790_v58, %v1630_v46  ;;  %v1633_v44 = vshrl.u32 %v1560_v6, 16  ;;  %9582 = vmatprep.subr.bf16.mxu1 %v11841_v20  ;;  %v10152_v60 = vld [vmem:[#allocation6 + $0x70] sm:$0xff]  }
 0x181   : > { %v9289_v29 = vpop.f32.mrb[26].mxu0  ;;  %9318 = vmatprep.mubr.bf16.mxu0 %v1631_v34  ;;  %v850_v63 = vmax.f32 %v818_v36, 0.0  ;;  %v848_v52 = vmax.f32 %v816_v12, 0.0  ;;  %v851_v49 = vmax.f32 %v819_v62, 0.0  ;;  %v849_v56 = vmax.f32 %v817_v39, 0.0  ;;  %9353 = vmatpush3.bf16.msra.mxu0 %v10150_v0 }
 0x182   : > { %v11873_v35 = vpop.permute.xlu1 %5352  ;;  %v11876_v23 = vpop.permute.xlu0 %5340  ;;  %v1635_v40 = vrot.slane %v1633_v44, 7  ;;  %v1636_v26 = vshll.u32 %v1560_v6, 16  ;;  %v1561_v58 = vmul.bf16 %v11225_v25, %v11665_v13  ;;  %v783_v46 = vmul.f32 %v9288_v8, %v11406_v17  ;;  %v7593_v34 = vld [vmem:[%s13543_s8 + $0x24] sm:$0xf]  ;;  %v7592_v25 = vld [vmem:[%s13543_s8 + $0x20] sm:$0xf]  ;;  %9354 = vmatprep.subr.bf16.mxu0 %v10152_v60 }
 0x183   : > { %3666 = vperm.xlu1 %10112, %v3489_v59   ;;  %v722_v33 = vpop.f32.mrb[27].mxu0  ;;  %3654 = vperm.xlu0 %10111, %v3488_v16   ;;  %v5241_v12 = vrot.slane %v11694_v38, %v10875_v50  ;;  %v11887_v62 = vpack.c.bf16 %v851_v49, %v850_v63  ;;  %v11889_v59 = vpack.c.bf16 %v849_v56, %v848_v52  ;;  %v5518_v6 = vshrl.u32 %v11860_v51, 16 }
 0x184   : > { %v11895_v13 = vor.u32 %v5505_v19, %v11849_v18  ;;  %v1638_v8 = vor.u32 %v1636_v26, %v1635_v40  ;;  %v1641_v39 = vshrl.u32 %v1561_v58, 16  ;;  %v5526_v38 = vshrl.u32 %v11867_v53, 16  ;;  %v10153_v26 = vld [vmem:[#allocation6 + $0x78] sm:$0xff]  }
 0x185   : > { %v11901_v44 = vcombine.low %v5241_v12, %v5253_v11  ;;  %891 = vst [vmem:[#allocation2 + $0x68] sm:$0xff] %v11887_v62  ;;  %890 = vst [vmem:[#allocation2 + $0x60] sm:$0xff] %v11889_v59  ;;  %v1644_v52 = vshll.u32 %v1561_v58, 16  ;;  %v781_v0 = vmul.f32 %v11406_v17, %v719_v37  ;;  %9522 = vmatprep.mubr.bf16.mxu1 %v11889_v59  ;;  %v3491_v37 = vld [vmem:[%s13542_s7 + $0x3c] sm:$0xf]  ;;  %v11919_v58 = vrot.slane %v5510_v2, 7 }
 0x186   : > { %13625 = vst [vmem:[#allocation40_spill] sm:$0xff] %v11895_v13  ;;  %v11898_v16 = vpop.permute.xlu1 %6136  ;;  %v11906_v19 = vpop.permute.xlu0 %5364  ;;  %v1639_v63 = vsel %vm1587_vm1, %v11835_v21, %v1638_v8  ;;  %v11911_v49 = vrot.slane %v1641_v39, 7  ;;  %v822_v11 = vadd.f32 %v11417_v57, %v783_v46  ;;  %v784_v56 = vmul.f32 %v9289_v29, %v11406_v17  ;;  %9523 = vmatmul.mubr.bf16.gmra.mrb[20].mxu1 %v11887_v62  ;;  %v3490_v29 = vld [vmem:[%s13542_s7 + $0x38] sm:$0xf] }
 0x187   : > { %7726 = vperm.xlu1 %10112, %v7593_v34   ;;  %7714 = vperm.xlu0 %10111, %v7592_v25   ;;  %v9292_v12 = vpop.f32.mrb[28].mxu0  ;;  %v5277_v34 = vrot.slane %v11780_v22, %v10875_v50  ;;  %v820_v21 = vadd.f32 %v11417_v57, %v781_v0  ;;  %v782_v46 = vmul.f32 %v11406_v17, %v722_v33  ;;  %v5521_v25 = vshll.u32 %v11860_v51, 16 }
 0x188   : > { %9319 = vmatmul.mubr.bf16.gmra.mrb[40].mxu0 %v1639_v63  ;;  %v735_v8 = vpop.f32.mrb[29].mxu0  ;;  %v1646_v39 = vor.u32 %v1644_v52, %v11911_v49  ;;  %v823_v2 = vadd.f32 %v11417_v57, %v784_v56  ;;  %v1562_v36 = vmul.bf16 %v11244_v31, %v11736_v61  ;;  %v11935_v0 = vrot.slane %v5518_v6, 7  ;;  %v11944_v56 = vld [vmem:[#allocation6 + $0x80] sm:$0xff]  }
 0x189   : > { %v9293_v63 = vpop.f32.mrb[30].mxu0  ;;  %9355 = vmatpush3.bf16.msra.mxu0 %v10152_v60  ;;  %v11937_v33 = vrot.slane %v5526_v38, 7  ;;  %v5265_v18 = vrot.slane %v11728_v5, %v10875_v50  ;;  %v821_v51 = vadd.f32 %v11417_v57, %v782_v46  ;;  %v5534_v31 = vshrl.u32 %v11901_v44, 16  ;;  %v7595_v5 = vld [vmem:[%s13543_s8 + $0x2c] sm:$0xf] }
 0x18a   : > { %v11933_v22 = vpop.permute.xlu1 %6160  ;;  %v11942_v13 = vpop.permute.xlu0 %6148  ;;  %9356 = vmatprep.subr.bf16.mxu0 %v10153_v26  ;;  %v1647_v61 = vsel %vm1587_vm1, %v1635_v40, %v1646_v39  ;;  %v854_v60 = vmax.f32 %v822_v11, 0.0  ;;  %v855_v6 = vmax.f32 %v823_v2, 0.0  ;;  %v852_v46 = vmax.f32 %v820_v21, 0.0 }
 0x18b   : > { %3690 = vperm.xlu1 %10112, %v3491_v37   ;;  %v738_v52 = vpop.f32.mrb[31].mxu0  ;;  %3678 = vperm.xlu0 %10111, %v3490_v29   ;;  %v11951_v38 = vcombine.low %v5265_v18, %v5277_v34  ;;  %v853_v37 = vmax.f32 %v821_v51, 0.0  ;;  %v1649_v20 = vshrl.u32 %v1562_v36, 16  ;;  %v5529_v48 = vshll.u32 %v11867_v53, 16 }
 0x18c   : > { %9322 = vmatprep.mubr.bf16.mxu0 %v1647_v61  ;;  %v11957_v40 = vpack.c.bf16 %v855_v6, %v854_v60  ;;  %v1563_v11 = vmul.bf16 %v11258_v1, %v11734_v55  ;;  %v787_v29 = vmul.f32 %v9292_v12, %v11406_v17  ;;  %v13626_v18 = vshll.u32 %v11823_v32, 16 }
 0x18d   : > { %9357 = vmatpush3.bf16.msra.mxu0 %v10153_v26  ;;  %v11969_v21 = vpack.c.bf16 %v853_v37, %v852_v46  ;;  %v1651_v2 = vrot.slane %v1649_v20, 7  ;;  %v1652_v51 = vshll.u32 %v1562_v36, 16  ;;  %v11975_v1 = vor.u32 %v5521_v25, %v11935_v0  ;;  %v3493_v20 = vld [vmem:[%s13542_s7 + $0x44] sm:$0xf] }
 0x18e   : > { %v11962_v39 = vpop.permute.xlu1 %6184  ;;  %v11967_v34 = vor.u32 %v13626_v18, %v11919_v58  ;;  %v11971_v53 = vpop.permute.xlu0 %6172  ;;  %9390 = vmatprep.subr.bf16.mxu0 %v11944_v56  ;;  %v11978_v55 = vor.u32 %v5529_v48, %v11937_v33  ;;  %v11980_v26 = vrot.slane %v5534_v31, 7  ;;  %893 = vst [vmem:[#allocation2 + $0x78] sm:$0xff] %v11957_v40  ;;  %v1657_v32 = vshrl.u32 %v1563_v11, 16 }
 0x18f   : > { %7750 = vperm.xlu1 %10112, %v7595_v5   ;;  %7738 = vperm.xlu0 %10111, %v7594_v41   ;;  %v5537_v36 = vshll.u32 %v11901_v44, 16  ;;  %v5542_v12 = vshrl.u32 %v11951_v38, 16  ;;  %892 = vst [vmem:[#allocation2 + $0x70] sm:$0xff] %v11969_v21  ;;  %v1654_v25 = vor.u32 %v1652_v51, %v1651_v2  ;;  %v785_v48 = vmul.f32 %v11406_v17, %v735_v8  ;;  %v3492_v44 = vld [vmem:[%s13542_s7 + $0x40] sm:$0xf] }
 0x190   : > { %9526 = vmatprep.mubr.bf16.mxu1 %v11969_v21  ;;  %v11991_v31 = vrot.slane %v1657_v32, 7  ;;  %v1660_v61 = vshll.u32 %v1563_v11, 16  ;;  %v826_v41 = vadd.f32 %v11417_v57, %v787_v29  ;;  %v788_v60 = vmul.f32 %v9293_v63, %v11406_v17 }
 0x191   : > { %9527 = vmatmul.mubr.bf16.gmra.mrb[24].mxu1 %v11957_v40  ;;  %v5289_v8 = vrot.slane %v11771_v54, %v10875_v50  ;;  %v1655_v5 = vsel %vm1587_vm1, %v11911_v49, %v1654_v25  ;;  %v824_v46 = vadd.f32 %v11417_v57, %v785_v48  ;;  %v786_v37 = vmul.f32 %v11406_v17, %v738_v52  ;;  %v7597_v49 = vld [vmem:[%s13543_s8 + $0x34] sm:$0xf] }
 0x192   : > { %v11995_v6 = vpop.permute.xlu1 %6208  ;;  %v12007_v11 = vpop.permute.xlu0 %6196  ;;  %v12010_v63 = vor.u32 %v5537_v36, %v11980_v26  ;;  %9323 = vmatmul.mubr.bf16.gmra.mrb[44].mxu0 %v1655_v5  ;;  %v1662_v29 = vor.u32 %v1660_v61, %v11991_v31  ;;  %v827_v18 = vadd.f32 %v11417_v57, %v788_v60  ;;  %v1564_v54 = vmul.bf16 %v11285_v15, %v11807_v9 }
 0x193   : > { %3714 = vperm.xlu1 %10112, %v3493_v20   ;;  %v12019_v51 = vrot.slane %v5542_v12, 7  ;;  %v5301_v17 = vrot.slane %v11810_v28, %v10875_v50  ;;  %v5325_v52 = vrot.slane %v11847_v7, %v10875_v50  ;;  %v825_v32 = vadd.f32 %v11417_v57, %v786_v37  ;;  %3702 = vperm.xlu0 %10111, %v3492_v44   ;;  %v7596_v12 = vld [vmem:[%s13543_s8 + $0x30] sm:$0xf] }
 0x194   : > { %v5349_v20 = vrot.slane %v11876_v23, %v10875_v50  ;;  %v1663_v15 = vsel %vm1587_vm1, %v1651_v2, %v1662_v29  ;;  %v858_v9 = vmax.f32 %v826_v41, 0.0  ;;  %v859_v36 = vmax.f32 %v827_v18, 0.0  ;;  %v3494_v18 = vld [vmem:[%s13542_s7 + $0x48] sm:$0xf] }
 0x195   : > { %v5373_v28 = vrot.slane %v11906_v19, %v10875_v50  ;;  %9326 = vmatprep.mubr.bf16.mxu0 %v1663_v15  ;;  %v856_v7 = vmax.f32 %v824_v46, 0.0  ;;  %v857_v57 = vmax.f32 %v825_v32, 0.0  ;;  %v1665_v48 = vshrl.u32 %v1564_v54, 16  ;;  %v3495_v19 = vld [vmem:[%s13542_s7 + $0x4c] sm:$0xf] }
 0x196   : > { %v12029_v25 = vpop.permute.xlu1 %6232  ;;  %v12036_v61 = vpop.permute.xlu0 %6220  ;;  %v5313_v23 = vrot.slane %v11802_v47, %v10875_v50  ;;  %v5337_v2 = vrot.slane %v11838_v45, %v10875_v50  ;;  %v879_v41 = vpack.c.bf16 %v859_v36, %v858_v9  ;;  %v1565_v60 = vmul.bf16 %v11322_v14, %v11805_v3  ;;  %v7599_v15 = vld [vmem:[%s13543_s8 + $0x3c] sm:$0xf] }
 0x197   : > { %7774 = vperm.xlu1 %10112, %v7597_v49   ;;  %v5361_v44 = vrot.slane %v11873_v35, %v10875_v50  ;;  %v12049_v5 = vpack.c.bf16 %v857_v57, %v856_v7  ;;  %v1667_v46 = vrot.slane %v1665_v48, 7  ;;  %v1668_v37 = vshll.u32 %v1564_v54, 16  ;;  %7762 = vperm.xlu0 %10111, %v7596_v12  }
 0x198   : > { %v12051_v47 = vcombine.low %v5289_v8, %v5301_v17  ;;  %v12053_v29 = vcombine.low %v5313_v23, %v5325_v52  ;;  %v12055_v45 = vcombine.low %v5337_v2, %v5349_v20  ;;  %895 = vst [vmem:[#allocation2 + $0x88] sm:$0xff] %v879_v41  ;;  %v1673_v14 = vshrl.u32 %v1565_v60, 16 }
 0x199   : > { %v5545_v35 = vshll.u32 %v11951_v38, 16  ;;  %v12063_v49 = vcombine.low %v5361_v44, %v5373_v28  ;;  %894 = vst [vmem:[#allocation2 + $0x80] sm:$0xff] %v12049_v5  ;;  %v1670_v8 = vor.u32 %v1668_v37, %v1667_v46  ;;  %v1566_v54 = vmul.bf16 %v11325_v30, %v11889_v59  ;;  %9530 = vmatprep.mubr.bf16.mxu1 %v12049_v5 }
 0x19a   : > { %v12057_v3 = vpop.permute.xlu1 %6256  ;;  %v12068_v17 = vpop.permute.xlu0 %6244  ;;  %v6157_v52 = vrot.slane %v11942_v13, %v10875_v50  ;;  %v1675_v32 = vrot.slane %v1673_v14, 7  ;;  %v1676_v20 = vshll.u32 %v1565_v60, 16  ;;  %v1567_v38 = vmul.bf16 %v11334_v10, %v11887_v62  ;;  %9531 = vmatmul.mubr.bf16.gmra.mrb[28].mxu1 %v879_v41 }
 0x19b   : > { %3738 = vperm.xlu1 %10112, %v3495_v19   ;;  %v12079_v30 = vor.u32 %v5545_v35, %v12019_v51  ;;  %v1671_v59 = vsel %vm1587_vm1, %v11991_v31, %v1670_v8  ;;  %v6181_v9 = vrot.slane %v11971_v53, %v10875_v50  ;;  %v1681_v13 = vshrl.u32 %v1566_v54, 16  ;;  %3726 = vperm.xlu0 %10111, %v3494_v18   ;;  %v7598_v31 = vld [vmem:[%s13543_s8 + $0x38] sm:$0xf]  ;;  %v3497_v19 = vld [vmem:[%s13542_s7 + $0x54] sm:$0xf] }
 0x19c   : > { %v5550_v36 = vshrl.u32 %v12051_v47, 16  ;;  %v5558_v10 = vshrl.u32 %v12053_v29, 16  ;;  %v6145_v62 = vrot.slane %v11898_v16, %v10875_v50  ;;  %9327 = vmatmul.mubr.bf16.gmra.mrb[48].mxu0 %v1671_v59  ;;  %v1678_v12 = vor.u32 %v1676_v20, %v1675_v32 }
 0x19d   : > { %v6169_v53 = vrot.slane %v11933_v22, %v10875_v50  ;;  %v1683_v7 = vrot.slane %v1681_v13, 7  ;;  %v1684_v57 = vshll.u32 %v1566_v54, 16  ;;  %v1689_v48 = vshrl.u32 %v1567_v38, 16  ;;  %v12131_v13 = vld [vmem:[#allocation2 + $0x10] sm:$0xff] }
 0x19e   : > { %v12089_v28 = vpop.permute.xlu1 %6280  ;;  %v12096_v23 = vpop.permute.xlu0 %6268  ;;  %v5566_v2 = vshrl.u32 %v12055_v45, 16  ;;  %v5574_v16 = vshrl.u32 %v12063_v49, 16  ;;  %v12100_v41 = vcombine.low %v6145_v62, %v6157_v52  ;;  %v1679_v60 = vsel %vm1587_vm1, %v1667_v46, %v1678_v12  ;;  %v3496_v52 = vld [vmem:[%s13542_s7 + $0x50] sm:$0xf]  ;;  %v7601_v12 = vld [vmem:[%s13543_s8 + $0x44] sm:$0xf] }
 0x19f   : > { %7798 = vperm.xlu1 %10112, %v7599_v15   ;;  %v12106_v44 = vcombine.low %v6169_v53, %v6181_v9  ;;  %9330 = vmatprep.mubr.bf16.mxu0 %v1679_v60  ;;  %v1686_v22 = vor.u32 %v1684_v57, %v1683_v7  ;;  %v1691_v37 = vrot.slane %v1689_v48, 7  ;;  %v1692_v14 = vshll.u32 %v1567_v38, 16  ;;  %v7600_v48 = vld [vmem:[%s13543_s8 + $0x40] sm:$0xf] }
 0x1a0   : > { %7786 = vperm.xlu0 %10111, %v7598_v31   ;;  %v12108_v18 = vrot.slane %v5550_v36, 7  ;;  %v5553_v35 = vshll.u32 %v12051_v47, 16  ;;  %v6205_v8 = vrot.slane %v12007_v11, %v10875_v50  ;;  %v1568_v46 = vmul.bf16 %v11373_v43, %v11969_v21  ;;  %v12133_v36 = vld [vmem:[#allocation2 + $0x18] sm:$0xff] }
 0x1a1   : > { %v12120_v20 = vrot.slane %v5558_v10, 7  ;;  %v5561_v38 = vshll.u32 %v12053_v29, 16  ;;  %v1687_v15 = vsel %vm1587_vm1, %v1675_v32, %v1686_v22  ;;  %v1694_v59 = vor.u32 %v1692_v14, %v1691_v37 }
 0x1a2   : > { %v12115_v54 = vpop.permute.xlu1 %6304  ;;  %v12124_v47 = vpop.permute.xlu0 %6292  ;;  %v12126_v11 = vrot.slane %v5566_v2, 7  ;;  %v6599_v43 = vshll.u32 %v12100_v41, 16  ;;  %v6193_v21 = vrot.slane %v11962_v39, %v10875_v50  ;;  %v1697_v9 = vshrl.u32 %v1568_v46, 16 }
 0x1a3   : > { %3762 = vperm.xlu1 %10112, %v3497_v19   ;;  %v5569_v29 = vshll.u32 %v12055_v45, 16  ;;  %v12136_v10 = vrot.slane %v5574_v16, 7  ;;  %v6606_v32 = vshll.u32 %v12106_v44, 16  ;;  %v1695_v62 = vsel %vm1587_vm1, %v1683_v7, %v1694_v59 }
 0x1a4   : > { %13627 = vst [vmem:[#allocation41_spill] sm:$0xff] %v12126_v11  ;;  %3750 = vperm.xlu0 %10111, %v3496_v52   ;;  %v12143_v31 = vcombine.low %v6193_v21, %v6205_v8  ;;  %9331 = vmatmul.mubr.bf16.gmra.mrb[52].mxu0 %v1687_v15  ;;  %v1699_v39 = vrot.slane %v1697_v9, 7  ;;  %v1700_v53 = vshll.u32 %v1568_v46, 16  ;;  %v1569_v57 = vmul.bf16 %v11383_v27, %v11957_v40  ;;  %v3499_v46 = vld [vmem:[%s13542_s7 + $0x5c] sm:$0xf] }
 0x1a5   : > { %13628 = vst [vmem:[#allocation42_spill] sm:$0xff] %v12136_v10  ;;  %v12153_v7 = vor.u32 %v5553_v35, %v12108_v18  ;;  %v5577_v2 = vshll.u32 %v12063_v49, 16  ;;  %9334 = vmatprep.mubr.bf16.mxu0 %v1695_v62  ;;  %v5598_v16 = vmul.bf16 %v11603_v42, %v12131_v13  ;;  %v5599_v60 = vmul.bf16 %v11742_v24, %v12133_v36  ;;  %v12174_v24 = vld [vmem:[#allocation2 + $0x20] sm:$0xff] }
 0x1a6   : > { %v12147_v45 = vpop.permute.xlu1 %6328  ;;  %v12160_v19 = vpop.permute.xlu0 %6316  ;;  %v12163_v27 = vor.u32 %v5561_v38, %v12120_v20  ;;  %v12166_v40 = vor.u32 %v5569_v29, %v12126_v11  ;;  %v12168_v22 = vrot.slane %v6599_v43, 1  ;;  %v1702_v14 = vor.u32 %v1700_v53, %v1699_v39 }
 0x1a7   : > { %7822 = vperm.xlu1 %10112, %v7601_v12   ;;  %v12171_v49 = vor.u32 %v5577_v2, %v12136_v10  ;;  %v6602_v42 = vshrl.u32 %v12100_v41, 16  ;;  %v1705_v35 = vshrl.u32 %v1569_v57, 16  ;;  %v5635_v8 = vshll.u32 %v5598_v16, 16  ;;  %v3498_v41 = vld [vmem:[%s13542_s7 + $0x58] sm:$0xf] }
 0x1a8   : > { %13629 = vst [vmem:[#allocation43_spill] sm:$0xff] %v12168_v22  ;;  %7810 = vperm.xlu0 %10111, %v7600_v48   ;;  %v6608_v52 = vrot.slane %v6606_v32, 1  ;;  %v6614_v38 = vshll.u32 %v12143_v31, 16  ;;  %v1703_v15 = vsel %vm1587_vm1, %v1691_v37, %v1702_v14  ;;  %v5640_v59 = vshll.u32 %v5599_v60, 16  ;;  %v13631_v48 = vld [vmem:[#allocation15_spill] sm:$0xff] }
 0x1a9   : > { %13630 = vst [vmem:[#allocation44_spill] sm:$0xff] %v12171_v49  ;;  %v1707_v21 = vrot.slane %v1705_v35, 7  ;;  %v1708_v9 = vshll.u32 %v1569_v57, 16  ;;  %v5633_v29 = vshrl.u32 %v5598_v16, 16  ;;  %v5637_v62 = vrot.slane %v5635_v8, 1 }
 0x1aa   : > { %v12181_v43 = vpop.permute.xlu1 %6352  ;;  %v6341_v12 = vpop.permute.xlu0 %6340  ;;  %v6604_v53 = vor.u32 %v6602_v42, %v12168_v22  ;;  %v6610_v32 = vshrl.u32 %v12106_v44, 16  ;;  %v1570_v2 = vmul.bf16 %v13631_v48, %v12049_v5  ;;  %v5600_v37 = vmul.bf16 %v11746_v4, %v12174_v24  ;;  %v7602_v8 = vld [vmem:[%s13543_s8 + $0x48] sm:$0xf] }
 0x1ab   : > { %3786 = vperm.xlu1 %10112, %v3499_v46   ;;  %v6229_v14 = vrot.slane %v12036_v61, %v10875_v50  ;;  %v1710_v10 = vor.u32 %v1708_v9, %v1707_v21  ;;  %v5638_v35 = vor.u32 %v5637_v62, %v5633_v29  ;;  %v5642_v57 = vrot.slane %v5640_v59, 1  ;;  %v7603_v61 = vld [vmem:[%s13543_s8 + $0x4c] sm:$0xf] }
 0x1ac   : > { %3774 = vperm.xlu0 %10111, %v3498_v41   ;;  %v12195_v16 = vsel %vm1409_vm0, %v6604_v53, %v6608_v52  ;;  %v6217_v44 = vrot.slane %v11995_v6, %v10875_v50  ;;  %9335 = vmatmul.mubr.bf16.gmra.mrb[56].mxu0 %v1703_v15  ;;  %v1713_v42 = vshrl.u32 %v1570_v2, 16  ;;  %v6612_v46 = vor.u32 %v6610_v32, %v6608_v52  ;;  %v12211_v9 = vld [vmem:[#allocation2 + $0x28] sm:$0xff] }
 0x1ad   : > { %13632 = vst [vmem:[#allocation15_spill] sm:$0xff] %v12195_v16  ;;  %v6616_v59 = vrot.slane %v6614_v38, 1  ;;  %v1711_v41 = vsel %vm1587_vm1, %v1699_v39, %v1710_v10  ;;  %v5643_v6 = vsel %vm1409_vm0, %v5638_v35, %v5642_v57  ;;  %v5644_v29 = vshrl.u32 %v5599_v60, 16  ;;  %v13633_v38 = vld [vmem:[#allocation33_spill] sm:$0xff]  ;;  %v13634_v10 = vld [vmem:[#allocation30_spill] sm:$0xff] }
 0x1ae   : > { %v12201_v4 = vpop.permute.xlu1 %6376  ;;  %v6365_v15 = vpop.permute.xlu0 %6364  ;;  %9338 = vmatprep.mubr.bf16.mxu0 %v1711_v41  ;;  %9550 = vmatprep.mubr.bf16.mxu1 %v5643_v6  ;;  %v1715_v62 = vrot.slane %v1713_v42, 7  ;;  %v1716_v53 = vshll.u32 %v1570_v2, 16  ;;  %v5648_v48 = vshll.u32 %v5600_v37, 16  ;;  %v6618_v5 = vshrl.u32 %v12143_v31, 16  ;;  %v12222_v2 = vld [vmem:[#allocation2 + $0x30] sm:$0xff] }
 0x1af   : > { %v12214_v16 = vcombine.low %v6217_v44, %v6229_v14  ;;  %v5484_v39 = vsel %vm1587_vm1, %v13634_v10, %v13633_v38  ;;  %7846 = vperm.xlu1 %10112, %v7603_v61   ;;  %v5646_v32 = vor.u32 %v5644_v29, %v5642_v57  ;;  %v3501_v31 = vld [vmem:[%s13542_s7 + $0x64] sm:$0xf]  ;;  %v6253_v14 = vrot.slane %v12068_v17, %v10875_v50  ;;  %v13636_v38 = vld [vmem:[#allocation32_spill] sm:$0xff] }
 0x1b0   : > { %7834 = vperm.xlu0 %10111, %v7602_v8   ;;  %v1718_v35 = vor.u32 %v1716_v53, %v1715_v62  ;;  %v5650_v60 = vrot.slane %v5648_v48, 1  ;;  %v5601_v42 = vmul.bf16 %v5484_v39, %v12211_v9  ;;  %v6337_v44 = vrot.slane %v12147_v45, %v10875_v50  ;;  %v10154_v8 = vld [vmem:[#allocation6 + $0x188] sm:$0xff]   ;;  %v13635_v48 = vld [vmem:[#allocation36_spill] sm:$0xff]  ;;  %v12245_v39 = vld [vmem:[#allocation2 + $0x38] sm:$0xff] }
 0x1b1   : > { %v5652_v61 = vshrl.u32 %v5600_v37, 16  ;;  %v6349_v57 = vrot.slane %v6341_v12, %v10875_v50  ;;  %v12237_v29 = vsel %vm1409_vm0, %v6612_v46, %v6616_v59  ;;  %v5492_v17 = vsel %vm1587_vm1, %v13636_v38, %v13635_v48  ;;  %v3500_v46 = vld [vmem:[%s13542_s7 + $0x60] sm:$0xf] }
 0x1b2   : > { %v12224_v41 = vpop.permute.xlu1 %6400  ;;  %v12234_v6 = vpop.permute.xlu0 %6388  ;;  %v1719_v62 = vsel %vm1587_vm1, %v1707_v21, %v1718_v35  ;;  %v5651_v53 = vsel %vm1409_vm0, %v5646_v32, %v5650_v60  ;;  %v5656_v45 = vshll.u32 %v5601_v42, 16  ;;  %v5602_v12 = vmul.bf16 %v5492_v17, %v12222_v2  ;;  %v13637_v32 = vld [vmem:[#allocation38_spill] sm:$0xff] }
 0x1b3   : > { %9551 = vmatmul.mubr.bf16.vlgmr.msra.gmra.mrb[0].mxu1 %v5651_v53  ;;  %v5654_v10 = vor.u32 %v5652_v61, %v5650_v60  ;;  %v8951_v37 = vcombine.low %v6337_v44, %v6349_v57  ;;  %3810 = vperm.xlu1 %10112, %v3501_v31   ;;  %v12250_v21 = vor.u32 %v6618_v5, %v6616_v59  ;;  %v5660_v60 = vshrl.u32 %v5601_v42, 16  ;;  %v7605_v31 = vld [vmem:[%s13543_s8 + $0x54] sm:$0xf]  ;;  %v12261_v48 = vld [vmem:[#allocation2] sm:$0xff]  ;;  %v13639_v59 = vld [vmem:[#allocation37_spill] sm:$0xff] }
 0x1b4   : > { %9339 = vmatmul.mubr.bf16.gmra.mrb[60].mxu0 %v1719_v62  ;;  %9583 = vmatpush3.bf16.msra.mxu1 %v13637_v32  ;;  %v6361_v35 = vrot.slane %v12181_v43, %v10875_v50  ;;  %v6373_v44 = vrot.slane %v6365_v15, %v10875_v50  ;;  %v5658_v57 = vrot.slane %v5656_v45, 1  ;;  %13638 = vst [vmem:[#allocation33_spill] sm:$0xff] %v12261_v48  ;;  %v5664_v5 = vshll.u32 %v5602_v12, 16  ;;  %v13640_v62 = vld [vmem:[#allocation34_spill] sm:$0xff]  ;;  %v10155_v42 = vld [vmem:[#allocation6 + $0x190] sm:$0xff]  }
 0x1b5   : > { %v6662_v53 = vshll.u32 %v8951_v37, 16  ;;  %9358 = vmatprep.mubr.bf16.mxu0 %v12261_v48  ;;  %9584 = vmatprep.subr.bf16.mxu1 %v10154_v8  ;;  %v5500_v43 = vsel %vm1587_vm1, %v13640_v62, %v13639_v59  ;;  %v13641_v38 = vrot.slane %v12029_v25, %v10875_v50  ;;  %v6666_v32 = vshrl.u32 %v8951_v37, 16  ;;  %v7604_v59 = vld [vmem:[%s13543_s8 + $0x50] sm:$0xf]  ;;  %v12294_v62 = vld [vmem:[#allocation2 + $0x40] sm:$0xff] }
 0x1b6   : > { %v12256_v61 = vpop.permute.xlu1 %6424  ;;  %v6413_v15 = vpop.permute.xlu0 %6412  ;;  %v8952_v45 = vcombine.low %v6361_v35, %v6373_v44  ;;  %v5603_v52 = vmul.bf16 %v5500_v43, %v12245_v39  ;;  %3798 = vperm.xlu0 %10111, %v3500_v46   ;;  %v5659_v48 = vsel %vm1409_vm0, %v5654_v10, %v5658_v57  ;;  %v5662_v11 = vor.u32 %v5660_v60, %v5658_v57  ;;  %v3503_v10 = vld [vmem:[%s13542_s7 + $0x6c] sm:$0xf] }
 0x1b7   : > { %v12270_v17 = vcombine.low %v13641_v38, %v6253_v14  ;;  %v12274_v22 = vrot.slane %v6662_v53, 1  ;;  %v5666_v49 = vrot.slane %v5664_v5, 1  ;;  %7870 = vperm.xlu1 %10112, %v7605_v31   ;;  %9554 = vmatprep.mubr.bf16.mxu1 %v5659_v48  ;;  %v5668_v37 = vshrl.u32 %v5602_v12, 16 }
 0x1b8   : > { %9585 = vmatpush3.bf16.msra.mxu1 %v10154_v8  ;;  %v6670_v14 = vshll.u32 %v8952_v45, 16  ;;  %v5672_v35 = vshll.u32 %v5603_v52, 16  ;;  %v6385_v57 = vrot.slane %v12201_v4, %v10875_v50  ;;  %v6397_v5 = vrot.slane %v12234_v6, %v10875_v50  ;;  %v10156_v6 = vld [vmem:[#allocation6 + $0x198] sm:$0xff]  }
 0x1b9   : > { %v6668_v44 = vor.u32 %v6666_v32, %v12274_v22  ;;  %v5667_v31 = vsel %vm1409_vm0, %v5662_v11, %v5666_v49  ;;  %9586 = vmatprep.subr.bf16.mxu1 %v10155_v42  ;;  %v5670_v53 = vor.u32 %v5668_v37, %v5666_v49  ;;  %v6674_v43 = vshrl.u32 %v8952_v45, 16  ;;  %v13642_v11 = vld [vmem:[#allocation40_spill] sm:$0xff]  ;;  %v13643_v32 = vld [vmem:[#allocation35_spill] sm:$0xff] }
 0x1ba   : > { %v12281_v46 = vpop.permute.xlu1 %6448  ;;  %v6437_v8 = vpop.permute.xlu0 %6436  ;;  %v6672_v12 = vrot.slane %v6670_v14, 1  ;;  %v5674_v48 = vrot.slane %v5672_v35, 1  ;;  %7858 = vperm.xlu0 %10111, %v7604_v59   ;;  %v6409_v38 = vrot.slane %v12224_v41, %v10875_v50  ;;  %v5508_v4 = vsel %vm1587_vm1, %v13643_v32, %v13642_v11  ;;  %v3502_v49 = vld [vmem:[%s13542_s7 + $0x68] sm:$0xf] }
 0x1bb   : > { %9555 = vmatmul.mubr.bf16.gmra.mrb[4].mxu1 %v5667_v31  ;;  %v6421_v60 = vrot.slane %v6413_v15, %v10875_v50  ;;  %3834 = vperm.xlu1 %10112, %v3503_v10   ;;  %v8953_v41 = vcombine.low %v6385_v57, %v6397_v5  ;;  %v5676_v14 = vshrl.u32 %v5603_v52, 16  ;;  %v12310_v37 = vld [vmem:[#allocation2 + $0x48] sm:$0xff]  ;;  %v7607_v15 = vld [vmem:[%s13543_s8 + $0x5c] sm:$0xf]  ;;  %v6433_v10 = vrot.slane %v12256_v61, %v10875_v50 }
 0x1bc   : > { %9359 = vmatmul.mubr.bf16.vlgmr.msra.gmra.mrb[32].mxu0 %v12131_v13  ;;  %v12307_v59 = vsel %vm1409_vm0, %v6668_v44, %v6672_v12  ;;  %v5675_v45 = vsel %vm1409_vm0, %v5670_v53, %v5674_v48  ;;  %v5604_v13 = vmul.bf16 %v5508_v4, %v12294_v62  ;;  %v12323_v52 = vld [vmem:[#allocation6 + $0x88] sm:$0xff]   ;;  %v6676_v57 = vor.u32 %v6674_v43, %v6672_v12 }
 0x1bd   : > { %13644 = vst [vmem:[#allocation30_spill] sm:$0xff] %v12307_v59  ;;  %9362 = vmatprep.mubr.bf16.mxu0 %v12133_v36  ;;  %9558 = vmatprep.mubr.bf16.mxu1 %v5675_v45  ;;  %v8954_v44 = vcombine.low %v6409_v38, %v6421_v60  ;;  %v6678_v53 = vshll.u32 %v8953_v41, 16  ;;  %v5678_v5 = vor.u32 %v5676_v14, %v5674_v48  ;;  %v13645_v11 = vld [vmem:[#allocation39_spill] sm:$0xff]  ;;  %v12328_v45 = vld [vmem:[#allocation2 + $0x50] sm:$0xff]  ;;  %v6682_v4 = vshrl.u32 %v8953_v41, 16 }
 0x1be   : > { %v12312_v35 = vpop.permute.xlu1 %6472  ;;  %v12321_v31 = vpop.permute.xlu0 %6460  ;;  %9587 = vmatpush3.bf16.msra.mxu1 %v10155_v42  ;;  %v5516_v32 = vsel %vm1587_vm1, %v13645_v11, %v11967_v34  ;;  %3822 = vperm.xlu0 %10111, %v3502_v49   ;;  %v5680_v25 = vshll.u32 %v5604_v13, 16  ;;  %v7606_v60 = vld [vmem:[%s13543_s8 + $0x58] sm:$0xf]  ;;  %v10157_v42 = vld [vmem:[#allocation6 + $0x1a0] sm:$0xff]   ;;  %v5684_v48 = vshrl.u32 %v5604_v13, 16  ;;  %v6445_v34 = vrot.slane %v6437_v8, %v10875_v50 }
 0x1bf   : > { %v6686_v59 = vshll.u32 %v8954_v44, 16  ;;  %v12331_v61 = vmul.bf16 %v5516_v32, %v12310_v37  ;;  %9588 = vmatprep.subr.bf16.mxu1 %v10156_v6  ;;  %7894 = vperm.xlu1 %10112, %v7607_v15   ;;  %v6680_v12 = vrot.slane %v6678_v53, 1  ;;  %v5524_v43 = vsel %vm1587_vm1, %v11919_v58, %v11975_v1  ;;  %v3505_v49 = vld [vmem:[%s13542_s7 + $0x74] sm:$0xf] }
 0x1c0   : > { %9391 = vmatpush3.bf16.msra.mxu0 %v11944_v56  ;;  %v5682_v41 = vrot.slane %v5680_v25, 1  ;;  %v5606_v13 = vmul.bf16 %v5524_v43, %v12328_v45  ;;  %v6622_v8 = vshll.u32 %v12214_v16, 16  ;;  %v8955_v11 = vcombine.low %v6433_v10, %v6445_v34  ;;  %v3504_v43 = vld [vmem:[%s13542_s7 + $0x70] sm:$0xf] }
 0x1c1   : > { %v6688_v14 = vrot.slane %v6686_v59, 1  ;;  %v5688_v15 = vshll.u32 %v12331_v61, 16  ;;  %9392 = vmatprep.subr.bf16.mxu0 %v12323_v52  ;;  %v12351_v58 = vsel %vm1409_vm0, %v6676_v57, %v6680_v12  ;;  %v6684_v1 = vor.u32 %v6682_v4, %v6680_v12 }
 0x1c2   : > { %v12340_v38 = vpop.permute.xlu1 %6496  ;;  %v6485_v53 = vpop.permute.xlu0 %6484  ;;  %9589 = vmatpush3.bf16.msra.mxu1 %v10156_v6  ;;  %7882 = vperm.xlu0 %10111, %v7606_v60   ;;  %v5683_v56 = vsel %vm1409_vm0, %v5678_v5, %v5682_v41  ;;  %v6690_v25 = vshrl.u32 %v8954_v44, 16  ;;  %v5686_v59 = vor.u32 %v5684_v48, %v5682_v41  ;;  %v6457_v6 = vrot.slane %v12281_v46, %v10875_v50  ;;  %v12363_v44 = vld [vmem:[#allocation2 + $0x58] sm:$0xff]  ;;  %v7609_v46 = vld [vmem:[%s13543_s8 + $0x64] sm:$0xf] }
 0x1c3   : > { %v5690_v32 = vrot.slane %v5688_v15, 1  ;;  %3858 = vperm.xlu1 %10112, %v3505_v49   ;;  %9590 = vmatprep.subr.bf16.mxu1 %v10157_v42  ;;  %v12359_v57 = vsel %vm1409_vm0, %v6684_v1, %v6688_v14  ;;  %v6694_v10 = vshll.u32 %v8955_v11, 16  ;;  %v5696_v5 = vshll.u32 %v5606_v13, 16  ;;  %v10158_v49 = vld [vmem:[#allocation6 + $0x1a8] sm:$0xff]  }
 0x1c4   : > { %9363 = vmatmul.mubr.bf16.gmra.mrb[36].mxu0 %v12174_v24  ;;  %9559 = vmatmul.mubr.bf16.gmra.mrb[8].mxu1 %v5683_v56  ;;  %v6692_v60 = vor.u32 %v6690_v25, %v6688_v14  ;;  %v5692_v24 = vshrl.u32 %v12331_v61, 16  ;;  %v6469_v48 = vrot.slane %v12321_v31, %v10875_v50  ;;  %v6481_v14 = vrot.slane %v12312_v35, %v10875_v50  ;;  %v12380_v61 = vld [vmem:[#allocation6 + $0x90] sm:$0xff]  }
 0x1c5   : > { %9366 = vmatprep.mubr.bf16.mxu0 %v12211_v9  ;;  %v5691_v12 = vsel %vm1409_vm0, %v5686_v59, %v5690_v32  ;;  %v6696_v41 = vrot.slane %v6694_v10, 1  ;;  %v5698_v15 = vrot.slane %v5696_v5, 1  ;;  %v5532_v1 = vsel %vm1587_vm1, %v11935_v0, %v11978_v55  ;;  %v7608_v10 = vld [vmem:[%s13543_s8 + $0x60] sm:$0xf]  ;;  %9393 = vmatpush3.bf16.msra.mxu0 %v12323_v52 }
 0x1c6   : > { %v12365_v4 = vpop.permute.xlu1 %2642  ;;  %v6509_v34 = vpop.permute.xlu0 %6508  ;;  %9562 = vmatprep.mubr.bf16.mxu1 %v5691_v12  ;;  %3846 = vperm.xlu0 %10111, %v3504_v43   ;;  %v8956_v31 = vcombine.low %v6457_v6, %v6469_v48  ;;  %v12383_v56 = vmul.bf16 %v5532_v1, %v12363_v44  ;;  %v5700_v25 = vshrl.u32 %v5606_v13, 16  ;;  %v6493_v59 = vrot.slane %v6485_v53, %v10875_v50  ;;  %v12397_v12 = vld [vmem:[#allocation2 + $0x60] sm:$0xff] }
 0x1c7   : > { %9591 = vmatpush3.bf16.msra.mxu1 %v10157_v42  ;;  %v12390_v35 = vsel %vm1409_vm0, %v6692_v60, %v6696_v41  ;;  %v6698_v5 = vshrl.u32 %v8955_v11, 16  ;;  %v5694_v0 = vor.u32 %v5692_v24, %v5690_v32  ;;  %v6505_v55 = vrot.slane %v12340_v38, %v10875_v50  ;;  %7918 = vperm.xlu1 %10112, %v7609_v46   ;;  %v7611_v24 = vld [vmem:[%s13543_s8 + $0x6c] sm:$0xf] }
 0x1c8   : > { %13646 = vst [vmem:[#allocation36_spill] sm:$0xff] %v12390_v35  ;;  %v6702_v6 = vshll.u32 %v8956_v31, 16  ;;  %v5702_v13 = vor.u32 %v5700_v25, %v5698_v15  ;;  %v5704_v53 = vshll.u32 %v12383_v56, 16  ;;  %v8957_v42 = vcombine.low %v6481_v14, %v6493_v59  ;;  %9592 = vmatprep.subr.bf16.mxu1 %v10158_v49  ;;  %9394 = vmatprep.subr.bf16.mxu0 %v12380_v61 }
 0x1c9   : > { %v6700_v11 = vor.u32 %v6698_v5, %v6696_v41  ;;  %v5699_v32 = vsel %vm1409_vm0, %v5694_v0, %v5698_v15  ;;  %v6706_v60 = vshrl.u32 %v8956_v31, 16  ;;  %v6517_v38 = vrot.slane %v6509_v34, %v10875_v50  ;;  %v7610_v41 = vld [vmem:[%s13543_s8 + $0x68] sm:$0xf]  ;;  %v10161_v34 = vld [vmem:[#allocation6 + $0x1b0] sm:$0xff]   ;;  %9395 = vmatpush3.bf16.msra.mxu0 %v12380_v61 }
 0x1ca   : > { %v12394_v43 = vpop.permute.xlu1 %2666  ;;  %v12399_v48 = vpop.permute.xlu0 %2654  ;;  %7906 = vperm.xlu0 %10111, %v7608_v10   ;;  %v6704_v46 = vrot.slane %v6702_v6, 1  ;;  %v5706_v14 = vrot.slane %v5704_v53, 1  ;;  %v6710_v1 = vshll.u32 %v8957_v42, 16  ;;  %v5540_v52 = vsel %vm1587_vm1, %v11937_v33, %v12010_v63  ;;  %v10163_v33 = vld [vmem:[#allocation6 + $0x98] sm:$0xff]   ;;  %v12471_v61 = vld [vmem:[#allocation2 + $0x70] sm:$0xff] }
 0x1cb   : > { %9593 = vmatpush3.bf16.msra.mxu1 %v10158_v49  ;;  %v6626_v15 = vshrl.u32 %v12214_v16, 16  ;;  %v6289_v31 = vrot.slane %v12089_v28, %v10875_v50  ;;  %v5608_v25 = vmul.bf16 %v5540_v52, %v12397_v12  ;;  %v12419_v59 = vcombine.low %v6505_v55, %v6517_v38  ;;  %7942 = vperm.xlu1 %10112, %v7611_v24   ;;  %v12430_v6 = vld [vmem:[#allocation6 + $0x1b8] sm:$0xff]   ;;  %v12443_v38 = vld [vmem:[#allocation2 + $0x68] sm:$0xff] }
 0x1cc   : > { %9367 = vmatmul.mubr.bf16.gmra.mrb[40].mxu0 %v12222_v2  ;;  %9563 = vmatmul.mubr.bf16.gmra.mrb[12].mxu1 %v5699_v32  ;;  %v12424_v63 = vsel %vm1409_vm0, %v6700_v11, %v6704_v46  ;;  %v6708_v49 = vor.u32 %v6706_v60, %v6704_v46  ;;  %v5707_v5 = vsel %vm1409_vm0, %v5702_v13, %v5706_v14  ;;  %v6712_v0 = vrot.slane %v6710_v1, 1  ;;  %v3507_v24 = vld [vmem:[%s13542_s7 + $0x7c] sm:$0xf] }
 0x1cd   : > { %13647 = vst [vmem:[#allocation32_spill] sm:$0xff] %v12424_v63  ;;  %9370 = vmatprep.mubr.bf16.mxu0 %v12245_v39  ;;  %v6624_v55 = vrot.slane %v6622_v8, 1  ;;  %v13648_v53 = vrot.slane %v12096_v23, %v10875_v50  ;;  %v13649_v11 = vrot.slane %v12057_v3, %v10875_v50  ;;  %9566 = vmatprep.mubr.bf16.mxu1 %v5707_v5  ;;  %v5708_v13 = vshrl.u32 %v12383_v56, 16  ;;  %v3506_v56 = vld [vmem:[%s13542_s7 + $0x78] sm:$0xf] }
 0x1ce   : > { %v12421_v10 = vpop.permute.xlu1 %2690  ;;  %v12428_v28 = vpop.permute.xlu0 %2678  ;;  %v5712_v60 = vshll.u32 %v5608_v25, 16  ;;  %7930 = vperm.xlu0 %10111, %v7610_v41   ;;  %v13650_v8 = vrot.slane %v12124_v47, %v10875_v50  ;;  %v12454_v3 = vsel %vm1409_vm0, %v6708_v49, %v6712_v0  ;;  %v6714_v46 = vshrl.u32 %v8957_v42, 16  ;;  %9594 = vmatprep.subr.bf16.mxu1 %v10161_v34  ;;  %v7615_v16 = vld [vmem:[%s13543_s8 + $0x7c] sm:$0xf] }
 0x1cf   : > { %v12440_v32 = vcombine.low %v13649_v11, %v13648_v53  ;;  %13651 = vst [vmem:[#allocation38_spill] sm:$0xff] %v12454_v3  ;;  %v6718_v1 = vshll.u32 %v12419_v59, 16  ;;  %v6325_v52 = vrot.slane %v12160_v19, %v10875_v50  ;;  %v5710_v41 = vor.u32 %v5708_v13, %v5706_v14  ;;  %9595 = vmatpush3.bf16.msra.mxu1 %v10161_v34 }
 0x1d0   : > { %v12451_v23 = vcombine.low %v6289_v31, %v13650_v8  ;;  %v5714_v47 = vrot.slane %v5712_v60, 1  ;;  %v5548_v31 = vsel %vm1587_vm1, %v11980_v26, %v12079_v30  ;;  %9396 = vmatprep.subr.bf16.mxu0 %v10163_v33  ;;  %v6716_v42 = vor.u32 %v6714_v46, %v6712_v0  ;;  %3882 = vperm.xlu1 %10112, %v3507_v24   ;;  %v10165_v0 = vld [vmem:[#allocation6 + $0xa0] sm:$0xff]  }
 0x1d1   : > { %v12468_v5 = vrot.slane %v6718_v1, 1  ;;  %v5609_v53 = vmul.bf16 %v5548_v31, %v12443_v38  ;;  %v5716_v11 = vshrl.u32 %v5608_v25, 16  ;;  %9596 = vmatprep.subr.bf16.mxu1 %v12430_v6  ;;  %v6630_v14 = vshll.u32 %v12270_v17, 16  ;;  %v7613_v25 = vld [vmem:[%s13543_s8 + $0x74] sm:$0xf]  ;;  %9397 = vmatpush3.bf16.msra.mxu0 %v10163_v33  ;;  %v10195_v46 = vld [vmem:[#allocation2 + $0x20] sm:$0xff] }
 0x1d2   : > { %v12466_v49 = vpop.permute.xlu1 %2714  ;;  %v12473_v19 = vpop.permute.xlu0 %2702  ;;  %v6638_v26 = vshll.u32 %v12440_v32, 16  ;;  %v6313_v30 = vrot.slane %v12115_v54, %v10875_v50  ;;  %v5715_v34 = vsel %vm1409_vm0, %v5710_v41, %v5714_v47  ;;  %3870 = vperm.xlu0 %10111, %v3506_v56   ;;  %v5556_v8 = vsel %vm1587_vm1, %v12019_v51, %v12153_v7  ;;  %v7612_v54 = vld [vmem:[%s13543_s8 + $0x70] sm:$0xf]  ;;  %v12501_v31 = vld [vmem:[#allocation2 + $0x78] sm:$0xff]  ;;  %v10166_v7 = vld [vmem:[#allocation6 + $0xa8] sm:$0xff]   ;;  %9398 = vmatprep.subr.bf16.mxu0 %v10165_v0 }
 0x1d3   : > { %v12486_v13 = vsel %vm1409_vm0, %v6716_v42, %v12468_v5  ;;  %v5718_v60 = vor.u32 %v5716_v11, %v5714_v47  ;;  %v5720_v24 = vshll.u32 %v5609_v53, 16  ;;  %v12495_v1 = vmul.bf16 %v10195_v46, %v12237_v29  ;;  %9597 = vmatpush3.bf16.msra.mxu1 %v12430_v6 }
 0x1d4   : > { %13652 = vst [vmem:[#allocation37_spill] sm:$0xff] %v12486_v13  ;;  %v6634_v56 = vshrl.u32 %v12270_v17, 16  ;;  %v6646_v41 = vshll.u32 %v12451_v23, 16  ;;  %9371 = vmatmul.mubr.bf16.gmra.mrb[44].mxu0 %v12294_v62  ;;  %9567 = vmatmul.mubr.bf16.gmra.mrb[16].mxu1 %v5715_v34  ;;  %v5610_v47 = vmul.bf16 %v5556_v8, %v12471_v61  ;;  %v12507_v33 = vsel %vm1409_vm0, %v12250_v21, %v6624_v55  ;;  %v12516_v34 = vld [vmem:[#allocation6 + $0x1c0] sm:$0xff]  }
 0x1d5   : > { %v6628_v29 = vor.u32 %v6626_v15, %v6624_v55  ;;  %v12511_v17 = vcombine.low %v6313_v30, %v6325_v52  ;;  %9374 = vmatprep.mubr.bf16.mxu0 %v12310_v37  ;;  %v5722_v42 = vrot.slane %v5720_v24, 1  ;;  %7966 = vperm.xlu1 %10112, %v7613_v25   ;;  %v6632_v8 = vrot.slane %v6630_v14, 1 }
 0x1d6   : > { %v12503_v51 = vpop.permute.xlu1 %2738  ;;  %v12514_v11 = vpop.permute.xlu0 %2726  ;;  %v6640_v46 = vrot.slane %v6638_v26, 1  ;;  %v5728_v13 = vshll.u32 %v5610_v47, 16  ;;  %v5564_v21 = vsel %vm1587_vm1, %v12108_v18, %v12163_v27  ;;  %7954 = vperm.xlu0 %10111, %v7612_v54   ;;  %v2651_v15 = vrot.slane %v12365_v4, %v10875_v50  ;;  %v12530_v26 = vld [vmem:[#allocation2 + $0x80] sm:$0xff]  ;;  %v7614_v18 = vld [vmem:[%s13543_s8 + $0x78] sm:$0xf]  ;;  %9399 = vmatpush3.bf16.msra.mxu0 %v10165_v0 }
 0x1d7   : > { %v5723_v55 = vsel %vm1409_vm0, %v5718_v60, %v5722_v42  ;;  %v5724_v52 = vshrl.u32 %v5609_v53, 16  ;;  %v12528_v14 = vmul.bf16 %v5564_v21, %v12501_v31  ;;  %v6642_v27 = vshrl.u32 %v12440_v32, 16  ;;  %9400 = vmatprep.subr.bf16.mxu0 %v10166_v7  ;;  %9630 = vmatprep.subr.bf16.mxu1 %v12516_v34  ;;  %v10168_v32 = vld [vmem:[#allocation6 + $0xb0] sm:$0xff]  }
 0x1d8   : > { %v6648_v30 = vrot.slane %v6646_v41, 1  ;;  %9570 = vmatprep.mubr.bf16.mxu1 %v5723_v55  ;;  %v5730_v4 = vrot.slane %v5728_v13, 1  ;;  %v5732_v25 = vshrl.u32 %v5610_v47, 16  ;;  %v6654_v53 = vshll.u32 %v12511_v17, 16  ;;  %v13653_v55 = vld [vmem:[#allocation14_spill] sm:$0xff] }
 0x1d9   : > { %v5726_v24 = vor.u32 %v5724_v52, %v5722_v42  ;;  %v5736_v54 = vshll.u32 %v12528_v14, 16  ;;  %v5572_v21 = vsel %vm1587_vm1, %v12120_v20, %v12166_v40  ;;  %7990 = vperm.xlu1 %10112, %v7615_v16   ;;  %v6636_v0 = vor.u32 %v6634_v56, %v6632_v8  ;;  %v12555_v16 = vld [vmem:[#allocation2 + $0x88] sm:$0xff] }
 0x1da   : > { %v12537_v60 = vpop.permute.xlu1 %3522  ;;  %v12544_v6 = vpop.permute.xlu0 %3510  ;;  %v6644_v13 = vor.u32 %v6642_v27, %v6640_v46  ;;  %v5734_v41 = vor.u32 %v5732_v25, %v5730_v4  ;;  %v5612_v47 = vmul.bf16 %v5572_v21, %v12530_v26  ;;  %7978 = vperm.xlu0 %10111, %v7614_v18   ;;  %v6650_v42 = vshrl.u32 %v12451_v23, 16  ;;  %13655 = vst [vmem:[#allocation34_spill] sm:$0xff] %v12555_v16 }
 0x1db   : > { %v13654_v52 = vrot.slane %v13653_v55, %v10875_v50  ;;  %v5731_v20 = vsel %vm1409_vm0, %v5726_v24, %v5730_v4  ;;  %v5738_v40 = vrot.slane %v5736_v54, 1  ;;  %9401 = vmatpush3.bf16.msra.mxu0 %v10166_v7  ;;  %v12558_v56 = vsel %vm1409_vm0, %v6628_v29, %v6632_v8  ;;  %v10169_v4 = vld [vmem:[#allocation6 + $0xb8] sm:$0xff]   ;;  %v13656_v29 = vld [vmem:[#allocation44_spill] sm:$0xff] }
 0x1dc   : > { %v12561_v27 = vsel %vm1409_vm0, %v6636_v0, %v6640_v46  ;;  %v12564_v18 = vsel %vm1409_vm0, %v6644_v13, %v6648_v30  ;;  %9375 = vmatmul.mubr.bf16.gmra.mrb[48].mxu0 %v12328_v45  ;;  %9571 = vmatmul.mubr.bf16.gmra.mrb[20].mxu1 %v5731_v20  ;;  %v5744_v23 = vshll.u32 %v5612_v47, 16  ;;  %v6652_v25 = vor.u32 %v6650_v42, %v6648_v30  ;;  %v13657_v8 = vld [vmem:[#allocation41_spill] sm:$0xff]  ;;  %v4957_v13 = vld [vmem:[#allocation2 + $0x90] sm:$0x1] }
 0x1dd   : > { %v12552_v3 = vcombine.low %v13654_v52, %v2651_v15  ;;  %v6656_v24 = vrot.slane %v6654_v53, 1  ;;  %9378 = vmatprep.mubr.bf16.mxu0 %v12363_v44  ;;  %v5739_v7 = vsel %vm1409_vm0, %v5734_v41, %v5738_v40  ;;  %v5580_v46 = vsel %vm1587_vm1, %v13657_v8, %v13656_v29  ;;  %9402 = vmatprep.subr.bf16.mxu0 %v10168_v32 }
 0x1de   : > { %v12567_v15 = vpop.permute.xlu1 %3546  ;;  %v12574_v54 = vpop.permute.xlu0 %3534  ;;  %v2675_v21 = vrot.slane %v12394_v43, %v10875_v50  ;;  %v2663_v0 = vrot.slane %v12399_v48, %v10875_v50  ;;  %9574 = vmatprep.mubr.bf16.mxu1 %v5739_v7  ;;  %v5746_v30 = vrot.slane %v5744_v23, 1  ;;  %v5613_v53 = vmul.bf16 %v5580_v46, %v12555_v16 }
 0x1df   : > { %v6658_v41 = vshrl.u32 %v12511_v17, 16  ;;  %v2916_v42 = vshrl.u32 %v12552_v3, 16  ;;  %v5740_v55 = vshrl.u32 %v12528_v14, 16  ;;  %v5748_v52 = vshrl.u32 %v5612_v47, 16  ;;  %9403 = vmatpush3.bf16.msra.mxu0 %v10168_v32  ;;  %v13658_v47 = vld [vmem:[#allocation42_spill] sm:$0xff] }
 0x1e0   : > { %v2699_v20 = vrot.slane %v12421_v10, %v10875_v50  ;;  %v2687_v43 = vrot.slane %v12428_v28, %v10875_v50  ;;  %v2723_v48 = vrot.slane %v12466_v49, %v10875_v50  ;;  %v2711_v23 = vrot.slane %v12473_v19, %v10875_v50  ;;  %9404 = vmatprep.subr.bf16.mxu0 %v10169_v4  ;;  %v12597_v10 = vld [vmem:[#allocation6 + $0xc0] sm:$0xff]   ;;  %v6085_v19 = vld [vmem:[#allocation2 + $0x10] sm:$0x80] }
 0x1e1   : > { %v5742_v17 = vor.u32 %v5740_v55, %v5738_v40  ;;  %v5750_v29 = vor.u32 %v5748_v52, %v5746_v30  ;;  %v5752_v14 = vshll.u32 %v5613_v53, 16  ;;  %v5614_v32 = vmul.bf16 %v13658_v47, %v4957_v13  ;;  %v13659_v55 = vld [vmem:[#allocation43_spill] sm:$0xff] }
 0x1e2   : > { %v12592_v7 = vpop.permute.xlu1 %3570  ;;  %v12595_v8 = vpop.permute.xlu0 %3558  ;;  %v12600_v28 = vsel %vm1409_vm0, %v6652_v25, %v6656_v24  ;;  %v6660_v46 = vor.u32 %v6658_v41, %v6656_v24  ;;  %v6722_v49 = vshrl.u32 %v12419_v59, 16  ;;  %v12603_v16 = vcombine.low %v2663_v0, %v2675_v21 }
 0x1e3   : > { %v5747_v63 = vsel %vm1409_vm0, %v5742_v17, %v5746_v30  ;;  %v5754_v40 = vrot.slane %v5752_v14, 1  ;;  %v6742_v52 = vmul.bf16 %v13659_v55, %v6085_v19  ;;  %v6789_v13 = vshrl.u32 %v12495_v1, 16  ;;  %9405 = vmatpush3.bf16.msra.mxu0 %v10169_v4  ;;  %v13660_v4 = vld [vmem:[#allocation15_spill] sm:$0xff]  ;;  %v12635_v17 = vld [vmem:[#allocation2 + $0x10] sm:$0xff] }
 0x1e4   : > { %v12608_v47 = vrot.slane %v2916_v42, 7  ;;  %v6724_v35 = vor.u32 %v6722_v49, %v12468_v5  ;;  %v12611_v25 = vcombine.low %v2687_v43, %v2699_v20  ;;  %v12613_v24 = vcombine.low %v2711_v23, %v2723_v48  ;;  %9379 = vmatmul.mubr.bf16.gmra.mrb[52].mxu0 %v12397_v12  ;;  %9575 = vmatmul.mubr.bf16.gmra.mrb[24].mxu1 %v5747_v63 }
 0x1e5   : > { %9382 = vmatprep.mubr.bf16.mxu0 %v12443_v38  ;;  %v5755_v21 = vsel %vm1409_vm0, %v5750_v29, %v5754_v40  ;;  %v5756_v0 = vshrl.u32 %v5613_v53, 16  ;;  %v5760_v30 = vshll.u32 %v5614_v32, 16  ;;  %v6743_v41 = vmul.bf16 %v13660_v4, %v12133_v36  ;;  %9438 = vmatprep.subr.bf16.mxu0 %v12597_v10  ;;  %13661 = vst [vmem:[#allocation40_spill] sm:$0xff] %v12635_v17  ;;  %v13662_v29 = vld [vmem:[#allocation33_spill] sm:$0xff] }
 0x1e6   : > { %v12616_v59 = vpop.permute.xlu1 %3594  ;;  %v12622_v42 = vpop.permute.xlu0 %3582  ;;  %v2919_v5 = vshll.u32 %v12552_v3, 16  ;;  %v2924_v20 = vshrl.u32 %v12603_v16, 16  ;;  %v2747_v63 = vrot.slane %v12503_v51, %v10875_v50  ;;  %v2735_v43 = vrot.slane %v12514_v11, %v10875_v50  ;;  %9578 = vmatprep.mubr.bf16.mxu1 %v5755_v21 }
 0x1e7   : > { %v12633_v53 = vsel %vm1409_vm0, %v6660_v46, %v12274_v22  ;;  %v5758_v36 = vor.u32 %v5756_v0, %v5754_v40  ;;  %v6777_v48 = vshrl.u32 %v6742_v52, 16  ;;  %v6781_v23 = vshrl.u32 %v6743_v41, 16 }
 0x1e8   : > { %v12638_v3 = vor.u32 %v2919_v5, %v12608_v47  ;;  %v12641_v14 = vmul.bf16 %v13662_v29, %v6724_v35  ;;  %v2932_v51 = vshrl.u32 %v12611_v25, 16  ;;  %v12644_v32 = vrot.slane %v6789_v13, 7  ;;  %v13664_v35 = vld [vmem:[#allocation16_spill] sm:$0xff] }
 0x1e9   : > { %v2940_v49 = vshrl.u32 %v12613_v24, 16  ;;  %v5762_v22 = vrot.slane %v5760_v30, 1  ;;  %v6783_v46 = vrot.slane %v6781_v23, 7  ;;  %v6784_v19 = vshll.u32 %v6743_v41, 16 }
 0x1ea   : > { %13663 = vst [vmem:[#allocation35_spill] sm:$0xff] %v12641_v14  ;;  %v7631_v11 = vpop.permute.xlu1 %7630  ;;  %v7619_v40 = vpop.permute.xlu0 %7618  ;;  %v12647_v55 = vrot.slane %v2924_v20, 7  ;;  %v2927_v52 = vshll.u32 %v12603_v16, 16  ;;  %v12650_v21 = vcombine.low %v2735_v43, %v2747_v63  ;;  %v12654_v0 = vmul.bf16 %v13664_v35, %v12635_v17  ;;  %v12667_v63 = vld [vmem:[#allocation2 + $0x18] sm:$0xff] }
 0x1eb   : > { %v5763_v13 = vsel %vm1409_vm0, %v5758_v36, %v5762_v22  ;;  %v6779_v4 = vrot.slane %v6777_v48, 7  ;;  %v6786_v5 = vor.u32 %v6784_v19, %v6783_v46  ;;  %v6745_v30 = vmul.bf16 %v12507_v33, %v12211_v9  ;;  %v13667_v35 = vld [vmem:[#allocation17_spill] sm:$0xff] }
 0x1ec   : > { %v12659_v23 = vrot.slane %v2932_v51, 7  ;;  %v3531_v41 = vrot.slane %v12537_v60, %v10875_v50  ;;  %v3519_v16 = vrot.slane %v12544_v6, %v10875_v50  ;;  %9383 = vmatmul.mubr.bf16.gmra.mrb[56].mxu0 %v12471_v61  ;;  %9579 = vmatmul.mubr.bf16.gmra.mrb[28].mxu1 %v5763_v13  ;;  %v3014_v20 = vshll.u32 %v12654_v0, 16 }
 0x1ed   : > { %v2935_v36 = vshll.u32 %v12611_v25, 16  ;;  %v12670_v48 = vrot.slane %v2940_v49, 7  ;;  %9386 = vmatprep.mubr.bf16.mxu0 %v12501_v31  ;;  %v6787_v9 = vsel %vm1587_vm1, %v6779_v4, %v6786_v5  ;;  %v6792_v33 = vshll.u32 %v12495_v1, 16 }
 0x1ee   : > { %13665 = vst [vmem:[#allocation39_spill] sm:$0xff] %v12659_v23  ;;  %v7655_v43 = vpop.permute.xlu1 %7654  ;;  %v7643_v60 = vpop.permute.xlu0 %7642  ;;  %v12676_v6 = vor.u32 %v2927_v52, %v12647_v55  ;;  %v2943_v29 = vshll.u32 %v12613_v24, 16  ;;  %v2948_v51 = vshrl.u32 %v12650_v21, 16  ;;  %9598 = vmatprep.mubr.bf16.mxu1 %v6787_v9  ;;  %v6797_v22 = vshrl.u32 %v6745_v30, 16 }
 0x1ef   : > { %13666 = vst [vmem:[#allocation14_spill] sm:$0xff] %v12670_v48  ;;  %v6794_v25 = vor.u32 %v6792_v33, %v12644_v32  ;;  %v7639_v49 = vrot.slane %v7631_v11, %v10875_v50  ;;  %v7627_v19 = vrot.slane %v7619_v40, %v10875_v50  ;;  %v2974_v13 = vmul.bf16 %v12667_v63, %v13667_v35 }
 0x1f0   : > { %v12686_v1 = vor.u32 %v2935_v36, %v12659_v23  ;;  %v2951_v52 = vshll.u32 %v12650_v21, 16  ;;  %v12689_v4 = vcombine.low %v3519_v16, %v3531_v41  ;;  %v3016_v24 = vrot.slane %v3014_v20, 1  ;;  %v10170_v36 = vld [vmem:[#allocation6 + $0x1c8] sm:$0xff]   ;;  %v12705_v16 = vld [vmem:[#allocation2 + $0x20] sm:$0xff] }
 0x1f1   : > { %v12694_v9 = vor.u32 %v2943_v29, %v12670_v48  ;;  %v6799_v33 = vrot.slane %v6797_v22, 7  ;;  %v6800_v11 = vshll.u32 %v6745_v30, 16  ;;  %v12696_v17 = vcombine.low %v7627_v19, %v7639_v49  ;;  %13669 = vst [vmem:[#allocation41_spill] sm:$0xff] %v12705_v16  ;;  %v13670_v49 = vld [vmem:[#allocation18_spill] sm:$0xff] }
 0x1f2   : > { %v12691_v5 = vpop.permute.xlu1 %3618  ;;  %v12698_v40 = vpop.permute.xlu0 %3606  ;;  %v12700_v35 = vrot.slane %v2948_v51, 7  ;;  %v3022_v14 = vshll.u32 %v2974_v13, 16  ;;  %v6746_v21 = vmul.bf16 %v12558_v56, %v12222_v2  ;;  %v7663_v41 = vrot.slane %v7655_v43, %v10875_v50 }
 0x1f3   : > { %v3555_v20 = vrot.slane %v12567_v15, %v10875_v50  ;;  %v3543_v30 = vrot.slane %v12574_v54, %v10875_v50  ;;  %v6795_v29 = vsel %vm1587_vm1, %v6783_v46, %v6794_v25  ;;  %v6802_v22 = vor.u32 %v6800_v11, %v6799_v33  ;;  %v13671_v25 = vld [vmem:[#allocation25_spill] sm:$0xff] }
 0x1f4   : > { %13668 = vst [vmem:[#allocation44_spill] sm:$0xff] %v12700_v35  ;;  %v3973_v51 = vshll.u32 %v12689_v4, 16  ;;  %9387 = vmatmul.mubr.bf16.gmra.mrb[60].mxu0 %v12530_v26  ;;  %9599 = vmatmul.mubr.bf16.vlgmr.msra.gmra.mrb[0].mxu1 %v6795_v29  ;;  %v3017_v2 = vsel %vm1409_vm0, %v13670_v49, %v3016_v24  ;;  %v6805_v56 = vshrl.u32 %v6746_v21, 16  ;;  %v7651_v43 = vrot.slane %v7643_v60, %v10875_v50 }
 0x1f5   : > { %9631 = vmatpush3.bf16.msra.mxu1 %v12516_v34  ;;  %v3018_v15 = vshrl.u32 %v12654_v0, 16  ;;  %9406 = vmatprep.mubr.bf16.mxu0 %v3017_v2  ;;  %v6803_v54 = vsel %vm1587_vm1, %v12644_v32, %v6802_v22  ;;  %v3024_v46 = vrot.slane %v3022_v14, 1  ;;  %v2975_v11 = vmul.bf16 %v13671_v25, %v12705_v16  ;;  %v10171_v0 = vld [vmem:[#allocation6 + $0x1d0] sm:$0xff]   ;;  %v12731_v2 = vld [vmem:[#allocation2 + $0x88] sm:$0x1] }
 0x1f6   : > { %v12717_v19 = vpop.permute.xlu1 %7678  ;;  %v12725_v29 = vpop.permute.xlu0 %7666  ;;  %9602 = vmatprep.mubr.bf16.mxu1 %v6803_v54  ;;  %9632 = vmatprep.subr.bf16.mxu1 %v10170_v36  ;;  %v6807_v49 = vrot.slane %v6805_v56, 7  ;;  %v6808_v60 = vshll.u32 %v6746_v21, 16  ;;  %v12727_v48 = vcombine.low %v7651_v43, %v7663_v41  ;;  %v6747_v34 = vmul.bf16 %v12561_v27, %v12245_v39  ;;  %13672 = vst [vmem:[#allocation42_spill] sm:$0xff] %v12731_v2  ;;  %v12734_v25 = vld [vmem:[#allocation2 + $0x28] sm:$0xff]  ;;  %v10172_v2 = vld [vmem:[#allocation6 + $0x1d8] sm:$0xff]  }
 0x1f7   : > { %v3020_v14 = vor.u32 %v3018_v15, %v3016_v24  ;;  %v3026_v22 = vshrl.u32 %v2974_v13, 16  ;;  %v3030_v23 = vshll.u32 %v2975_v11, 16  ;;  %v12737_v54 = vor.u32 %v2951_v52, %v12700_v35 }
 0x1f8   : > { %v6810_v41 = vor.u32 %v6808_v60, %v6807_v49  ;;  %v6813_v56 = vshrl.u32 %v6747_v34, 16  ;;  %v12743_v39 = vcombine.low %v3543_v30, %v3555_v20  ;;  %v3579_v27 = vrot.slane %v12592_v7, %v10875_v50  ;;  %v13674_v60 = vld [vmem:[#allocation26_spill] sm:$0xff] }
 0x1f9   : > { %13673 = vst [vmem:[#allocation43_spill] sm:$0xff] %v12737_v54  ;;  %9633 = vmatpush3.bf16.msra.mxu1 %v10170_v36  ;;  %v3028_v13 = vor.u32 %v3026_v22, %v3024_v46  ;;  %v3032_v24 = vrot.slane %v3030_v23, 1  ;;  %v3567_v52 = vrot.slane %v12595_v8, %v10875_v50  ;;  %v6816_v16 = vshll.u32 %v6747_v34, 16  ;;  %v10176_v36 = vld [vmem:[#allocation6 + $0xc8] sm:$0xff]   ;;  %v10179_v54 = vld [vmem:[#allocation6 + $0xd8] sm:$0xff]  }
 0x1fa   : > { %v12741_v43 = vpop.permute.xlu1 %3642  ;;  %v12747_v15 = vpop.permute.xlu0 %3630  ;;  %v6815_v32 = vrot.slane %v6813_v56, 7  ;;  %9634 = vmatprep.subr.bf16.mxu1 %v10171_v0  ;;  %v2976_v21 = vmul.bf16 %v13674_v60, %v12734_v25  ;;  %v3025_v20 = vsel %vm1409_vm0, %v3020_v14, %v3024_v46  ;;  %v6811_v30 = vsel %vm1587_vm1, %v6799_v33, %v6810_v41  ;;  %v12760_v60 = vld [vmem:[#allocation2 + $0x30] sm:$0xff]  ;;  %v10173_v41 = vld [vmem:[#allocation6 + $0x1e0] sm:$0xff]  }
 0x1fb   : > { %v3033_v7 = vsel %vm1409_vm0, %v3028_v13, %v3032_v24  ;;  %v6748_v23 = vmul.bf16 %v12564_v18, %v12294_v62  ;;  %v3034_v22 = vshrl.u32 %v2975_v11, 16  ;;  %v7687_v56 = vrot.slane %v12717_v19, %v10875_v50  ;;  %13675 = vst [vmem:[#allocation15_spill] sm:$0xff] %v12760_v60 }
 0x1fc   : > { %9407 = vmatmul.mubr.bf16.vlgmr.msra.gmra.mrb[32].mxu0 %v3025_v20  ;;  %9603 = vmatmul.mubr.bf16.gmra.mrb[4].mxu1 %v6811_v30  ;;  %v6818_v8 = vor.u32 %v6816_v16, %v6815_v32  ;;  %v3038_v34 = vshll.u32 %v2976_v21, 16  ;;  %v12764_v46 = vrot.slane %v3973_v51, 1  ;;  %v3603_v33 = vrot.slane %v12616_v59, %v10875_v50  ;;  %v10178_v30 = vld [vmem:[#allocation6 + $0xd0] sm:$0xff]  }
 0x1fd   : > { %v3591_v62 = vrot.slane %v12622_v42, %v10875_v50  ;;  %9410 = vmatprep.mubr.bf16.mxu0 %v3033_v7  ;;  %v6821_v18 = vshrl.u32 %v6748_v23, 16  ;;  %9635 = vmatpush3.bf16.msra.mxu1 %v10171_v0  ;;  %v3980_v11 = vshll.u32 %v12743_v39, 16  ;;  %v3036_v14 = vor.u32 %v3034_v22, %v3032_v24  ;;  %v13677_v0 = vld [vmem:[#allocation28_spill] sm:$0xff] }
 0x1fe   : > { %v12762_v35 = vpop.permute.xlu1 %7702  ;;  %13676 = vst [vmem:[#allocation33_spill] sm:$0xff] %v12764_v46  ;;  %v12770_v16 = vpop.permute.xlu0 %7690  ;;  %v6819_v19 = vsel %vm1587_vm1, %v6807_v49, %v6818_v8  ;;  %v7675_v51 = vrot.slane %v12725_v29, %v10875_v50  ;;  %9636 = vmatprep.subr.bf16.mxu1 %v10172_v2  ;;  %9439 = vmatpush3.bf16.msra.mxu0 %v12597_v10  ;;  %v3040_v59 = vrot.slane %v3038_v34, 1  ;;  %v6824_v13 = vshll.u32 %v6748_v23, 16  ;;  %v12784_v8 = vld [vmem:[#allocation2 + $0x38] sm:$0xff] }
 0x1ff   : > { %9606 = vmatprep.mubr.bf16.mxu1 %v6819_v19  ;;  %v6823_v42 = vrot.slane %v6821_v18, 7  ;;  %v2977_v20 = vmul.bf16 %v13677_v0, %v12760_v60  ;;  %9440 = vmatprep.subr.bf16.mxu0 %v10176_v36  ;;  %v12780_v49 = vcombine.low %v3567_v52, %v3579_v27  ;;  %v6749_v29 = vmul.bf16 %v12600_v28, %v12310_v37  ;;  %v10174_v37 = vld [vmem:[#allocation6 + $0x1e8] sm:$0xff]  }
 0x200   : > { %v8977_v24 = vcombine.low %v7675_v51, %v7687_v56  ;;  %13678 = vst [vmem:[#allocation16_spill] sm:$0xff] %v12784_v8  ;;  %v12788_v22 = vcombine.low %v3591_v62, %v3603_v33  ;;  %v8088_v23 = vshrl.u32 %v12727_v48, 16  ;;  %v3042_v18 = vshrl.u32 %v2976_v21, 16  ;;  %v13679_v62 = vld [vmem:[#allocation29_spill] sm:$0xff] }
 0x201   : > { %v6826_v34 = vor.u32 %v6824_v13, %v6823_v42  ;;  %9637 = vmatpush3.bf16.msra.mxu1 %v10172_v2  ;;  %v3041_v27 = vsel %vm1409_vm0, %v3036_v14, %v3040_v59  ;;  %v3046_v56 = vshll.u32 %v2977_v20, 16  ;;  %v6829_v51 = vshrl.u32 %v6749_v29, 16 }
 0x202   : > { %v12786_v10 = vpop.permute.xlu1 %3666  ;;  %v12791_v19 = vpop.permute.xlu0 %3654  ;;  %v8096_v52 = vshrl.u32 %v8977_v24, 16  ;;  %9638 = vmatprep.subr.bf16.mxu1 %v10173_v41  ;;  %9441 = vmatpush3.bf16.msra.mxu0 %v10176_v36  ;;  %v8099_v0 = vshll.u32 %v8977_v24, 16  ;;  %v3044_v33 = vor.u32 %v3042_v18, %v3040_v59  ;;  %v12797_v7 = vmul.bf16 %v13679_v62, %v12784_v8 }
 0x203   : > { %v6827_v28 = vsel %vm1587_vm1, %v6815_v32, %v6826_v34  ;;  %9442 = vmatprep.subr.bf16.mxu0 %v10178_v30  ;;  %v3048_v21 = vrot.slane %v3046_v56, 1  ;;  %v6831_v14 = vrot.slane %v6829_v51, 7  ;;  %v6832_v13 = vshll.u32 %v6749_v29, 16  ;;  %v12814_v56 = vld [vmem:[#allocation2 + $0x8] sm:$0x80] }
 0x204   : > { %9411 = vmatmul.mubr.bf16.gmra.mrb[36].mxu0 %v3041_v27  ;;  %9607 = vmatmul.mubr.bf16.gmra.mrb[8].mxu1 %v6827_v28  ;;  %v12799_v2 = vrot.slane %v8096_v52, 7  ;;  %v12803_v36 = vrot.slane %v8088_v23, 7  ;;  %v3050_v32 = vshrl.u32 %v2977_v20, 16  ;;  %v3054_v59 = vshll.u32 %v12797_v7, 16  ;;  %v10177_v23 = vld [vmem:[#allocation6 + $0x1f0] sm:$0xff]   ;;  %13681 = vst [vmem:[#allocation18_spill] sm:$0xff] %v12814_v56 }
 0x205   : > { %v6750_v24 = vmul.bf16 %v12633_v53, %v12328_v45  ;;  %9639 = vmatpush3.bf16.msra.mxu1 %v10173_v41  ;;  %v3049_v27 = vsel %vm1409_vm0, %v3044_v33, %v3048_v21  ;;  %v6834_v52 = vor.u32 %v6832_v13, %v6831_v14  ;;  %v7711_v29 = vrot.slane %v12762_v35, %v10875_v50  ;;  %v12819_v28 = vld [vmem:[#allocation2 + $0x40] sm:$0xff] }
 0x206   : > { %13680 = vst [vmem:[#allocation17_spill] sm:$0xff] %v12799_v2  ;;  %v12801_v60 = vpop.permute.xlu1 %7726  ;;  %v12808_v34 = vpop.permute.xlu0 %7714  ;;  %v8101_v18 = vor.u32 %v8099_v0, %v12799_v2  ;;  %9640 = vmatprep.subr.bf16.mxu1 %v10174_v37  ;;  %v13682_v20 = vshrl.u32 %v12689_v4, 16  ;;  %v3982_v45 = vrot.slane %v3980_v11, 1  ;;  %9414 = vmatprep.mubr.bf16.mxu0 %v3049_v27  ;;  %v3052_v53 = vor.u32 %v3050_v32, %v3048_v21  ;;  %v10181_v11 = vld [vmem:[#allocation6 + $0xe0] sm:$0xff]  }
 0x207   : > { %v6837_v41 = vshrl.u32 %v6750_v24, 16  ;;  %13683 = vst [vmem:[#allocation25_spill] sm:$0xff] %v12819_v28  ;;  %9443 = vmatpush3.bf16.msra.mxu0 %v10178_v30  ;;  %v3988_v0 = vshll.u32 %v12780_v49, 16  ;;  %v6835_v33 = vsel %vm1587_vm1, %v6823_v42, %v6834_v52  ;;  %v7699_v62 = vrot.slane %v12770_v16, %v10875_v50  ;;  %v13684_v16 = vld [vmem:[#allocation31_spill] sm:$0xff]  ;;  %v12866_v56 = vld [vmem:[#allocation6 + $0x200] sm:$0xff]  }
 0x208   : > { %v3978_v51 = vor.u32 %v13682_v20, %v12764_v46  ;;  %v12824_v35 = vsel %vm1587_vm1, %v12803_v36, %v8101_v18  ;;  %9444 = vmatprep.subr.bf16.mxu0 %v10179_v54  ;;  %v3996_v21 = vshll.u32 %v12788_v22, 16  ;;  %9610 = vmatprep.mubr.bf16.mxu1 %v6835_v33  ;;  %v3056_v13 = vrot.slane %v3054_v59, 1  ;;  %v13685_v20 = vld [vmem:[#allocation30_spill] sm:$0xff]  ;;  %v10180_v33 = vld [vmem:[#allocation6 + $0x1f8] sm:$0xff]  }
 0x209   : > { %v12832_v30 = vrot.slane %v6837_v41, 7  ;;  %v6840_v32 = vshll.u32 %v6750_v24, 16  ;;  %9641 = vmatpush3.bf16.msra.mxu1 %v10174_v37  ;;  %v12838_v18 = vcombine.low %v7699_v62, %v7711_v29  ;;  %v2979_v52 = vmul.bf16 %v13684_v16, %v12819_v28 }
 0x20a   : > { %v12829_v4 = vpop.permute.xlu1 %3690  ;;  %v12834_v27 = vpop.permute.xlu0 %3678  ;;  %v6751_v2 = vmul.bf16 %v13685_v20, %v12363_v44  ;;  %9642 = vmatprep.subr.bf16.mxu1 %v10177_v23  ;;  %v12845_v59 = vsel %vm1409_vm0, %v3978_v51, %v3982_v45  ;;  %v13686_v24 = vshrl.u32 %v12743_v39, 16  ;;  %v3057_v37 = vsel %vm1409_vm0, %v3052_v53, %v3056_v13  ;;  %v12853_v20 = vld [vmem:[#allocation2 + $0x48] sm:$0xff] }
 0x20b   : > { %v6842_v42 = vor.u32 %v6840_v32, %v12832_v30  ;;  %9445 = vmatpush3.bf16.msra.mxu0 %v10179_v54  ;;  %v3990_v29 = vrot.slane %v3988_v0, 1  ;;  %v3992_v62 = vshrl.u32 %v12780_v49, 16  ;;  %v3058_v16 = vshrl.u32 %v12797_v7, 16  ;;  %v10182_v51 = vld [vmem:[#allocation6 + $0xe8] sm:$0xff]  }
 0x20c   : > { %v3986_v41 = vor.u32 %v13686_v24, %v3982_v45  ;;  %9415 = vmatmul.mubr.bf16.gmra.mrb[40].mxu0 %v3057_v37  ;;  %v3062_v44 = vshll.u32 %v2979_v52, 16  ;;  %9446 = vmatprep.subr.bf16.mxu0 %v10181_v11  ;;  %v12857_v39 = vrot.slane %v3996_v21, 1  ;;  %v6845_v54 = vshrl.u32 %v6751_v2, 16  ;;  %v13687_v24 = vld [vmem:[#allocation23_spill] sm:$0xff] }
 0x20d   : > { %v6843_v53 = vsel %vm1587_vm1, %v6831_v14, %v6842_v42  ;;  %9643 = vmatpush3.bf16.msra.mxu1 %v10177_v23  ;;  %v3060_v49 = vor.u32 %v3058_v16, %v3056_v13  ;;  %v6848_v32 = vshll.u32 %v6751_v2, 16  ;;  %v13688_v37 = vld [vmem:[#allocation19_spill] sm:$0xff]  ;;  %v3066_v46 = vshrl.u32 %v2979_v52, 16  ;;  %v12876_v16 = vld [vmem:[#allocation2 + $0x50] sm:$0xff] }
 0x20e   : > { %v12855_v28 = vpop.permute.xlu1 %7750  ;;  %v12861_v0 = vpop.permute.xlu0 %7738  ;;  %9611 = vmatmul.mubr.bf16.gmra.mrb[12].mxu1 %v6843_v53  ;;  %v3064_v7 = vrot.slane %v3062_v44, 1  ;;  %v2898_v8 = vsel %vm1587_vm1, %v13688_v37, %v13687_v24  ;;  %9644 = vmatprep.subr.bf16.mxu1 %v10180_v33  ;;  %v6847_v21 = vrot.slane %v6845_v54, 7  ;;  %v6752_v14 = vmul.bf16 %v12351_v58, %v12397_v12  ;;  %v13689_v54 = vld [vmem:[#allocation24_spill] sm:$0xff] }
 0x20f   : > { %v2980_v45 = vmul.bf16 %v2898_v8, %v12853_v20  ;;  %9447 = vmatpush3.bf16.msra.mxu0 %v10181_v11  ;;  %v3991_v23 = vsel %vm1409_vm0, %v3986_v41, %v3990_v29  ;;  %v8081_v13 = vshrl.u32 %v12696_v17, 16  ;;  %v7735_v42 = vrot.slane %v12801_v60, %v10875_v50  ;;  %v10184_v8 = vld [vmem:[#allocation6 + $0xf0] sm:$0xff]  }
 0x210   : > { %v3065_v2 = vsel %vm1409_vm0, %v3060_v49, %v3064_v7  ;;  %9448 = vmatprep.subr.bf16.mxu0 %v10182_v51  ;;  %v3627_v52 = vrot.slane %v12691_v5, %v10875_v50  ;;  %v6850_v58 = vor.u32 %v6848_v32, %v6847_v21  ;;  %v3068_v12 = vor.u32 %v3066_v46, %v3064_v7  ;;  %v13690_v49 = vld [vmem:[#allocation20_spill] sm:$0xff] }
 0x211   : > { %9418 = vmatprep.mubr.bf16.mxu0 %v3065_v2  ;;  %v3070_v11 = vshll.u32 %v2980_v45, 16  ;;  %9645 = vmatpush3.bf16.msra.mxu1 %v10180_v33  ;;  %v3615_v41 = vrot.slane %v12698_v40, %v10875_v50  ;;  %v6853_v53 = vshrl.u32 %v6752_v14, 16  ;;  %v7723_v60 = vrot.slane %v12808_v34, %v10875_v50 }
 0x212   : > { %v12878_v44 = vpop.permute.xlu1 %3714  ;;  %v2906_v24 = vsel %vm1587_vm1, %v13690_v49, %v13689_v54  ;;  %v12889_v37 = vpop.permute.xlu0 %3702  ;;  %9678 = vmatprep.subr.bf16.mxu1 %v12866_v56  ;;  %v3994_v5 = vor.u32 %v3992_v62, %v3990_v29  ;;  %v6851_v46 = vsel %vm1587_vm1, %v12832_v30, %v6850_v58  ;;  %v6856_v32 = vshll.u32 %v6752_v14, 16  ;;  %v10185_v49 = vld [vmem:[#allocation6 + $0xf8] sm:$0xff]  }
 0x213   : > { %v3072_v33 = vrot.slane %v3070_v11, 1  ;;  %v2981_v7 = vmul.bf16 %v2906_v24, %v12876_v16  ;;  %9449 = vmatpush3.bf16.msra.mxu0 %v10182_v51  ;;  %9614 = vmatprep.mubr.bf16.mxu1 %v6851_v46  ;;  %v6855_v40 = vrot.slane %v6853_v53, 7  ;;  %v12895_v34 = vcombine.low %v7723_v60, %v7735_v42  ;;  %v10196_v29 = vld [vmem:[#allocation2 + $0x18] sm:$0xff] }
 0x214   : > { %v6753_v2 = vmul.bf16 %v12359_v57, %v12443_v38  ;;  %9450 = vmatprep.subr.bf16.mxu0 %v10184_v8  ;;  %v12901_v62 = vmul.bf16 %v10196_v29, %v3991_v23  ;;  %v3074_v58 = vshrl.u32 %v2980_v45, 16  ;;  %v12904_v51 = vrot.slane %v8081_v13, 7  ;;  %v12909_v57 = vld [vmem:[#allocation2 + $0x58] sm:$0xff] }
 0x215   : > { %v3073_v30 = vsel %vm1409_vm0, %v3068_v12, %v3072_v33  ;;  %v3078_v11 = vshll.u32 %v2981_v7, 16  ;;  %v8084_v14 = vshll.u32 %v12696_v17, 16  ;;  %v12907_v42 = vcombine.low %v3615_v41, %v3627_v52  ;;  %v13692_v52 = vld [vmem:[#allocation27_spill] sm:$0xff]  ;;  %v13693_v41 = vld [vmem:[#allocation21_spill] sm:$0xff] }
 0x216   : > { %v12899_v54 = vpop.permute.xlu1 %7774  ;;  %13691 = vst [vmem:[#allocation26_spill] sm:$0xff] %v12904_v51  ;;  %9419 = vmatmul.mubr.bf16.gmra.mrb[44].mxu0 %v3073_v30  ;;  %v6858_v53 = vor.u32 %v6856_v32, %v6855_v40  ;;  %v12911_v38 = vpop.permute.xlu0 %7762  ;;  %v3651_v23 = vrot.slane %v12741_v43, %v10875_v50  ;;  %v3076_v60 = vor.u32 %v3074_v58, %v3072_v33  ;;  %v6861_v12 = vshrl.u32 %v6753_v2, 16 }
 0x217   : > { %v3080_v24 = vrot.slane %v3078_v11, 1  ;;  %9451 = vmatpush3.bf16.msra.mxu0 %v10184_v8  ;;  %v3639_v45 = vrot.slane %v12747_v15, %v10875_v50  ;;  %v6864_v13 = vshll.u32 %v6753_v2, 16  ;;  %v2914_v46 = vsel %vm1587_vm1, %v13693_v41, %v13692_v52  ;;  %v13695_v2 = vld [vmem:[#allocation36_spill] sm:$0xff] }
 0x218   : > { %v6859_v17 = vsel %vm1587_vm1, %v6847_v21, %v6858_v53  ;;  %9452 = vmatprep.subr.bf16.mxu0 %v10185_v49  ;;  %v6863_v33 = vrot.slane %v6861_v12, 7  ;;  %v2982_v29 = vmul.bf16 %v2914_v46, %v12909_v57  ;;  %v3082_v8 = vshrl.u32 %v2981_v7, 16  ;;  %v12949_v46 = vld [vmem:[#allocation2 + $0x60] sm:$0xff] }
 0x219   : > { %9615 = vmatmul.mubr.bf16.gmra.mrb[16].mxu1 %v6859_v17  ;;  %v3081_v43 = vsel %vm1409_vm0, %v3076_v60, %v3080_v24  ;;  %v13694_v15 = vshrl.u32 %v12788_v22, 16  ;;  %v8086_v21 = vor.u32 %v8084_v14, %v12904_v51  ;;  %v6754_v58 = vmul.bf16 %v13695_v2, %v12471_v61  ;;  %v13697_v2 = vld [vmem:[#allocation32_spill] sm:$0xff] }
 0x21a   : > { %v12921_v32 = vpop.permute.xlu1 %3738  ;;  %9422 = vmatprep.mubr.bf16.mxu0 %v3081_v43  ;;  %v7759_v11 = vrot.slane %v12855_v28, %v10875_v50  ;;  %v12933_v53 = vpop.permute.xlu0 %3726  ;;  %v6866_v60 = vor.u32 %v6864_v13, %v6863_v33  ;;  %v3084_v12 = vor.u32 %v3082_v8, %v3080_v24  ;;  %v3086_v17 = vshll.u32 %v2982_v29, 16 }
 0x21b   : > { %v4002_v30 = vor.u32 %v13694_v15, %v12857_v39  ;;  %v7747_v7 = vrot.slane %v12861_v0, %v10875_v50  ;;  %9453 = vmatpush3.bf16.msra.mxu0 %v10185_v49  ;;  %v12939_v22 = vsel %vm1409_vm0, %v3994_v5, %v12857_v39  ;;  %v4004_v14 = vshll.u32 %v12907_v42, 16  ;;  %v13696_v0 = vld [vmem:[#allocation22_spill] sm:$0xff] }
 0x21c   : > { %v12942_v52 = vcombine.low %v3639_v45, %v3651_v23  ;;  %v6869_v61 = vshrl.u32 %v6754_v58, 16  ;;  %v6867_v28 = vsel %vm1587_vm1, %v6855_v40, %v6866_v60  ;;  %v3088_v13 = vrot.slane %v3086_v17, 1  ;;  %v13003_v40 = vld [vmem:[#allocation2 + $0x70] sm:$0xff] }
 0x21d   : > { %v12947_v24 = vcombine.low %v7747_v7, %v7759_v11  ;;  %v2922_v49 = vsel %vm1587_vm1, %v13696_v0, %v12638_v3  ;;  %v8091_v39 = vshll.u32 %v12727_v48, 16  ;;  %9618 = vmatprep.mubr.bf16.mxu1 %v6867_v28  ;;  %v6872_v23 = vshll.u32 %v6754_v58, 16 }
 0x21e   : > { %v12944_v41 = vpop.permute.xlu1 %7798  ;;  %v6871_v5 = vrot.slane %v6869_v61, 7  ;;  %v2983_v45 = vmul.bf16 %v2922_v49, %v12949_v46  ;;  %v12960_v8 = vmul.bf16 %v8086_v21, %v12667_v63  ;;  %v3089_v15 = vsel %vm1409_vm0, %v3084_v12, %v3088_v13 }
 0x21f   : > { %v12956_v43 = vpop.permute.xlu0 %7786  ;;  %v6755_v11 = vmul.bf16 %v13697_v2, %v12501_v31  ;;  %v12966_v3 = vor.u32 %v8091_v39, %v12803_v36  ;;  %v4008_v48 = vshrl.u32 %v12907_v42, 16  ;;  %9423 = vmatmul.mubr.bf16.gmra.mrb[48].mxu0 %v3089_v15  ;;  %v3090_v60 = vshrl.u32 %v2982_v29, 16  ;;  %v12975_v36 = vld [vmem:[#allocation2 + $0x68] sm:$0xff] }
 0x220   : > { %v6874_v58 = vor.u32 %v6872_v23, %v6871_v5  ;;  %v4006_v7 = vrot.slane %v4004_v14, 1  ;;  %v4012_v61 = vshll.u32 %v12942_v52, 16  ;;  %v3094_v21 = vshll.u32 %v2983_v45, 16 }
 0x221   : > { %13698 = vst [vmem:[#allocation28_spill] sm:$0xff] %v12966_v3  ;;  %v6877_v28 = vshrl.u32 %v6755_v11, 16  ;;  %v3675_v12 = vrot.slane %v12786_v10, %v10875_v50  ;;  %v3092_v0 = vor.u32 %v3090_v60, %v3088_v13  ;;  %v2930_v42 = vsel %vm1587_vm1, %v12608_v47, %v12676_v6 }
 0x222   : > { %v12969_v17 = vpop.permute.xlu1 %3762  ;;  %v6875_v31 = vsel %vm1587_vm1, %v6863_v33, %v6874_v58  ;;  %v3096_v14 = vrot.slane %v3094_v21, 1  ;;  %v6880_v39 = vshll.u32 %v6755_v11, 16  ;;  %v2984_v23 = vmul.bf16 %v2930_v42, %v12975_v36  ;;  %v13699_v33 = vld [vmem:[#allocation38_spill] sm:$0xff] }
 0x223   : > { %v12980_v29 = vpop.permute.xlu0 %3750  ;;  %9619 = vmatmul.mubr.bf16.gmra.mrb[20].mxu1 %v6875_v31  ;;  %v6879_v49 = vrot.slane %v6877_v28, 7  ;;  %v3663_v10 = vrot.slane %v12791_v19, %v10875_v50  ;;  %v3098_v15 = vshrl.u32 %v2983_v45, 16  ;;  %v6756_v13 = vmul.bf16 %v13699_v33, %v12530_v26 }
 0x224   : > { %v7783_v2 = vrot.slane %v12899_v54, %v10875_v50  ;;  %v3097_v47 = vsel %vm1409_vm0, %v3092_v0, %v3096_v14  ;;  %v3102_v58 = vshll.u32 %v2984_v23, 16  ;;  %v7771_v60 = vrot.slane %v12911_v38, %v10875_v50 }
 0x225   : > { %v6882_v6 = vor.u32 %v6880_v39, %v6879_v49  ;;  %v12995_v21 = vsel %vm1409_vm0, %v4002_v30, %v4006_v7  ;;  %v4010_v19 = vor.u32 %v4008_v48, %v4006_v7  ;;  %v4014_v45 = vrot.slane %v4012_v61, 1  ;;  %9426 = vmatprep.mubr.bf16.mxu0 %v3097_v47  ;;  %v13702_v47 = vld [vmem:[#allocation37_spill] sm:$0xff] }
 0x226   : > { %v12992_v11 = vpop.permute.xlu1 %7822  ;;  %v6885_v28 = vshrl.u32 %v6756_v13, 16  ;;  %v3100_v31 = vor.u32 %v3098_v15, %v3096_v14  ;;  %v3104_v0 = vrot.slane %v3102_v58, 1  ;;  %v13000_v42 = vcombine.low %v7771_v60, %v7783_v2  ;;  %v13701_v2 = vld [vmem:[#allocation34_spill] sm:$0xff] }
 0x227   : > { %v12997_v26 = vpop.permute.xlu0 %7810  ;;  %v6883_v54 = vsel %vm1587_vm1, %v6871_v5, %v6882_v6  ;;  %v4016_v39 = vshrl.u32 %v12942_v52, 16  ;;  %v6888_v33 = vshll.u32 %v6756_v13, 16  ;;  %v2938_v30 = vsel %vm1587_vm1, %v12647_v55, %v12686_v1 }
 0x228   : > { %9622 = vmatprep.mubr.bf16.mxu1 %v6883_v54  ;;  %v6887_v38 = vrot.slane %v6885_v28, 7  ;;  %v13010_v48 = vmul.bf16 %v12824_v35, %v12734_v25  ;;  %v13012_v5 = vcombine.low %v3663_v10, %v3675_v12  ;;  %v3105_v7 = vsel %vm1409_vm0, %v3100_v31, %v3104_v0  ;;  %v13038_v31 = vld [vmem:[#allocation2 + $0x78] sm:$0xff] }
 0x229   : > { %v2985_v61 = vmul.bf16 %v2938_v30, %v13003_v40  ;;  %v13019_v14 = vsel %vm1409_vm0, %v4010_v19, %v4014_v45  ;;  %v3699_v15 = vrot.slane %v12829_v4, %v10875_v50  ;;  %v3687_v55 = vrot.slane %v12834_v27, %v10875_v50  ;;  %9427 = vmatmul.mubr.bf16.gmra.mrb[52].mxu0 %v3105_v7  ;;  %v13703_v19 = vld [vmem:[#allocation39_spill] sm:$0xff] }
 0x22a   : > { %13700 = vst [vmem:[#allocation29_spill] sm:$0xff] %v13010_v48  ;;  %v13016_v52 = vpop.permute.xlu1 %3786  ;;  %v6890_v1 = vor.u32 %v6888_v33, %v6887_v38  ;;  %v13027_v12 = vor.u32 %v4016_v39, %v4014_v45  ;;  %v3106_v10 = vshrl.u32 %v2984_v23, 16  ;;  %v6757_v6 = vmul.bf16 %v13702_v47, %v13701_v2 }
 0x22b   : > { %v13025_v35 = vpop.permute.xlu0 %3774  ;;  %v3110_v13 = vshll.u32 %v2985_v61, 16  ;;  %v8104_v58 = vshrl.u32 %v12838_v18, 16  ;;  %v8107_v60 = vshll.u32 %v12838_v18, 16  ;;  %v2946_v27 = vsel %vm1587_vm1, %v13703_v19, %v12694_v9 }
 0x22c   : > { %v6891_v4 = vsel %vm1587_vm1, %v6879_v49, %v6890_v1  ;;  %v4020_v28 = vshll.u32 %v13012_v5, 16  ;;  %v3108_v45 = vor.u32 %v3106_v10, %v3104_v0  ;;  %v6893_v23 = vshrl.u32 %v6757_v6, 16  ;;  %v13704_v49 = vld [vmem:[#allocation35_spill] sm:$0xff] }
 0x22d   : > { %9623 = vmatmul.mubr.bf16.gmra.mrb[24].mxu1 %v6891_v4  ;;  %v3112_v54 = vrot.slane %v3110_v13, 1  ;;  %v13040_v39 = vcombine.low %v3687_v55, %v3699_v15  ;;  %v3723_v33 = vrot.slane %v12878_v44, %v10875_v50  ;;  %v2986_v18 = vmul.bf16 %v2946_v27, %v13038_v31  ;;  %v13058_v27 = vld [vmem:[#allocation2 + $0x80] sm:$0xff] }
 0x22e   : > { %v6901_v30 = vshrl.u32 %v13704_v49, 16  ;;  %v13046_v7 = vpop.permute.xlu1 %7846  ;;  %v6895_v1 = vrot.slane %v6893_v23, 7  ;;  %v6896_v2 = vshll.u32 %v6757_v6, 16  ;;  %v7807_v0 = vrot.slane %v12944_v41, %v10875_v50  ;;  %v13705_v6 = vld [vmem:[#allocation43_spill] sm:$0xff] }
 0x22f   : > { %v3113_v9 = vsel %vm1409_vm0, %v3108_v45, %v3112_v54  ;;  %v13051_v10 = vpop.permute.xlu0 %7834  ;;  %v3114_v15 = vshrl.u32 %v2985_v61, 16  ;;  %v3118_v55 = vshll.u32 %v2986_v18, 16  ;;  %v6904_v44 = vshll.u32 %v13704_v49, 16  ;;  %v13706_v45 = vld [vmem:[#allocation14_spill] sm:$0xff] }
 0x230   : > { %9430 = vmatprep.mubr.bf16.mxu0 %v3113_v9  ;;  %v6903_v13 = vrot.slane %v6901_v30, 7  ;;  %v3711_v47 = vrot.slane %v12889_v37, %v10875_v50  ;;  %v6898_v4 = vor.u32 %v6896_v2, %v6895_v1  ;;  %v7795_v19 = vrot.slane %v12956_v43, %v10875_v50 }
 0x231   : > { %v2954_v41 = vsel %vm1587_vm1, %v13706_v45, %v13705_v6  ;;  %v3116_v23 = vor.u32 %v3114_v15, %v3112_v54  ;;  %v3120_v9 = vrot.slane %v3118_v55, 1  ;;  %v13066_v49 = vrot.slane %v8104_v58, 7 }
 0x232   : > { %v6906_v61 = vor.u32 %v6904_v44, %v6903_v13  ;;  %v2987_v30 = vmul.bf16 %v2954_v41, %v13058_v27  ;;  %v13064_v48 = vpop.permute.xlu1 %3810  ;;  %v4024_v37 = vshrl.u32 %v13012_v5, 16  ;;  %v6899_v2 = vsel %vm1587_vm1, %v6887_v38, %v6898_v4  ;;  %v13708_v4 = vld [vmem:[#allocation42_spill] sm:$0xff] }
 0x233   : > { %v13070_v43 = vcombine.low %v7795_v19, %v7807_v0  ;;  %v4022_v51 = vrot.slane %v4020_v28, 1  ;;  %9626 = vmatprep.mubr.bf16.mxu1 %v6899_v2  ;;  %v3121_v3 = vsel %vm1409_vm0, %v3116_v23, %v3120_v9  ;;  %v3122_v15 = vshrl.u32 %v2986_v18, 16  ;;  %v13707_v0 = vld [vmem:[#allocation44_spill] sm:$0xff] }
 0x234   : > { %v6907_v54 = vsel %vm1587_vm1, %v6895_v1, %v6906_v61  ;;  %v8112_v55 = vshrl.u32 %v12895_v34, 16  ;;  %v4028_v13 = vshll.u32 %v13040_v39, 16  ;;  %v8120_v58 = vshrl.u32 %v12947_v24, 16  ;;  %9431 = vmatmul.mubr.bf16.gmra.mrb[56].mxu0 %v3121_v3  ;;  %v13710_v23 = vld [vmem:[#allocation40_spill] sm:$0xff] }
 0x235   : > { %9627 = vmatmul.mubr.bf16.gmra.mrb[28].mxu1 %v6907_v54  ;;  %v3126_v5 = vshll.u32 %v2987_v30, 16  ;;  %v13077_v44 = vpop.permute.xlu0 %3798  ;;  %v13079_v38 = vcombine.low %v3711_v47, %v3723_v33  ;;  %v3124_v28 = vor.u32 %v3122_v15, %v3120_v9  ;;  %v13709_v1 = vmul.bf16 %v13707_v0, %v13708_v4  ;;  %v13712_v15 = vld [vmem:[#allocation18_spill] sm:$0xff] }
 0x236   : > { %9646 = vmatprep.mubr.bf16.mxu1 %v12667_v63  ;;  %v7831_v19 = vrot.slane %v12992_v11, %v10875_v50  ;;  %v13087_v6 = vpop.permute.xlu1 %7870  ;;  %v3130_v3 = vshrl.u32 %v2987_v30, 16  ;;  %v7819_v41 = vrot.slane %v12997_v26, %v10875_v50  ;;  %v4117_v33 = vmul.bf16 %v12845_v59, %v13710_v23 }
 0x237   : > { %v3134_v18 = vshll.u32 %v13709_v1, 16  ;;  %v3128_v45 = vrot.slane %v3126_v5, 1  ;;  %v13094_v47 = vor.u32 %v8107_v60, %v13066_v49  ;;  %v13098_v63 = vsel %vm1409_vm0, %v13027_v12, %v4022_v51  ;;  %v13711_v12 = vld [vmem:[#allocation33_spill] sm:$0xff]  ;;  %v10186_v1 = vld [vmem:[#allocation6 + $0x208] sm:$0xff]  }
 0x238   : > { %v3747_v11 = vrot.slane %v12921_v32, %v10875_v50  ;;  %v3735_v9 = vrot.slane %v12933_v53, %v10875_v50  ;;  %v4026_v61 = vor.u32 %v4024_v37, %v4022_v51  ;;  %v13105_v2 = vcombine.low %v7819_v41, %v7831_v19 }
 0x239   : > { %v3129_v30 = vsel %vm1409_vm0, %v3124_v28, %v3128_v45  ;;  %v3132_v26 = vor.u32 %v3130_v3, %v3128_v45  ;;  %v13107_v59 = vpop.permute.xlu0 %7858  ;;  %v8115_v60 = vshll.u32 %v12895_v34, 16  ;;  %v3136_v54 = vrot.slane %v3134_v18, 1 }
 0x23a   : > { %9434 = vmatprep.mubr.bf16.mxu0 %v3129_v30  ;;  %v13713_v5 = vmul.bf16 %v13711_v12, %v13712_v15  ;;  %v4155_v32 = vshrl.u32 %v4117_v33, 16  ;;  %v13113_v4 = vpop.permute.xlu1 %3834  ;;  %v13115_v53 = vrot.slane %v8112_v55, 7  ;;  %v4030_v51 = vrot.slane %v4028_v13, 1  ;;  %v13714_v55 = vld [vmem:[#allocation41_spill] sm:$0xff]  ;;  %v10187_v12 = vld [vmem:[#allocation6 + $0x210] sm:$0xff]  }
 0x23b   : > { %v13117_v37 = vrot.slane %v8120_v58, 7  ;;  %v4036_v28 = vshll.u32 %v13079_v38, 16  ;;  %v13120_v19 = vcombine.low %v3735_v9, %v3747_v11  ;;  %v3137_v34 = vsel %vm1409_vm0, %v3132_v26, %v3136_v54 }
 0x23c   : > { %v4151_v0 = vshrl.u32 %v13713_v5, 16  ;;  %v4157_v18 = vrot.slane %v4155_v32, 7  ;;  %v4158_v45 = vshll.u32 %v4117_v33, 16  ;;  %v3771_v3 = vrot.slane %v12969_v17, %v10875_v50  ;;  %9435 = vmatmul.mubr.bf16.gmra.mrb[60].mxu0 %v3137_v34 }
 0x23d   : > { %v3759_v41 = vrot.slane %v12980_v29, %v10875_v50  ;;  %9647 = vmatmul.mubr.bf16.vlgmr.msra.gmra.mrb[0].mxu1 %v13714_v55  ;;  %v13715_v13 = vshrl.u32 %v12901_v62, 16  ;;  %v7855_v23 = vrot.slane %v13046_v7, %v10875_v50  ;;  %v13132_v11 = vpop.permute.xlu0 %3822  ;;  %v4166_v17 = vshll.u32 %v12901_v62, 16 }
 0x23e   : > { %9679 = vmatpush3.bf16.msra.mxu1 %v12866_v56  ;;  %v4153_v33 = vrot.slane %v4151_v0, 7  ;;  %v4160_v9 = vor.u32 %v4158_v45, %v4157_v18  ;;  %9650 = vmatprep.mubr.bf16.mxu1 %v12734_v25  ;;  %v7843_v29 = vrot.slane %v13051_v10, %v10875_v50  ;;  %v13139_v30 = vpop.permute.xlu1 %7894  ;;  %v13142_v26 = vor.u32 %v8115_v60, %v13115_v53 }
 0x23f   : > { %v4165_v58 = vrot.slane %v13715_v13, 7  ;;  %v4032_v7 = vshrl.u32 %v13040_v39, 16  ;;  %v8123_v54 = vshll.u32 %v12947_v24, 16  ;;  %9680 = vmatprep.subr.bf16.mxu1 %v10186_v1  ;;  %v4119_v56 = vmul.bf16 %v12939_v22, %v13714_v55 }
 0x240   : > { %v8128_v15 = vshrl.u32 %v13000_v42, 16  ;;  %v4161_v62 = vsel %vm1587_vm1, %v4153_v33, %v4160_v9  ;;  %v13150_v10 = vcombine.low %v7843_v29, %v7855_v23  ;;  %v13153_v0 = vsel %vm1409_vm0, %v4026_v61, %v4030_v51  ;;  %v10188_v33 = vld [vmem:[#allocation6 + $0x218] sm:$0xff]  }
 0x241   : > { %v4168_v5 = vor.u32 %v4166_v17, %v4165_v58  ;;  %v4038_v60 = vrot.slane %v4036_v28, 1  ;;  %v4044_v39 = vshll.u32 %v13120_v19, 16  ;;  %9454 = vmatprep.mubr.bf16.mxu0 %v4161_v62  ;;  %v4171_v24 = vshrl.u32 %v4119_v56, 16  ;;  %v13156_v32 = vpop.permute.xlu0 %7882 }
 0x242   : > { %v4034_v34 = vor.u32 %v4032_v7, %v4030_v51  ;;  %v13159_v22 = vor.u32 %v8123_v54, %v13117_v37  ;;  %v13161_v45 = vcombine.low %v3759_v41, %v3771_v3  ;;  %9681 = vmatpush3.bf16.msra.mxu1 %v10186_v1  ;;  %v4120_v55 = vmul.bf16 %v12995_v21, %v12734_v25  ;;  %v13169_v51 = vpop.permute.xlu1 %3858  ;;  %v13717_v54 = vld [vmem:[#allocation16_spill] sm:$0xff] }
 0x243   : > { %v3795_v61 = vrot.slane %v13016_v52, %v10875_v50  ;;  %v3783_v28 = vrot.slane %v13025_v35, %v10875_v50  ;;  %v4173_v13 = vrot.slane %v4171_v24, 7  ;;  %v4174_v23 = vshll.u32 %v4119_v56, 16  ;;  %9682 = vmatprep.subr.bf16.mxu1 %v10187_v12  ;;  %v13716_v35 = vld [vmem:[#allocation15_spill] sm:$0xff] }
 0x244   : > { %v4040_v9 = vshrl.u32 %v13079_v38, 16  ;;  %v13172_v3 = vrot.slane %v8128_v15, 7  ;;  %v4169_v1 = vsel %vm1587_vm1, %v4157_v18, %v4168_v5  ;;  %v4179_v41 = vshrl.u32 %v4120_v55, 16 }
 0x245   : > { %v4039_v25 = vsel %vm1409_vm0, %v4034_v34, %v4038_v60  ;;  %v8131_v21 = vshll.u32 %v13000_v42, 16  ;;  %v4046_v52 = vrot.slane %v4044_v39, 1  ;;  %9455 = vmatmul.mubr.bf16.vlgmr.msra.gmra.mrb[32].mxu0 %v4169_v1  ;;  %9651 = vmatmul.mubr.bf16.gmra.mrb[4].mxu1 %v13716_v35  ;;  %v4176_v17 = vor.u32 %v4174_v23, %v4173_v13  ;;  %v13178_v29 = vpop.permute.xlu0 %3846  ;;  %v10189_v39 = vld [vmem:[#allocation6 + $0x220] sm:$0xff]  }
 0x246   : > { %v8136_v7 = vshrl.u32 %v13070_v43, 16  ;;  %9654 = vmatprep.mubr.bf16.mxu1 %v13717_v54  ;;  %v4181_v38 = vrot.slane %v4179_v41, 7  ;;  %v4182_v56 = vshll.u32 %v4120_v55, 16  ;;  %9683 = vmatpush3.bf16.msra.mxu1 %v10187_v12  ;;  %v4121_v18 = vmul.bf16 %v13019_v14, %v13716_v35  ;;  %v10190_v35 = vld [vmem:[#allocation6 + $0x228] sm:$0xff]  }
 0x247   : > { %v4048_v15 = vshrl.u32 %v13120_v19, 16  ;;  %v4052_v42 = vshll.u32 %v13161_v45, 16  ;;  %v13186_v62 = vcombine.low %v3783_v28, %v3795_v61  ;;  %v4177_v5 = vsel %vm1587_vm1, %v4165_v58, %v4176_v17  ;;  %9684 = vmatprep.subr.bf16.mxu1 %v10188_v33  ;;  %v13197_v28 = vpop.permute.xlu1 %7918 }
 0x248   : > { %v4042_v24 = vor.u32 %v4040_v9, %v4038_v60  ;;  %v13190_v34 = vor.u32 %v8131_v21, %v13172_v3  ;;  %9458 = vmatprep.mubr.bf16.mxu0 %v4177_v5  ;;  %v4184_v55 = vor.u32 %v4182_v56, %v4181_v38  ;;  %v4187_v12 = vshrl.u32 %v4121_v18, 16 }
 0x249   : > { %v4050_v23 = vor.u32 %v4048_v15, %v4046_v52  ;;  %v8139_v14 = vshll.u32 %v13070_v43, 16  ;;  %v3819_v19 = vrot.slane %v13064_v48, %v10875_v50  ;;  %v3807_v61 = vrot.slane %v13077_v44, %v10875_v50  ;;  %v13203_v41 = vpop.permute.xlu0 %7906 }
 0x24a   : > { %v13199_v58 = vrot.slane %v8136_v7, 7  ;;  %v4189_v60 = vrot.slane %v4187_v12, 7  ;;  %v4190_v9 = vshll.u32 %v4121_v18, 16  ;;  %v4122_v1 = vmul.bf16 %v13098_v63, %v13717_v54  ;;  %9685 = vmatpush3.bf16.msra.mxu1 %v10188_v33  ;;  %v13718_v54 = vld [vmem:[#allocation25_spill] sm:$0xff] }
 0x24b   : > { %v4054_v21 = vrot.slane %v4052_v42, 1  ;;  %v8144_v43 = vshrl.u32 %v13105_v2, 16  ;;  %v4060_v48 = vshll.u32 %v13186_v62, 16  ;;  %v3843_v44 = vrot.slane %v13113_v4, %v10875_v50  ;;  %9686 = vmatprep.subr.bf16.mxu1 %v10189_v39 }
 0x24c   : > { %v4185_v17 = vsel %vm1587_vm1, %v4173_v13, %v4184_v55  ;;  %v4192_v7 = vor.u32 %v4190_v9, %v4189_v60  ;;  %v3831_v56 = vrot.slane %v13132_v11, %v10875_v50  ;;  %v4195_v63 = vshrl.u32 %v4122_v1, 16 }
 0x24d   : > { %v13212_v33 = vcombine.low %v3807_v61, %v3819_v19  ;;  %9459 = vmatmul.mubr.bf16.gmra.mrb[36].mxu0 %v4185_v17  ;;  %9655 = vmatmul.mubr.bf16.gmra.mrb[8].mxu1 %v13718_v54  ;;  %v4198_v18 = vshll.u32 %v4122_v1, 16  ;;  %v4123_v15 = vmul.bf16 %v13153_v0, %v13718_v54  ;;  %v3867_v4 = vrot.slane %v13169_v51, %v10875_v50  ;;  %v10191_v19 = vld [vmem:[#allocation6 + $0x230] sm:$0xff]  }
 0x24e   : > { %v4193_v42 = vsel %vm1587_vm1, %v4181_v38, %v4192_v7  ;;  %9658 = vmatprep.mubr.bf16.mxu1 %v12853_v20  ;;  %v4197_v13 = vrot.slane %v4195_v63, 7  ;;  %v3855_v11 = vrot.slane %v13178_v29, %v10875_v50  ;;  %v4124_v5 = vmul.bf16 %v4039_v25, %v12853_v20  ;;  %9687 = vmatpush3.bf16.msra.mxu1 %v10189_v39  ;;  %v13230_v38 = vpop.permute.xlu1 %7942  ;;  %v13233_v25 = vpop.permute.xlu0 %7930 }
 0x24f   : > { %v4047_v55 = vsel %vm1409_vm0, %v4042_v24, %v4046_v52  ;;  %v13226_v12 = vor.u32 %v8139_v14, %v13199_v58  ;;  %v4056_v0 = vshrl.u32 %v13161_v45, 16  ;;  %v8147_v51 = vshll.u32 %v13105_v2, 16  ;;  %9462 = vmatprep.mubr.bf16.mxu0 %v4193_v42  ;;  %9688 = vmatprep.subr.bf16.mxu1 %v10190_v35 }
 0x250   : > { %v4055_v61 = vsel %vm1409_vm0, %v4050_v23, %v4054_v21  ;;  %v8900_v29 = vcombine.low %v3831_v56, %v3843_v44  ;;  %v4200_v9 = vor.u32 %v4198_v18, %v4197_v13  ;;  %v4203_v20 = vshrl.u32 %v4123_v15, 16  ;;  %v10192_v18 = vld [vmem:[#allocation6 + $0x238] sm:$0xff]  }
 0x251   : > { %v4058_v52 = vor.u32 %v4056_v0, %v4054_v21  ;;  %v13235_v39 = vrot.slane %v8144_v43, 7  ;;  %v4062_v24 = vrot.slane %v4060_v48, 1  ;;  %v4211_v14 = vshrl.u32 %v4124_v5, 16 }
 0x252   : > { %v4068_v45 = vshll.u32 %v13212_v33, 16  ;;  %v4205_v1 = vrot.slane %v4203_v20, 7  ;;  %v4206_v17 = vshll.u32 %v4123_v15, 16  ;;  %v13238_v7 = vcombine.low %v3855_v11, %v3867_v4  ;;  %9689 = vmatpush3.bf16.msra.mxu1 %v10190_v35  ;;  %v3883_v4 = vpop.permute.xlu1 %3882  ;;  %v3871_v0 = vpop.permute.xlu0 %3870 }
 0x253   : > { %v7879_v23 = vrot.slane %v13087_v6, %v10875_v50  ;;  %v7867_v44 = vrot.slane %v13107_v59, %v10875_v50  ;;  %v4125_v56 = vmul.bf16 %v4047_v55, %v12876_v16  ;;  %9690 = vmatprep.subr.bf16.mxu1 %v10191_v19  ;;  %v8259_v21 = vshrl.u32 %v12960_v8, 16 }
 0x254   : > { %v4076_v43 = vshll.u32 %v8900_v29, 16  ;;  %v4201_v48 = vsel %vm1587_vm1, %v4189_v60, %v4200_v9  ;;  %v4208_v63 = vor.u32 %v4206_v17, %v4205_v1  ;;  %v4213_v54 = vrot.slane %v4211_v14, 7 }
 0x255   : > { %v4063_v15 = vsel %vm1409_vm0, %v4058_v52, %v4062_v24  ;;  %v4064_v35 = vshrl.u32 %v13186_v62, 16  ;;  %v8152_v6 = vshrl.u32 %v13150_v10, 16  ;;  %9463 = vmatmul.mubr.bf16.gmra.mrb[40].mxu0 %v4201_v48  ;;  %9659 = vmatmul.mubr.bf16.gmra.mrb[12].mxu1 %v12876_v16  ;;  %v4219_v59 = vshrl.u32 %v4125_v56, 16 }
 0x256   : > { %v4070_v42 = vrot.slane %v4068_v45, 1  ;;  %v4209_v11 = vsel %vm1587_vm1, %v4197_v13, %v4208_v63  ;;  %9662 = vmatprep.mubr.bf16.mxu1 %v12909_v57  ;;  %v4084_v60 = vshll.u32 %v13238_v7, 16  ;;  %v4214_v55 = vshll.u32 %v4124_v5, 16  ;;  %9691 = vmatpush3.bf16.msra.mxu1 %v10191_v19 }
 0x257   : > { %v4066_v9 = vor.u32 %v4064_v35, %v4062_v24  ;;  %v13254_v20 = vcombine.low %v7867_v44, %v7879_v23  ;;  %9466 = vmatprep.mubr.bf16.mxu0 %v4209_v11  ;;  %v4221_v62 = vrot.slane %v4219_v59, 7  ;;  %v4222_v52 = vshll.u32 %v4125_v56, 16  ;;  %9692 = vmatprep.subr.bf16.mxu1 %v10192_v18 }
 0x258   : > { %v4078_v14 = vrot.slane %v4076_v43, 1  ;;  %v4216_v16 = vor.u32 %v4214_v55, %v4213_v54  ;;  %v4126_v17 = vmul.bf16 %v4055_v61, %v12909_v57  ;;  %v3891_v45 = vrot.slane %v3883_v4, %v10875_v50 }
 0x259   : > { %v4072_v13 = vshrl.u32 %v13212_v33, 16  ;;  %v4224_v48 = vor.u32 %v4222_v52, %v4221_v62  ;;  %v3879_v5 = vrot.slane %v3871_v0, %v10875_v50  ;;  %v4127_v24 = vmul.bf16 %v4063_v15, %v12949_v46 }
 0x25a   : > { %v4071_v23 = vsel %vm1409_vm0, %v4066_v9, %v4070_v42  ;;  %v4080_v44 = vshrl.u32 %v8900_v29, 16  ;;  %v4086_v63 = vrot.slane %v4084_v60, 1  ;;  %v4227_v56 = vshrl.u32 %v4126_v17, 16  ;;  %9693 = vmatpush3.bf16.msra.mxu1 %v10192_v18 }
 0x25b   : > { %v4074_v19 = vor.u32 %v4072_v13, %v4070_v42  ;;  %v8160_v43 = vshrl.u32 %v13254_v20, 16  ;;  %v8902_v35 = vcombine.low %v3879_v5, %v3891_v45  ;;  %v4235_v57 = vshrl.u32 %v4127_v24, 16 }
 0x25c   : > { %v4082_v61 = vor.u32 %v4080_v44, %v4078_v14  ;;  %v4217_v59 = vsel %vm1587_vm1, %v4205_v1, %v4216_v16  ;;  %v4229_v33 = vrot.slane %v4227_v56, 7  ;;  %v4230_v4 = vshll.u32 %v4126_v17, 16  ;;  %v13719_v44 = vld [vmem:[#allocation28_spill] sm:$0xff]  ;;  %v13720_v56 = vld [vmem:[#allocation26_spill] sm:$0xff] }
 0x25d   : > { %9467 = vmatmul.mubr.bf16.gmra.mrb[44].mxu0 %v4217_v59  ;;  %9663 = vmatmul.mubr.bf16.gmra.mrb[16].mxu1 %v12949_v46  ;;  %v4225_v15 = vsel %vm1587_vm1, %v4213_v54, %v4224_v48  ;;  %v4092_v11 = vshll.u32 %v8902_v35, 16  ;;  %v4237_v29 = vrot.slane %v4235_v57, 7  ;;  %v4128_v60 = vmul.bf16 %v4071_v23, %v12975_v36 }
 0x25e   : > { %v13270_v42 = vor.u32 %v8147_v51, %v13235_v39  ;;  %v4079_v18 = vsel %vm1409_vm0, %v4074_v19, %v4078_v14  ;;  %v4087_v1 = vsel %vm1409_vm0, %v4082_v61, %v4086_v63  ;;  %9470 = vmatprep.mubr.bf16.mxu0 %v4225_v15  ;;  %9666 = vmatprep.mubr.bf16.mxu1 %v12975_v36  ;;  %v4238_v55 = vshll.u32 %v4127_v24, 16  ;;  %v13282_v36 = vld [vmem:[#allocation2 + $0x88] sm:$0xff] }
 0x25f   : > { %v4232_v46 = vor.u32 %v4230_v4, %v4229_v33  ;;  %v4094_v0 = vrot.slane %v4092_v11, 1  ;;  %v4096_v54 = vshrl.u32 %v8902_v35, 16  ;;  %v4243_v9 = vshrl.u32 %v4128_v60, 16  ;;  %v7568_v4 = vld [vmem:[#allocation2 + $0x20] sm:$0xff] }
 0x260   : > { %v13275_v52 = vrot.slane %v8152_v6, 7  ;;  %v8155_v16 = vshll.u32 %v13150_v10, 16  ;;  %v4088_v2 = vshrl.u32 %v13238_v7, 16  ;;  %v8261_v51 = vshll.u32 %v12960_v8, 16 }
 0x261   : > { %v13280_v17 = vrot.slane %v8160_v43, 7  ;;  %v4098_v14 = vor.u32 %v4096_v54, %v4094_v0  ;;  %v4240_v45 = vor.u32 %v4238_v55, %v4237_v29  ;;  %v4245_v13 = vrot.slane %v4243_v9, 7 }
 0x262   : > { %v4090_v48 = vor.u32 %v4088_v2, %v4086_v63  ;;  %v4246_v5 = vshll.u32 %v4128_v60, 16  ;;  %v4129_v24 = vmul.bf16 %v4079_v18, %v13003_v40  ;;  %v4130_v6 = vmul.bf16 %v4087_v1, %v13038_v31 }
 0x263   : > { %v8163_v23 = vshll.u32 %v13254_v20, 16  ;;  %v4233_v10 = vsel %vm1587_vm1, %v4221_v62, %v4232_v46  ;;  %v4132_v7 = vmul.bf16 %v4098_v14, %v13282_v36  ;;  %v8094_v19 = vsel %vm1587_vm1, %v13720_v56, %v13719_v44 }
 0x264   : > { %v4095_v43 = vsel %vm1409_vm0, %v4090_v48, %v4094_v0  ;;  %v4248_v63 = vor.u32 %v4246_v5, %v4245_v13  ;;  %v4251_v35 = vshrl.u32 %v4129_v24, 16  ;;  %v8263_v57 = vrot.slane %v8261_v51, 1 }
 0x265   : > { %v13294_v61 = vor.u32 %v8155_v16, %v13275_v52  ;;  %v7903_v59 = vrot.slane %v13139_v30, %v10875_v50  ;;  %9471 = vmatmul.mubr.bf16.gmra.mrb[48].mxu0 %v4233_v10  ;;  %9667 = vmatmul.mubr.bf16.gmra.mrb[20].mxu1 %v13003_v40  ;;  %v4241_v20 = vsel %vm1587_vm1, %v4229_v33, %v4240_v45  ;;  %v4259_v62 = vshrl.u32 %v4130_v6, 16 }
 0x266   : > { %v13301_v15 = vor.u32 %v8163_v23, %v13280_v17  ;;  %9474 = vmatprep.mubr.bf16.mxu0 %v4241_v20  ;;  %9670 = vmatprep.mubr.bf16.mxu1 %v13038_v31  ;;  %v4253_v11 = vrot.slane %v4251_v35, 7  ;;  %v4254_v60 = vshll.u32 %v4129_v24, 16  ;;  %v8225_v18 = vmul.bf16 %v8094_v19, %v7568_v4  ;;  %v13721_v24 = vld [vmem:[#allocation29_spill] sm:$0xff] }
 0x267   : > { %v4261_v1 = vrot.slane %v4259_v62, 7  ;;  %v4262_v55 = vshll.u32 %v4130_v6, 16  ;;  %v4131_v46 = vmul.bf16 %v4095_v43, %v13058_v27  ;;  %v4275_v0 = vshrl.u32 %v4132_v7, 16  ;;  %v7571_v62 = vld [vmem:[#allocation2 + $0x38] sm:$0xff] }
 0x268   : > { %v4249_v40 = vsel %vm1587_vm1, %v4237_v29, %v4248_v63  ;;  %v4256_v54 = vor.u32 %v4254_v60, %v4253_v11  ;;  %v8264_v33 = vor.u32 %v8263_v57, %v8259_v21  ;;  %v8266_v9 = vshll.u32 %v8225_v18, 16  ;;  %v13722_v29 = vld [vmem:[#allocation17_spill] sm:$0xff] }
 0x269   : > { %v4264_v16 = vor.u32 %v4262_v55, %v4261_v1  ;;  %v8270_v2 = vshrl.u32 %v8225_v18, 16  ;;  %v4267_v51 = vshrl.u32 %v4131_v46, 16  ;;  %v4278_v14 = vshll.u32 %v4132_v7, 16  ;;  %v7570_v7 = vld [vmem:[#allocation2 + $0x30] sm:$0xff]  ;;  %v7572_v55 = vld [vmem:[#allocation2 + $0x40] sm:$0xff] }
 0x26a   : > { %v8268_v45 = vrot.slane %v8266_v9, 1  ;;  %v4270_v48 = vshll.u32 %v4131_v46, 16  ;;  %v4277_v5 = vrot.slane %v4275_v0, 7  ;;  %v8274_v23 = vshll.u32 %v13721_v24, 16  ;;  %v7573_v9 = vld [vmem:[#allocation2 + $0x48] sm:$0xff] }
 0x26b   : > { %v4257_v6 = vsel %vm1587_vm1, %v4245_v13, %v4256_v54  ;;  %v4265_v10 = vsel %vm1587_vm1, %v4253_v11, %v4264_v16  ;;  %v13311_v44 = vrot.slane %v4267_v51, 7  ;;  %v8110_v8 = vsel %vm1587_vm1, %v13722_v29, %v13094_v47  ;;  %v7574_v16 = vld [vmem:[#allocation2 + $0x50] sm:$0xff] }
 0x26c   : > { %v8269_v21 = vsel %vm1409_vm0, %v8264_v33, %v8268_v45  ;;  %v8272_v56 = vor.u32 %v8270_v2, %v8268_v45  ;;  %v8276_v19 = vrot.slane %v8274_v23, 1  ;;  %v8278_v43 = vshrl.u32 %v13721_v24, 16  ;;  %v7575_v2 = vld [vmem:[#allocation2 + $0x58] sm:$0xff] }
 0x26d   : > { %9475 = vmatmul.mubr.bf16.gmra.mrb[52].mxu0 %v4249_v40  ;;  %9671 = vmatmul.mubr.bf16.gmra.mrb[24].mxu1 %v13058_v27  ;;  %v4272_v13 = vor.u32 %v4270_v48, %v13311_v44  ;;  %v8227_v63 = vmul.bf16 %v8110_v8, %v7570_v7  ;;  %v8118_v35 = vsel %vm1587_vm1, %v13066_v49, %v13142_v26 }
 0x26e   : > { %9478 = vmatprep.mubr.bf16.mxu0 %v4257_v6  ;;  %9674 = vmatprep.mubr.bf16.mxu1 %v13282_v36  ;;  %v4280_v47 = vor.u32 %v4278_v14, %v4277_v5  ;;  %v13325_v57 = vsel %vm1409_vm0, %v8272_v56, %v8276_v19  ;;  %v8280_v20 = vor.u32 %v8278_v43, %v8276_v19  ;;  %v13344_v5 = vld [vmem:[#allocation2] sm:$0xff] }
 0x26f   : > { %v4273_v4 = vsel %vm1587_vm1, %v4261_v1, %v4272_v13  ;;  %v8282_v11 = vshll.u32 %v8227_v63, 16  ;;  %v8228_v60 = vmul.bf16 %v8118_v35, %v7571_v62  ;;  %v8286_v18 = vshrl.u32 %v8227_v63, 16 }
 0x270   : > { %v8126_v46 = vsel %vm1587_vm1, %v13115_v53, %v13159_v22  ;;  %v8134_v49 = vsel %vm1587_vm1, %v13117_v37, %v13190_v34  ;;  %v8142_v26 = vsel %vm1587_vm1, %v13172_v3, %v13226_v12  ;;  %v8150_v1 = vsel %vm1587_vm1, %v13199_v58, %v13270_v42 }
 0x271   : > { %v8284_v0 = vrot.slane %v8282_v11, 1  ;;  %v8290_v40 = vshll.u32 %v8228_v60, 16  ;;  %v8229_v54 = vmul.bf16 %v8126_v46, %v7572_v55  ;;  %v8294_v33 = vshrl.u32 %v8228_v60, 16  ;;  %v7577_v11 = vld [vmem:[#allocation2 + $0x68] sm:$0xff] }
 0x272   : > { %v8230_v53 = vmul.bf16 %v8134_v49, %v7573_v9  ;;  %v8231_v22 = vmul.bf16 %v8142_v26, %v7574_v16  ;;  %v8232_v51 = vmul.bf16 %v8150_v1, %v7575_v2  ;;  %v8158_v37 = vsel %vm1587_vm1, %v13235_v39, %v13294_v61  ;;  %v7576_v39 = vld [vmem:[#allocation2 + $0x60] sm:$0xff]  ;;  %v7955_v9 = vpop.permute.xlu0 %7954 }
 0x273   : > { %v8285_v3 = vsel %vm1409_vm0, %v8280_v20, %v8284_v0  ;;  %v8288_v34 = vor.u32 %v8286_v18, %v8284_v0  ;;  %v8292_v12 = vrot.slane %v8290_v40, 1  ;;  %v8298_v14 = vshll.u32 %v8229_v54, 16 }
 0x274   : > { %v8302_v58 = vshrl.u32 %v8229_v54, 16  ;;  %v8306_v42 = vshll.u32 %v8230_v53, 16  ;;  %v8310_v45 = vshrl.u32 %v8230_v53, 16  ;;  %v8314_v48 = vshll.u32 %v8231_v22, 16 }
 0x275   : > { %9479 = vmatmul.mubr.bf16.gmra.mrb[56].mxu0 %v4265_v10  ;;  %9675 = vmatmul.mubr.bf16.gmra.mrb[28].mxu1 %v13344_v5  ;;  %v8293_v24 = vsel %vm1409_vm0, %v8288_v34, %v8292_v12  ;;  %v8296_v23 = vor.u32 %v8294_v33, %v8292_v12  ;;  %v8300_v6 = vrot.slane %v8298_v14, 1  ;;  %v8318_v29 = vshrl.u32 %v8231_v22, 16  ;;  %v7967_v33 = vpop.permute.xlu1 %7966 }
 0x276   : > { %9694 = vmatprep.mubr.bf16.mxu1 %v8269_v21  ;;  %9482 = vmatprep.mubr.bf16.mxu0 %v4273_v4  ;;  %v8308_v61 = vrot.slane %v8306_v42, 1  ;;  %v8316_v8 = vrot.slane %v8314_v48, 1  ;;  %v8322_v56 = vshll.u32 %v8232_v51, 16  ;;  %v8233_v19 = vmul.bf16 %v8158_v37, %v7576_v39  ;;  %v7578_v39 = vld [vmem:[#allocation2 + $0x70] sm:$0xff] }
 0x277   : > { %v8301_v7 = vsel %vm1409_vm0, %v8296_v23, %v8300_v6  ;;  %v8304_v43 = vor.u32 %v8302_v58, %v8300_v6  ;;  %v8326_v10 = vshrl.u32 %v8232_v51, 16  ;;  %v8166_v13 = vsel %vm1587_vm1, %v13275_v52, %v13301_v15  ;;  %v7979_v51 = vpop.permute.xlu0 %7978 }
 0x278   : > { %v8312_v63 = vor.u32 %v8310_v45, %v8308_v61  ;;  %v8320_v35 = vor.u32 %v8318_v29, %v8316_v8  ;;  %v8324_v20 = vrot.slane %v8322_v56, 1  ;;  %v8330_v62 = vshll.u32 %v8233_v19, 16 }
 0x279   : > { %v7891_v21 = vrot.slane %v13156_v32, %v10875_v50  ;;  %v4281_v4 = vsel %vm1587_vm1, %v13311_v44, %v4280_v47  ;;  %v8309_v60 = vsel %vm1409_vm0, %v8304_v43, %v8308_v61  ;;  %v13357_v18 = vmul.bf16 %v8166_v13, %v7577_v11  ;;  %v7991_v22 = vpop.permute.xlu1 %7990 }
 0x27a   : > { %v8317_v55 = vsel %vm1409_vm0, %v8312_v63, %v8316_v8  ;;  %v8325_v46 = vsel %vm1409_vm0, %v8320_v35, %v8324_v20  ;;  %v8328_v52 = vor.u32 %v8326_v10, %v8324_v20  ;;  %v8332_v15 = vrot.slane %v8330_v62, 1 }
 0x27b   : > { %v8334_v49 = vshrl.u32 %v8233_v19, 16  ;;  %v8338_v26 = vshll.u32 %v13357_v18, 16  ;;  %v8986_v47 = vcombine.low %v7891_v21, %v7903_v59  ;;  %v7927_v40 = vrot.slane %v13197_v28, %v10875_v50 }
 0x27c   : > { %v8333_v1 = vsel %vm1409_vm0, %v8328_v52, %v8332_v15  ;;  %v7915_v54 = vrot.slane %v13203_v41, %v10875_v50  ;;  %v7939_v2 = vrot.slane %v13233_v25, %v10875_v50  ;;  %v7975_v41 = vrot.slane %v7967_v33, %v10875_v50  ;;  %v7583_v33 = vld [vmem:[#allocation2 + $0x98] sm:$0x1] }
 0x27d   : > { %9483 = vmatmul.mubr.bf16.gmra.mrb[60].mxu0 %v4281_v4  ;;  %9695 = vmatmul.mubr.bf16.vlgmr.msra.gmra.mrb[0].mxu1 %v13325_v57  ;;  %v8336_v32 = vor.u32 %v8334_v49, %v8332_v15  ;;  %v8340_v44 = vrot.slane %v8338_v26, 1  ;;  %v8168_v16 = vshrl.u32 %v8986_v47, 16  ;;  %v7951_v57 = vrot.slane %v13230_v38, %v10875_v50 }
 0x27e   : > { %9698 = vmatprep.mubr.bf16.mxu1 %v8285_v3  ;;  %v8987_v30 = vcombine.low %v7915_v54, %v7927_v40  ;;  %v8171_v28 = vshll.u32 %v8986_v47, 16  ;;  %v7963_v3 = vrot.slane %v7955_v9, %v10875_v50  ;;  %v7999_v38 = vrot.slane %v7991_v22, %v10875_v50 }
 0x27f   : > { %v8341_v0 = vsel %vm1409_vm0, %v8336_v32, %v8340_v44  ;;  %v8170_v59 = vrot.slane %v8168_v16, 7  ;;  %v8988_v53 = vcombine.low %v7939_v2, %v7951_v57  ;;  %v7987_v14 = vrot.slane %v7979_v51, %v10875_v50 }
 0x280   : > { %v8176_v37 = vshrl.u32 %v8987_v30, 16  ;;  %v8989_v58 = vcombine.low %v7963_v3, %v7975_v41  ;;  %v8179_v42 = vshll.u32 %v8987_v30, 16  ;;  %v8342_v20 = vshrl.u32 %v13357_v18, 16 }
 0x281   : > { %v8173_v34 = vor.u32 %v8171_v28, %v8170_v59  ;;  %v8184_v12 = vshrl.u32 %v8988_v53, 16  ;;  %v8990_v48 = vcombine.low %v7987_v14, %v7999_v38  ;;  %v8187_v6 = vshll.u32 %v8988_v53, 16 }
 0x282   : > { %v8178_v25 = vrot.slane %v8176_v37, 7  ;;  %v8192_v29 = vshrl.u32 %v8989_v58, 16  ;;  %v8195_v43 = vshll.u32 %v8989_v58, 16  ;;  %v8344_v4 = vor.u32 %v8342_v20, %v8340_v44 }
 0x283   : > { %v8186_v45 = vrot.slane %v8184_v12, 7  ;;  %v8200_v56 = vshrl.u32 %v8990_v48, 16  ;;  %v8203_v35 = vshll.u32 %v8990_v48, 16 }
 0x284   : > { %v8181_v23 = vor.u32 %v8179_v42, %v8178_v25  ;;  %v8194_v19 = vrot.slane %v8192_v29, 7 }
 0x285   : > { %9699 = vmatmul.mubr.bf16.gmra.mrb[4].mxu1 %v8293_v24  ;;  %v8174_v24 = vsel %vm1587_vm1, %v13280_v17, %v8173_v34  ;;  %v8189_v8 = vor.u32 %v8187_v6, %v8186_v45  ;;  %v8202_v10 = vrot.slane %v8200_v56, 7 }
 0x286   : > { %9702 = vmatprep.mubr.bf16.mxu1 %v8301_v7  ;;  %v8235_v61 = vmul.bf16 %v8174_v24, %v7578_v39  ;;  %v8182_v50 = vsel %vm1587_vm1, %v8170_v59, %v8181_v23  ;;  %v8197_v17 = vor.u32 %v8195_v43, %v8194_v19 }
 0x287   : > { %v8190_v13 = vsel %vm1587_vm1, %v8178_v25, %v8189_v8  ;;  %v8236_v63 = vmul.bf16 %v8182_v50, %v13038_v31  ;;  %v8205_v21 = vor.u32 %v8203_v35, %v8202_v10  ;;  %v8240_v2 = vmul.bf16 %v8202_v10, %v7583_v33 }
 0x288   : > { %v8346_v7 = vshll.u32 %v8235_v61, 16  ;;  %v8237_v11 = vmul.bf16 %v8190_v13, %v13058_v27  ;;  %v8350_v26 = vshrl.u32 %v8235_v61, 16 }
 0x289   : > { %v8206_v15 = vsel %vm1587_vm1, %v8194_v19, %v8205_v21  ;;  %v8358_v18 = vshrl.u32 %v8236_v63, 16  ;;  %v8386_v51 = vshll.u32 %v8240_v2, 16 }
 0x28a   : > { %v8348_v62 = vrot.slane %v8346_v7, 1  ;;  %v8362_v52 = vshll.u32 %v8237_v11, 16  ;;  %v8239_v27 = vmul.bf16 %v13344_v5, %v8206_v15  ;;  %v8366_v16 = vshrl.u32 %v8237_v11, 16 }
 0x28b   : > { %v8388_v37 = vrot.slane %v8386_v51, 1 }
 0x28c   : > { %v8352_v32 = vor.u32 %v8350_v26, %v8348_v62  ;;  %v8378_v54 = vshll.u32 %v8239_v27, 16  ;;  %v8382_v22 = vshrl.u32 %v8239_v27, 16 }
 0x28d   : > { %9703 = vmatmul.mubr.bf16.gmra.mrb[8].mxu1 %v8309_v60  ;;  %v8354_v60 = vshll.u32 %v8236_v63, 16 }
 0x28e   : > { %9706 = vmatprep.mubr.bf16.mxu1 %v8317_v55  ;;  %v8198_v55 = vsel %vm1587_vm1, %v8186_v45, %v8197_v17 }
 0x28f   : > { %v8356_v31 = vrot.slane %v8354_v60, 1  ;;  %v8238_v49 = vmul.bf16 %v8198_v55, %v13282_v36  ;;  %v8380_v36 = vrot.slane %v8378_v54, 1 }
 0x291   : > { %v8360_v44 = vor.u32 %v8358_v18, %v8356_v31  ;;  %v8370_v47 = vshll.u32 %v8238_v49, 16  ;;  %v8357_v40 = vsel %vm1409_vm0, %v8352_v32, %v8356_v31  ;;  %v8374_v57 = vshrl.u32 %v8238_v49, 16 }
 0x292   : > { %v8384_v28 = vor.u32 %v8382_v22, %v8380_v36 }
 0x293   : > { %v8372_v9 = vrot.slane %v8370_v47, 1 }
 0x294   : > { %v8389_v41 = vsel %vm1409_vm0, %v8384_v28, %v8388_v37 }
 0x295   : > { %9707 = vmatmul.mubr.bf16.gmra.mrb[12].mxu1 %v8325_v46  ;;  %v8349_v46 = vsel %vm1409_vm0, %v8344_v4, %v8348_v62  ;;  %v8376_v59 = vor.u32 %v8374_v57, %v8372_v9 }
 0x296   : > { %9710 = vmatprep.mubr.bf16.mxu1 %v8333_v1  ;;  %v8364_v1 = vrot.slane %v8362_v52, 1 }
 0x297   : > { %v8381_v53 = vsel %vm1409_vm0, %v8376_v59, %v8380_v36 }
 0x298   : > { %v8368_v30 = vor.u32 %v8366_v16, %v8364_v1 }
 0x29a   : > { %v8373_v5 = vsel %vm1409_vm0, %v8368_v30, %v8372_v9 }
 0x29d   : > { %9711 = vmatmul.mubr.bf16.gmra.mrb[16].mxu1 %v8341_v0  ;;  %v8365_v0 = vsel %vm1409_vm0, %v8360_v44, %v8364_v1 }
 0x29e   : > { %9714 = vmatprep.mubr.bf16.mxu1 %v8349_v46 }
 0x2a5   : > { %9715 = vmatmul.mubr.bf16.gmra.mrb[20].mxu1 %v8357_v40 }
 0x2a6   : > { %9718 = vmatprep.mubr.bf16.mxu1 %v8365_v0 }
 0x2ad   : > { %9719 = vmatmul.mubr.bf16.gmra.mrb[24].mxu1 %v8373_v5 }
 0x2ae   : > { %9722 = vmatprep.mubr.bf16.mxu1 %v8381_v53 }
 0x2b5   : > { %9723 = vmatmul.mubr.bf16.gmra.mrb[28].mxu1 %v8389_v41 }
 0x318   : > { %v9456_v3 = vpop.f32.mrb[32].mxu0 }
 0x319   : > { %v4380_v34 = vpop.f32.mrb[33].mxu0 }
 0x31a   : > { %v9457_v12 = vpop.f32.mrb[34].mxu0 }
 0x31b   : > { %v4383_v38 = vpop.f32.mrb[35].mxu0 }
 0x320   : > { %v9460_v14 = vpop.f32.mrb[36].mxu0 }
 0x321   : > { %v4396_v25 = vpop.f32.mrb[37].mxu0 }
 0x322   : > { %v9461_v58 = vpop.f32.mrb[38].mxu0 }
 0x323   : > { %v4399_v42 = vpop.f32.mrb[39].mxu0 }
 0x328   : > { %v9464_v45 = vpop.f32.mrb[40].mxu0 }
 0x329   : > { %v4412_v48 = vpop.f32.mrb[41].mxu0 }
 0x32a   : > { %v9465_v24 = vpop.f32.mrb[42].mxu0 }
 0x32b   : > { %v4415_v23 = vpop.f32.mrb[43].mxu0 }
 0x330   : > { %v9468_v6 = vpop.f32.mrb[44].mxu0 }
 0x331   : > { %v4428_v29 = vpop.f32.mrb[45].mxu0 }
 0x332   : > { %v9469_v39 = vpop.f32.mrb[46].mxu0 }
 0x333   : > { %v13397_v61 = vpop.f32.mrb[47].mxu0 }
 0x338   : > { %v13399_v8 = vpop.f32.mrb[48].mxu0 }
 0x339   : > { %v13401_v56 = vpop.f32.mrb[49].mxu0 }
 0x33a   : > { %v13403_v19 = vpop.f32.mrb[50].mxu0 }
 0x33b   : > { %v13405_v50 = vpop.f32.mrb[51].mxu0 }
 0x340   : > { %v13407_v7 = vpop.f32.mrb[52].mxu0 }
 0x341   : > { %v13409_v43 = vpop.f32.mrb[53].mxu0 }
 0x342   : > { %v13411_v10 = vpop.f32.mrb[54].mxu0 }
 0x343   : > { %v13413_v13 = vpop.f32.mrb[55].mxu0 }
 0x348   : > { %v13415_v63 = vpop.f32.mrb[56].mxu0 }
 0x349   : > { %v13417_v17 = vpop.f32.mrb[57].mxu0 }
 0x34a   : > { %v13419_v35 = vpop.f32.mrb[58].mxu0 }
 0x34b   : > { %v13421_v20 = vpop.f32.mrb[59].mxu0 }
 0x350   : > { %v13423_v62 = vpop.f32.mrb[60].mxu0  ;;  %v9696_v11 = vpop.f32.mrb[0].mxu1 }
 0x351   : > { %v9728_v21 = vadd.f32 %v9696_v11, %v9456_v3  ;;  %v13425_v4 = vpop.f32.mrb[61].mxu0  ;;  %v8488_v60 = vpop.f32.mrb[1].mxu1 }
 0x352   : > { %v9731_v55 = vadd.f32 %v8488_v60, %v4380_v34  ;;  %v13427_v46 = vpop.f32.mrb[62].mxu0  ;;  %v9697_v52 = vpop.f32.mrb[2].mxu1 }
 0x353   : > { %8681 = vst [vmem:[%s13431_s21 + $0x10] sm:$0xff] %v9728_v21  ;;  %v9734_v15 = vadd.f32 %v9697_v52, %v9457_v12  ;;  %v13434_v31 = vpop.f32.mrb[63].mxu0  ;;  %v8491_v49 = vpop.f32.mrb[3].mxu1 }
 0x354   : > { %8679 = vst [vmem:[%s13431_s21] sm:$0xff] %v9731_v55  ;;  %v9737_v26 = vadd.f32 %v8491_v49, %v4383_v38 }
 0x355   : > { %8682 = vst [vmem:[%s13431_s21 + $0x18] sm:$0xff] %v9734_v15 }
 0x356   : > { %8680 = vst [vmem:[%s13431_s21 + $0x8] sm:$0xff] %v9737_v26 }
 0x358   : > { %v9700_v18 = vpop.f32.mrb[4].mxu1 }
 0x359   : > { %v9740_v1 = vadd.f32 %v9700_v18, %v9460_v14  ;;  %v8504_v27 = vpop.f32.mrb[5].mxu1 }
 0x35a   : > { %v9743_v32 = vadd.f32 %v8504_v27, %v4396_v25  ;;  %v9701_v44 = vpop.f32.mrb[6].mxu1 }
 0x35b   : > { %8685 = vst [vmem:[%s13431_s21 + $0x30] sm:$0xff] %v9740_v1  ;;  %v9746_v47 = vadd.f32 %v9701_v44, %v9461_v58  ;;  %v8507_v40 = vpop.f32.mrb[7].mxu1 }
 0x35c   : > { %8683 = vst [vmem:[%s13431_s21 + $0x20] sm:$0xff] %v9743_v32  ;;  %v9749_v0 = vadd.f32 %v8507_v40, %v4399_v42 }
 0x35d   : > { %8686 = vst [vmem:[%s13431_s21 + $0x38] sm:$0xff] %v9746_v47 }
 0x35e   : > { %8684 = vst [vmem:[%s13431_s21 + $0x28] sm:$0xff] %v9749_v0 }
 0x360   : > { %v9704_v54 = vpop.f32.mrb[8].mxu1 }
 0x361   : > { %v9752_v33 = vadd.f32 %v9704_v54, %v9464_v45  ;;  %v8520_v9 = vpop.f32.mrb[9].mxu1 }
 0x362   : > { %v9755_v16 = vadd.f32 %v8520_v9, %v4412_v48  ;;  %v9705_v57 = vpop.f32.mrb[10].mxu1 }
 0x363   : > { %8689 = vst [vmem:[%s13431_s21 + $0x50] sm:$0xff] %v9752_v33  ;;  %v9758_v36 = vadd.f32 %v9705_v57, %v9465_v24  ;;  %v8523_v2 = vpop.f32.mrb[11].mxu1 }
 0x364   : > { %8687 = vst [vmem:[%s13431_s21 + $0x40] sm:$0xff] %v9755_v16  ;;  %v9761_v30 = vadd.f32 %v8523_v2, %v4415_v23 }
 0x365   : > { %8690 = vst [vmem:[%s13431_s21 + $0x58] sm:$0xff] %v9758_v36 }
 0x366   : > { %8688 = vst [vmem:[%s13431_s21 + $0x48] sm:$0xff] %v9761_v30 }
 0x368   : > { %v9708_v59 = vpop.f32.mrb[12].mxu1 }
 0x369   : > { %v9764_v5 = vadd.f32 %v9708_v59, %v9468_v6  ;;  %v8536_v53 = vpop.f32.mrb[13].mxu1 }
 0x36a   : > { %v9767_v22 = vadd.f32 %v8536_v53, %v4428_v29  ;;  %v9709_v51 = vpop.f32.mrb[14].mxu1 }
 0x36b   : > { %8693 = vst [vmem:[%s13431_s21 + $0x70] sm:$0xff] %v9764_v5  ;;  %v9770_v28 = vadd.f32 %v9709_v51, %v9469_v39  ;;  %v8539_v37 = vpop.f32.mrb[15].mxu1 }
 0x36c   : > { %8691 = vst [vmem:[%s13431_s21 + $0x60] sm:$0xff] %v9767_v22  ;;  %v9773_v41 = vadd.f32 %v8539_v37, %v13397_v61 }
 0x36d   : > { %8694 = vst [vmem:[%s13431_s21 + $0x78] sm:$0xff] %v9770_v28 }
 0x36e   : > { %8692 = vst [vmem:[%s13431_s21 + $0x68] sm:$0xff] %v9773_v41 }
 0x370   : > { %v9712_v3 = vpop.f32.mrb[16].mxu1 }
 0x371   : > { %v9776_v34 = vadd.f32 %v9712_v3, %v13399_v8  ;;  %v8552_v12 = vpop.f32.mrb[17].mxu1 }
 0x372   : > { %v9779_v38 = vadd.f32 %v8552_v12, %v13401_v56  ;;  %v9713_v14 = vpop.f32.mrb[18].mxu1 }
 0x373   : > { %8697 = vst [vmem:[%s13431_s21 + $0x90] sm:$0xff] %v9776_v34  ;;  %v9782_v25 = vadd.f32 %v9713_v14, %v13403_v19  ;;  %v8555_v58 = vpop.f32.mrb[19].mxu1 }
 0x374   : > { %8695 = vst [vmem:[%s13431_s21 + $0x80] sm:$0xff] %v9779_v38  ;;  %v9785_v42 = vadd.f32 %v8555_v58, %v13405_v50 }
 0x375   : > { %8698 = vst [vmem:[%s13431_s21 + $0x98] sm:$0xff] %v9782_v25 }
 0x376   : > { %8696 = vst [vmem:[%s13431_s21 + $0x88] sm:$0xff] %v9785_v42 }
 0x378   : > { %v9716_v45 = vpop.f32.mrb[20].mxu1 }
 0x379   : > { %v9788_v48 = vadd.f32 %v9716_v45, %v13407_v7  ;;  %v8568_v24 = vpop.f32.mrb[21].mxu1 }
 0x37a   : > { %v9791_v23 = vadd.f32 %v8568_v24, %v13409_v43  ;;  %v9717_v6 = vpop.f32.mrb[22].mxu1 }
 0x37b   : > { %8701 = vst [vmem:[%s13431_s21 + $0xb0] sm:$0xff] %v9788_v48  ;;  %v9794_v29 = vadd.f32 %v9717_v6, %v13411_v10  ;;  %v8571_v39 = vpop.f32.mrb[23].mxu1 }
 0x37c   : > { %8699 = vst [vmem:[%s13431_s21 + $0xa0] sm:$0xff] %v9791_v23  ;;  %v9797_v61 = vadd.f32 %v8571_v39, %v13413_v13 }
 0x37d   : > { %8702 = vst [vmem:[%s13431_s21 + $0xb8] sm:$0xff] %v9794_v29 }
 0x37e   : > { %8700 = vst [vmem:[%s13431_s21 + $0xa8] sm:$0xff] %v9797_v61 }
 0x380   : > { %v9720_v8 = vpop.f32.mrb[24].mxu1 }
 0x381   : > { %v9800_v56 = vadd.f32 %v9720_v8, %v13415_v63  ;;  %v8584_v19 = vpop.f32.mrb[25].mxu1 }
 0x382   : > { %v9803_v50 = vadd.f32 %v8584_v19, %v13417_v17  ;;  %v9721_v7 = vpop.f32.mrb[26].mxu1 }
 0x383   : > { %8705 = vst [vmem:[%s13431_s21 + $0xd0] sm:$0xff] %v9800_v56  ;;  %v9806_v43 = vadd.f32 %v9721_v7, %v13419_v35  ;;  %v8587_v10 = vpop.f32.mrb[27].mxu1 }
 0x384   : > { %8703 = vst [vmem:[%s13431_s21 + $0xc0] sm:$0xff] %v9803_v50  ;;  %v9809_v13 = vadd.f32 %v8587_v10, %v13421_v20 }
 0x385   : > { %8706 = vst [vmem:[%s13431_s21 + $0xd8] sm:$0xff] %v9806_v43 }
 0x386   : > { %8704 = vst [vmem:[%s13431_s21 + $0xc8] sm:$0xff] %v9809_v13 }
 0x388   : > { %v9724_v11 = vpop.f32.mrb[28].mxu1 }
 0x389   : > { %v9812_v63 = vadd.f32 %v9724_v11, %v13423_v62  ;;  %v8600_v17 = vpop.f32.mrb[29].mxu1 }
 0x38a   : > { %v9815_v21 = vadd.f32 %v8600_v17, %v13425_v4  ;;  %v9725_v35 = vpop.f32.mrb[30].mxu1 }
 0x38b   : > { %8709 = vst [vmem:[%s13431_s21 + $0xf0] sm:$0xff] %v9812_v63  ;;  %v9818_v60 = vadd.f32 %v9725_v35, %v13427_v46  ;;  %v8603_v55 = vpop.f32.mrb[31].mxu1 }
 0x38c   : > { %8707 = vst [vmem:[%s13431_s21 + $0xe0] sm:$0xff] %v9815_v21  ;;  %v9821_v20 = vadd.f32 %v8603_v55, %v13434_v31 }
 0x38d   : > { %8710 = vst [vmem:[%s13431_s21 + $0xf8] sm:$0xff] %v9818_v60 }
 0x38e   : > { %8708 = vst [vmem:[%s13431_s21 + $0xe8] sm:$0xff] %v9821_v20 }
 0x38f   : > { %10269 = shalt.err (!%p10266_p7)
}
 0x390   : > { %s10270_s23 = scalar_lea.hbm %s13485_s17, 4096  ;;  %s10274_s21 = scalar_lea.hbm %s13544_s9, 8192 }
 0x391   : > { %p10271_p9 = scmp.ne.s32.totalorder %s13485_s17, %s10270_s23  ;;  %p10275_p5 = scmp.lt.u32.totalorder %s13485_s17, %s13544_s9 }
 0x392   : > { %p10276_p11 = scmp.lt.u32.totalorder %s10274_s21, %s10270_s23  ;;  %p10278_p4 = scmp.lt.u32.totalorder %s10270_s23, %s13485_s17 }
 0x393   : > { %p10272_p2 = pnand %p10271_p9, %p10480_p12 }
 0x394   : > { %p10277_p1 = por %p10276_p11, %p10275_p5 }
 0x395   : > { %p10273_p0 = pneg %p10272_p2 }
 0x396   : > { %p10279_p6 = por %p10278_p4, %p10277_p1 }
 0x398   : > { %p10280_p8 = pnand %p10279_p6, %p10273_p0 }
 0x39a   : > { %10283 = shalt.err (!%p10280_p8)
}
 0x39b   : > { %s10337_s14 = smov 128   ;;  %s10338_s26 = smov 8  }
 0x39c   : > { %10052 = dma.vmem_to_hbm [thread:$0]  (%p10480_p12), %s13487_s25, 4096, %s13485_s17, %s8712_s13, %s10337_s14, %s10337_s14, %s10338_s26  }
 0x39d PF: > { %s13723_s22 = sld [smem:[#allocation12_spill]]  ;;  %s8740_s15 = sand.u32 1, %s10314_s30  }
 0x39e   : > { %p13725_p13 = scmp.ge.s32.totalorder %s10326_s12, 2  ;;  %s8741_s19 = scalar_lea.sflag [#allocation5], %s8740_s15 }
 0x3a3   : > { %p13724_p10 = scmp.ne.s32.totalorder %s13723_s22, 0 }
 0x3a5   : > { %p10063_p3 = pnand %p13725_p13, %p13724_p10 }
 0x3a7   : > { %10309 = dma.done.wait (!%p10063_p3), %s8741_s19, 4096  }
 0x3a8   : > { %10311 = vsyncadd (!%p10063_p3), %s8741_s19, 4294963200  ;;  %s13726_s12 = sld [smem:[#allocation13_spill]]  ;;  %s13727_s30 = smov %s10318_s10 }
 0x3a9   : > { %s13728_s10 = smov %s10322_s11  ;;  %s13729_s11 = smov %s10476_s28 }
 0x3ae   : > { %p23_p7 = scmp.ge.s32.totalorder %s13726_s12, 4  }
 0x3b0   :  { %25 = sbr.rel (!%p23_p7) target bundleno = 6 (0x6), region = 113 }
 0x3b7   :  { %8746 = vsyncpa [#allocation4], 1 }
 0x3b8   :  { %8748 = vsyncpa [#allocation4 + $0x1], 1 }
 0x3b9   :  { %8749 = vsyncpa [#allocation7], 1 }
 0x3ba   :  { %8750 = vsyncpa [#allocation5], 1 }
 0x3bb   :  { %8752 = vsyncpa [#allocation5 + $0x1], 1 }

</bundles_post_ra>
